<compile_context>
chip_gen: v7x
topology: tpu7x:2x2x1
jax: 0.10.0
libtpu: 0.0.40
codegen_flags: <defaults>
</compile_context>

<pallas_src>
import jax
import jax.numpy as jnp
import numpy as np
from jax.experimental import pallas as pl
from jax.experimental.pallas import tpu as pltpu


def tgcn_kernel(x_ref, adj_ref, w_hh_ref, w_hc_ref, w_xh_ref, w_xc_ref,
                b_g_ref, b_c_ref, w_out_ref, b_out_ref, out_ref):
    """One grid step = one block of BB batch elements (rows ordered batch-major).

    x_ref   : (BB*N, T)    inputs
    adj_ref : (N, N)       normalized adjacency (shared by all batches)
    out_ref : (BB*N, OPAD) lane-padded output of the final linear layer
    """
    BN, T = x_ref.shape
    N = adj_ref.shape[0]
    BB = BN // N
    H = w_hc_ref.shape[0]
    f32 = jnp.float32

    adj = adj_ref[...]                       # (N, N)
    w_hh = w_hh_ref[...]                     # (H, 2H) fused r|u gate weight
    w_hc = w_hc_ref[...]                     # (H, H)

    # Hoisted broadcasts (JAX does not CSE broadcast_in_dim): one each,
    # reused by every (batch, time) step.
    wxg = jnp.broadcast_to(w_xh_ref[...], (N, 2 * H))
    wxc = jnp.broadcast_to(w_xc_ref[...], (N, H))
    bg = jnp.broadcast_to(b_g_ref[...], (N, 2 * H))
    bc = jnp.broadcast_to(b_c_ref[...], (N, H))

    x_all = x_ref[...]                       # (BB*N, T)

    def step(h, axc):
        # x / bias contributions: the (N,1) lane broadcast happens once per
        # term and is reused by the gate and candidate expressions.
        gx = axc * wxg + bg                                        # (N, 2H)
        cx = axc * wxc + bc                                        # (N, H)
        # adj@h computed ONCE and reused by both gates through the fused
        # (H, 2H) gate weight -> 4 matmuls per step instead of 6.
        ah = jnp.dot(adj, h, preferred_element_type=f32)           # (N, H)
        ru = jnp.dot(ah, w_hh, preferred_element_type=f32) + gx    # (N, 2H)
        r = jax.nn.sigmoid(ru[:, :H])
        u = jax.nn.sigmoid(ru[:, H:])
        c = jnp.tanh(
            jnp.dot(adj, jnp.dot(r * h, w_hc, preferred_element_type=f32),
                    preferred_element_type=f32) + cx)
        return c + u * (h - c)                                     # == u*h+(1-u)*c

    h_finals = []
    for b in range(BB):                                            # BB is static
        xb = x_all[b * N:(b + 1) * N, :]      # sublane-aligned (N % 8 == 0)
        # adj distributes over the x-dependent gate terms:
        #   adj @ (x_t * w_x) = (adj @ x)_t * w_x,
        # so one (N,N)@(N,T) matmul replaces T per-step adj matmuls.
        ax = jnp.dot(adj, xb, preferred_element_type=f32)          # (N, T)

        h = jnp.zeros((N, H), f32)
        if T <= 8:
            # Small T: full static unroll (max scheduler visibility).
            for t in range(T):
                h = step(h, ax[:, t:t + 1])
        else:
            # Larger T: bound vreg live ranges with a real loop.
            def body(t, h_carry):
                axc = jax.lax.dynamic_slice_in_dim(ax, t, 1, axis=1)
                return step(h_carry, axc)
            h = jax.lax.fori_loop(0, T, body, h)
        h_finals.append(h)

    h_all = h_finals[0] if BB == 1 else jnp.concatenate(h_finals, axis=0)
    # Final linear projection; lane-dense (128-padded) single unmasked store.
    out_ref[...] = (jnp.dot(h_all, w_out_ref[...], preferred_element_type=f32)
                    + b_out_ref[...])


def _default_batch_block(B):
    """Generation-aware default: split the batch across 2 TensorCores when present."""
    try:
        kind = jax.devices()[0].device_kind.lower()
    except Exception:
        kind = ""
    two_core = any(tag in kind for tag in ("v7", "v5p", "v4"))
    if two_core and B >= 2 and B % 2 == 0:
        return B // 2
    return B


def temporal_gcn_forward(x, adj, params, pred_steps=15, batch_block=None):
    """x: [B, T, N, 1], adj: [N, N] -> [B, pred_steps, N, O]."""
    B, T, N, input_dim = x.shape
    assert input_dim == 1, "reference module squeezes input_dim == 1"
    H = params["w_hc"].shape[0]
    O = params["w_out"].shape[1]
    f32 = jnp.float32

    if batch_block is None:
        batch_block = _default_batch_block(B)
    assert B % batch_block == 0
    BB = batch_block
    nblk = B // BB
    # Per-batch row slices inside the kernel must be sublane-aligned.
    assert (BB == 1) or (N % 8 == 0), "batch row-fold needs N % 8 == 0"
    OPAD = 128 * ((O + 127) // 128)          # lane-dense padded output width

    # ---- preprocessing (plain XLA, once) ----
    # GCN normalization D^-1/2 (A+I) D^-1/2 via elementwise row/col scaling.
    a = adj.astype(f32) + jnp.eye(N, dtype=f32)
    d = a.sum(1) ** -0.5
    d = jnp.where(jnp.isinf(d), 0.0, d)
    adj_norm = (d[:, None] * a) * d[None, :]                 # (N, N) -- no kron

    # x: [B, T, N, 1] -> (B*N, T), batch-major rows.
    x_k = jnp.transpose(x[..., 0], (0, 2, 1)).reshape(B * N, T).astype(f32)

    # Gate weights/biases kept FUSED (r|u) so the kernel does one (H,2H) matmul.
    w_xh = params["w_xh"].astype(f32).reshape(1, 2 * H)
    w_hh = params["w_hh"].astype(f32)
    b_g = params["b_g"].astype(f32).reshape(1, 2 * H)
    w_xc = params["w_xc"].astype(f32).reshape(1, H)
    w_hc = params["w_hc"].astype(f32)
    b_c = params["b_c"].astype(f32).reshape(1, H)

    # Output projection padded to a lane-dense slab.
    w_out = params["w_out"].astype(f32)
    b_out = params["b_out"].astype(f32).reshape(1, O)
    w_out_p = jnp.zeros((H, OPAD), f32).at[:, :O].set(w_out)
    b_out_p = jnp.zeros((1, OPAD), f32).at[:, :O].set(b_out)

    inv = lambda i: (0, 0)
    kernel = pl.pallas_call(
        tgcn_kernel,
        out_shape=jax.ShapeDtypeStruct((B * N, OPAD), f32),
        grid_spec=pltpu.PrefetchScalarGridSpec(
            num_scalar_prefetch=0,
            grid=(nblk,),
            in_specs=[
                pl.BlockSpec((BB * N, T), lambda i: (i, 0)),   # x (batch block)
                pl.BlockSpec((N, N), inv),                     # adjacency
                pl.BlockSpec((H, 2 * H), inv),                 # w_hh (fused r|u)
                pl.BlockSpec((H, H), inv),                     # w_hc
                pl.BlockSpec((1, 2 * H), inv),                 # w_xh (fused r|u)
                pl.BlockSpec((1, H), inv),                     # w_xc
                pl.BlockSpec((1, 2 * H), inv),                 # b_g (fused r|u)
                pl.BlockSpec((1, H), inv),                     # b_c
                pl.BlockSpec((H, OPAD), inv),                  # w_out (lane-padded)
                pl.BlockSpec((1, OPAD), inv),                  # b_out (lane-padded)
            ],
            out_specs=pl.BlockSpec((BB * N, OPAD), lambda i: (i, 0)),
        ),
        compiler_params=pltpu.CompilerParams(
            dimension_semantics=("parallel",)),
    )
    out_pad = kernel(x_k, adj_norm, w_hh, w_hc, w_xh, w_xc, b_g, b_c,
                     w_out_p, b_out_p)                         # (B*N, OPAD)
    out = out_pad[:, :O].reshape(B, N, O)
    # expand -> output_layer -> permute in the reference collapses to a
    # broadcast over pred_steps (every predicted step is identical).
    return jnp.broadcast_to(out[:, None, :, :], (B, pred_steps, N, O))


def temporal_gcn_reference(x, adj, params, pred_steps=15):
    """Pure-JAX reference mirroring the PyTorch forward."""
    B, T, N, _ = x.shape
    H = params["w_hc"].shape[0]
    a = adj + jnp.eye(N, dtype=adj.dtype)
    d = a.sum(1) ** -0.5
    d = jnp.where(jnp.isinf(d), 0.0, d)
    adj_norm = jnp.diag(d) @ a @ jnp.diag(d)
    x_r = x[..., 0]                                            # [B, T, N]
    h = jnp.zeros((B, N, H), jnp.float32)
    for t in range(T):
        inp = x_r[:, t, :][..., None]                          # [B, N, 1]
        comb = inp @ params["w_xh"] + h @ params["w_hh"]
        gates = jax.nn.sigmoid(
            jnp.einsum("ij,bjk->bik", adj_norm, comb) + params["b_g"])
        r, u = gates[..., :H], gates[..., H:]
        comb_c = inp @ params["w_xc"] + (r * h) @ params["w_hc"]
        c = jnp.tanh(
            jnp.einsum("ij,bjk->bik", adj_norm, comb_c) + params["b_c"])
        h = u * h + (1.0 - u) * c
    out = h @ params["w_out"] + params["b_out"]                # [B, N, O]
    O = out.shape[-1]
    return jnp.broadcast_to(out[:, None, :, :], (B, pred_steps, N, O))


def _xavier_uniform(key, shape):
    fan_in, fan_out = shape[0], shape[1]
    limit = (6.0 / (fan_in + fan_out)) ** 0.5
    return jax.random.uniform(key, shape, jnp.float32, -limit, limit)


if __name__ == "__main__":
    B, T, N, H, O, PRED = 2, 8, 16, 32, 4, 15

    key = jax.random.PRNGKey(0)
    keys = jax.random.split(key, 8)
    params = {
        "w_xh": _xavier_uniform(keys[0], (1, 2 * H)),
        "w_hh": _xavier_uniform(keys[1], (H, 2 * H)),
        "b_g": jnp.ones((1, 2 * H), jnp.float32),              # init.constant_(1.0)
        "w_xc": _xavier_uniform(keys[2], (1, H)),
        "w_hc": _xavier_uniform(keys[3], (H, H)),
        "b_c": jnp.zeros((1, H), jnp.float32),                 # init.constant_(0.0)
        "w_out": _xavier_uniform(keys[4], (H, O)),             # nn.Linear W^T
        "b_out": jax.random.uniform(keys[5], (1, O), jnp.float32, -0.1, 0.1),
    }

    x = jax.random.normal(keys[6], (B, T, N, 1), jnp.float32)
    adj = jax.random.uniform(keys[7], (N, N), jnp.float32)     # nonnegative weights

    out = temporal_gcn_forward(x, adj, params, pred_steps=PRED)
    out = jax.block_until_ready(out)
    assert out.shape == (B, PRED, N, O)

    ref = temporal_gcn_reference(x, adj, params, pred_steps=PRED)
    np.testing.assert_allclose(np.asarray(out), np.asarray(ref),
                               rtol=1e-4, atol=1e-4)
    print("KERNEL_OK")
</pallas_src>

<mosaic_0001>
module attributes {stable_mosaic.version = 11 : i64} {
  func.func @tgcn_kernel(%arg0: i32, %arg1: memref<32x8xf32, #tpu.memory_space<vmem>>, %arg2: memref<16x16xf32, #tpu.memory_space<vmem>>, %arg3: memref<32x64xf32, #tpu.memory_space<vmem>>, %arg4: memref<32x32xf32, #tpu.memory_space<vmem>>, %arg5: memref<1x64xf32, #tpu.memory_space<vmem>>, %arg6: memref<1x32xf32, #tpu.memory_space<vmem>>, %arg7: memref<1x64xf32, #tpu.memory_space<vmem>>, %arg8: memref<1x32xf32, #tpu.memory_space<vmem>>, %arg9: memref<32x128xf32, #tpu.memory_space<vmem>>, %arg10: memref<1x128xf32, #tpu.memory_space<vmem>>, %arg11: memref<32x128xf32, #tpu.memory_space<vmem>>) attributes {dimension_semantics = [#tpu.dimension_semantics<parallel>], iteration_bounds = array<i64: 1>, scalar_prefetch = 0 : i64, scratch_operands = 0 : i64, tpu.core_type = #tpu.core_type<tc>, window_params = [{transform_indices = @transform_0, window_bounds = array<i64: 32, 8>}, {pipeline_mode = #tpu.pipeline_mode<synchronous>, transform_indices = @transform_1, window_bounds = array<i64: 16, 16>}, {pipeline_mode = #tpu.pipeline_mode<synchronous>, transform_indices = @transform_2, window_bounds = array<i64: 32, 64>}, {pipeline_mode = #tpu.pipeline_mode<synchronous>, transform_indices = @transform_3, window_bounds = array<i64: 32, 32>}, {pipeline_mode = #tpu.pipeline_mode<synchronous>, transform_indices = @transform_4, window_bounds = array<i64: 1, 64>}, {pipeline_mode = #tpu.pipeline_mode<synchronous>, transform_indices = @transform_5, window_bounds = array<i64: 1, 32>}, {pipeline_mode = #tpu.pipeline_mode<synchronous>, transform_indices = @transform_6, window_bounds = array<i64: 1, 64>}, {pipeline_mode = #tpu.pipeline_mode<synchronous>, transform_indices = @transform_7, window_bounds = array<i64: 1, 32>}, {pipeline_mode = #tpu.pipeline_mode<synchronous>, transform_indices = @transform_8, window_bounds = array<i64: 32, 128>}, {pipeline_mode = #tpu.pipeline_mode<synchronous>, transform_indices = @transform_9, window_bounds = array<i64: 1, 128>}, {transform_indices = @transform_10, window_bounds = array<i64: 32, 128>}]} {
    %c0 = arith.constant 0 : index
    %c0_0 = arith.constant 0 : index
    %0 = vector.load %arg2[%c0, %c0_0] : memref<16x16xf32, #tpu.memory_space<vmem>>, vector<16x16xf32>
    %c0_1 = arith.constant 0 : index
    %c0_2 = arith.constant 0 : index
    %1 = vector.load %arg3[%c0_1, %c0_2] : memref<32x64xf32, #tpu.memory_space<vmem>>, vector<32x64xf32>
    %c0_3 = arith.constant 0 : index
    %c0_4 = arith.constant 0 : index
    %2 = vector.load %arg4[%c0_3, %c0_4] : memref<32x32xf32, #tpu.memory_space<vmem>>, vector<32x32xf32>
    %c0_5 = arith.constant 0 : index
    %c0_6 = arith.constant 0 : index
    %3 = vector.load %arg5[%c0_5, %c0_6] : memref<1x64xf32, #tpu.memory_space<vmem>>, vector<1x64xf32>
    %4 = vector.shape_cast %3 : vector<1x64xf32> to vector<1x64xf32>
    %5 = vector.broadcast %4 : vector<1x64xf32> to vector<16x64xf32>
    %c0_7 = arith.constant 0 : index
    %c0_8 = arith.constant 0 : index
    %6 = vector.load %arg6[%c0_7, %c0_8] : memref<1x32xf32, #tpu.memory_space<vmem>>, vector<1x32xf32>
    %7 = vector.shape_cast %6 : vector<1x32xf32> to vector<1x32xf32>
    %8 = vector.broadcast %7 : vector<1x32xf32> to vector<16x32xf32>
    %c0_9 = arith.constant 0 : index
    %c0_10 = arith.constant 0 : index
    %9 = vector.load %arg7[%c0_9, %c0_10] : memref<1x64xf32, #tpu.memory_space<vmem>>, vector<1x64xf32>
    %10 = vector.shape_cast %9 : vector<1x64xf32> to vector<1x64xf32>
    %11 = vector.broadcast %10 : vector<1x64xf32> to vector<16x64xf32>
    %c0_11 = arith.constant 0 : index
    %c0_12 = arith.constant 0 : index
    %12 = vector.load %arg8[%c0_11, %c0_12] : memref<1x32xf32, #tpu.memory_space<vmem>>, vector<1x32xf32>
    %13 = vector.shape_cast %12 : vector<1x32xf32> to vector<1x32xf32>
    %14 = vector.broadcast %13 : vector<1x32xf32> to vector<16x32xf32>
    %c0_13 = arith.constant 0 : index
    %c0_14 = arith.constant 0 : index
    %15 = vector.load %arg1[%c0_13, %c0_14] : memref<32x8xf32, #tpu.memory_space<vmem>>, vector<32x8xf32>
    %16 = vector.extract_strided_slice %15 {offsets = [0, 0], sizes = [16, 8], strides = [1, 1]} : vector<32x8xf32> to vector<16x8xf32>
    %cst = arith.constant dense<0.000000e+00> : vector<16x8xf32>
    %17 = tpu.matmul %0, %16, %cst {dimension_numbers = #tpu.dot_dimension_numbers<[1], [0], [0], [1], [0, 0, 1, 1], [], []>} : vector<16x16xf32>, vector<16x8xf32>, vector<16x8xf32> -> vector<16x8xf32>
    %cst_15 = arith.constant 0.000000e+00 : f32
    %18 = vector.broadcast %cst_15 : f32 to vector<16x32xf32>
    %19 = vector.extract_strided_slice %17 {offsets = [0, 0], sizes = [16, 1], strides = [1, 1]} : vector<16x8xf32> to vector<16x1xf32>
    %20 = vector.broadcast %19 : vector<16x1xf32> to vector<16x64xf32>
    %21 = arith.mulf %20, %5 : vector<16x64xf32>
    %22 = arith.addf %21, %11 : vector<16x64xf32>
    %23 = vector.broadcast %19 : vector<16x1xf32> to vector<16x32xf32>
    %24 = arith.mulf %23, %8 : vector<16x32xf32>
    %25 = arith.addf %24, %14 : vector<16x32xf32>
    %cst_16 = arith.constant dense<0.000000e+00> : vector<16x32xf32>
    %26 = tpu.matmul %0, %18, %cst_16 {dimension_numbers = #tpu.dot_dimension_numbers<[1], [0], [0], [1], [0, 0, 1, 1], [], []>} : vector<16x16xf32>, vector<16x32xf32>, vector<16x32xf32> -> vector<16x32xf32>
    %cst_17 = arith.constant dense<0.000000e+00> : vector<16x64xf32>
    %27 = tpu.matmul %26, %1, %cst_17 {dimension_numbers = #tpu.dot_dimension_numbers<[1], [0], [0], [1], [0, 0, 1, 1], [], []>} : vector<16x32xf32>, vector<32x64xf32>, vector<16x64xf32> -> vector<16x64xf32>
    %28 = arith.addf %27, %22 : vector<16x64xf32>
    %29 = vector.extract_strided_slice %28 {offsets = [0, 0], sizes = [16, 32], strides = [1, 1]} : vector<16x64xf32> to vector<16x32xf32>
    %30 = arith.negf %29 : vector<16x32xf32>
    %31 = math.exp %30 : vector<16x32xf32>
    %cst_18 = arith.constant 1.000000e+00 : f32
    %32 = vector.broadcast %cst_18 : f32 to vector<16x32xf32>
    %33 = arith.addf %32, %31 : vector<16x32xf32>
    %34 = arith.divf %32, %33 : vector<16x32xf32>
    %35 = vector.extract_strided_slice %28 {offsets = [0, 32], sizes = [16, 32], strides = [1, 1]} : vector<16x64xf32> to vector<16x32xf32>
    %36 = arith.negf %35 : vector<16x32xf32>
    %37 = math.exp %36 : vector<16x32xf32>
    %cst_19 = arith.constant 1.000000e+00 : f32
    %38 = vector.broadcast %cst_19 : f32 to vector<16x32xf32>
    %39 = arith.addf %38, %37 : vector<16x32xf32>
    %40 = arith.divf %38, %39 : vector<16x32xf32>
    %41 = arith.mulf %34, %18 : vector<16x32xf32>
    %cst_20 = arith.constant dense<0.000000e+00> : vector<16x32xf32>
    %42 = tpu.matmul %41, %2, %cst_20 {dimension_numbers = #tpu.dot_dimension_numbers<[1], [0], [0], [1], [0, 0, 1, 1], [], []>} : vector<16x32xf32>, vector<32x32xf32>, vector<16x32xf32> -> vector<16x32xf32>
    %cst_21 = arith.constant dense<0.000000e+00> : vector<16x32xf32>
    %43 = tpu.matmul %0, %42, %cst_21 {dimension_numbers = #tpu.dot_dimension_numbers<[1], [0], [0], [1], [0, 0, 1, 1], [], []>} : vector<16x16xf32>, vector<16x32xf32>, vector<16x32xf32> -> vector<16x32xf32>
    %44 = arith.addf %43, %25 : vector<16x32xf32>
    %45 = math.tanh %44 : vector<16x32xf32>
    %46 = arith.subf %18, %45 : vector<16x32xf32>
    %47 = arith.mulf %40, %46 : vector<16x32xf32>
    %48 = arith.addf %45, %47 : vector<16x32xf32>
    %49 = vector.extract_strided_slice %17 {offsets = [0, 1], sizes = [16, 1], strides = [1, 1]} : vector<16x8xf32> to vector<16x1xf32>
    %50 = vector.broadcast %49 : vector<16x1xf32> to vector<16x64xf32>
    %51 = arith.mulf %50, %5 : vector<16x64xf32>
    %52 = arith.addf %51, %11 : vector<16x64xf32>
    %53 = vector.broadcast %49 : vector<16x1xf32> to vector<16x32xf32>
    %54 = arith.mulf %53, %8 : vector<16x32xf32>
    %55 = arith.addf %54, %14 : vector<16x32xf32>
    %cst_22 = arith.constant dense<0.000000e+00> : vector<16x32xf32>
    %56 = tpu.matmul %0, %48, %cst_22 {dimension_numbers = #tpu.dot_dimension_numbers<[1], [0], [0], [1], [0, 0, 1, 1], [], []>} : vector<16x16xf32>, vector<16x32xf32>, vector<16x32xf32> -> vector<16x32xf32>
    %cst_23 = arith.constant dense<0.000000e+00> : vector<16x64xf32>
    %57 = tpu.matmul %56, %1, %cst_23 {dimension_numbers = #tpu.dot_dimension_numbers<[1], [0], [0], [1], [0, 0, 1, 1], [], []>} : vector<16x32xf32>, vector<32x64xf32>, vector<16x64xf32> -> vector<16x64xf32>
    %58 = arith.addf %57, %52 : vector<16x64xf32>
    %59 = vector.extract_strided_slice %58 {offsets = [0, 0], sizes = [16, 32], strides = [1, 1]} : vector<16x64xf32> to vector<16x32xf32>
    %60 = arith.negf %59 : vector<16x32xf32>
    %61 = math.exp %60 : vector<16x32xf32>
    %cst_24 = arith.constant 1.000000e+00 : f32
    %62 = vector.broadcast %cst_24 : f32 to vector<16x32xf32>
    %63 = arith.addf %62, %61 : vector<16x32xf32>
    %64 = arith.divf %62, %63 : vector<16x32xf32>
    %65 = vector.extract_strided_slice %58 {offsets = [0, 32], sizes = [16, 32], strides = [1, 1]} : vector<16x64xf32> to vector<16x32xf32>
    %66 = arith.negf %65 : vector<16x32xf32>
    %67 = math.exp %66 : vector<16x32xf32>
    %cst_25 = arith.constant 1.000000e+00 : f32
    %68 = vector.broadcast %cst_25 : f32 to vector<16x32xf32>
    %69 = arith.addf %68, %67 : vector<16x32xf32>
    %70 = arith.divf %68, %69 : vector<16x32xf32>
    %71 = arith.mulf %64, %48 : vector<16x32xf32>
    %cst_26 = arith.constant dense<0.000000e+00> : vector<16x32xf32>
    %72 = tpu.matmul %71, %2, %cst_26 {dimension_numbers = #tpu.dot_dimension_numbers<[1], [0], [0], [1], [0, 0, 1, 1], [], []>} : vector<16x32xf32>, vector<32x32xf32>, vector<16x32xf32> -> vector<16x32xf32>
    %cst_27 = arith.constant dense<0.000000e+00> : vector<16x32xf32>
    %73 = tpu.matmul %0, %72, %cst_27 {dimension_numbers = #tpu.dot_dimension_numbers<[1], [0], [0], [1], [0, 0, 1, 1], [], []>} : vector<16x16xf32>, vector<16x32xf32>, vector<16x32xf32> -> vector<16x32xf32>
    %74 = arith.addf %73, %55 : vector<16x32xf32>
    %75 = math.tanh %74 : vector<16x32xf32>
    %76 = arith.subf %48, %75 : vector<16x32xf32>
    %77 = arith.mulf %70, %76 : vector<16x32xf32>
    %78 = arith.addf %75, %77 : vector<16x32xf32>
    %79 = vector.extract_strided_slice %17 {offsets = [0, 2], sizes = [16, 1], strides = [1, 1]} : vector<16x8xf32> to vector<16x1xf32>
    %80 = vector.broadcast %79 : vector<16x1xf32> to vector<16x64xf32>
    %81 = arith.mulf %80, %5 : vector<16x64xf32>
    %82 = arith.addf %81, %11 : vector<16x64xf32>
    %83 = vector.broadcast %79 : vector<16x1xf32> to vector<16x32xf32>
    %84 = arith.mulf %83, %8 : vector<16x32xf32>
    %85 = arith.addf %84, %14 : vector<16x32xf32>
    %cst_28 = arith.constant dense<0.000000e+00> : vector<16x32xf32>
    %86 = tpu.matmul %0, %78, %cst_28 {dimension_numbers = #tpu.dot_dimension_numbers<[1], [0], [0], [1], [0, 0, 1, 1], [], []>} : vector<16x16xf32>, vector<16x32xf32>, vector<16x32xf32> -> vector<16x32xf32>
    %cst_29 = arith.constant dense<0.000000e+00> : vector<16x64xf32>
    %87 = tpu.matmul %86, %1, %cst_29 {dimension_numbers = #tpu.dot_dimension_numbers<[1], [0], [0], [1], [0, 0, 1, 1], [], []>} : vector<16x32xf32>, vector<32x64xf32>, vector<16x64xf32> -> vector<16x64xf32>
    %88 = arith.addf %87, %82 : vector<16x64xf32>
    %89 = vector.extract_strided_slice %88 {offsets = [0, 0], sizes = [16, 32], strides = [1, 1]} : vector<16x64xf32> to vector<16x32xf32>
    %90 = arith.negf %89 : vector<16x32xf32>
    %91 = math.exp %90 : vector<16x32xf32>
    %cst_30 = arith.constant 1.000000e+00 : f32
    %92 = vector.broadcast %cst_30 : f32 to vector<16x32xf32>
    %93 = arith.addf %92, %91 : vector<16x32xf32>
    %94 = arith.divf %92, %93 : vector<16x32xf32>
    %95 = vector.extract_strided_slice %88 {offsets = [0, 32], sizes = [16, 32], strides = [1, 1]} : vector<16x64xf32> to vector<16x32xf32>
    %96 = arith.negf %95 : vector<16x32xf32>
    %97 = math.exp %96 : vector<16x32xf32>
    %cst_31 = arith.constant 1.000000e+00 : f32
    %98 = vector.broadcast %cst_31 : f32 to vector<16x32xf32>
    %99 = arith.addf %98, %97 : vector<16x32xf32>
    %100 = arith.divf %98, %99 : vector<16x32xf32>
    %101 = arith.mulf %94, %78 : vector<16x32xf32>
    %cst_32 = arith.constant dense<0.000000e+00> : vector<16x32xf32>
    %102 = tpu.matmul %101, %2, %cst_32 {dimension_numbers = #tpu.dot_dimension_numbers<[1], [0], [0], [1], [0, 0, 1, 1], [], []>} : vector<16x32xf32>, vector<32x32xf32>, vector<16x32xf32> -> vector<16x32xf32>
    %cst_33 = arith.constant dense<0.000000e+00> : vector<16x32xf32>
    %103 = tpu.matmul %0, %102, %cst_33 {dimension_numbers = #tpu.dot_dimension_numbers<[1], [0], [0], [1], [0, 0, 1, 1], [], []>} : vector<16x16xf32>, vector<16x32xf32>, vector<16x32xf32> -> vector<16x32xf32>
    %104 = arith.addf %103, %85 : vector<16x32xf32>
    %105 = math.tanh %104 : vector<16x32xf32>
    %106 = arith.subf %78, %105 : vector<16x32xf32>
    %107 = arith.mulf %100, %106 : vector<16x32xf32>
    %108 = arith.addf %105, %107 : vector<16x32xf32>
    %109 = vector.extract_strided_slice %17 {offsets = [0, 3], sizes = [16, 1], strides = [1, 1]} : vector<16x8xf32> to vector<16x1xf32>
    %110 = vector.broadcast %109 : vector<16x1xf32> to vector<16x64xf32>
    %111 = arith.mulf %110, %5 : vector<16x64xf32>
    %112 = arith.addf %111, %11 : vector<16x64xf32>
    %113 = vector.broadcast %109 : vector<16x1xf32> to vector<16x32xf32>
    %114 = arith.mulf %113, %8 : vector<16x32xf32>
    %115 = arith.addf %114, %14 : vector<16x32xf32>
    %cst_34 = arith.constant dense<0.000000e+00> : vector<16x32xf32>
    %116 = tpu.matmul %0, %108, %cst_34 {dimension_numbers = #tpu.dot_dimension_numbers<[1], [0], [0], [1], [0, 0, 1, 1], [], []>} : vector<16x16xf32>, vector<16x32xf32>, vector<16x32xf32> -> vector<16x32xf32>
    %cst_35 = arith.constant dense<0.000000e+00> : vector<16x64xf32>
    %117 = tpu.matmul %116, %1, %cst_35 {dimension_numbers = #tpu.dot_dimension_numbers<[1], [0], [0], [1], [0, 0, 1, 1], [], []>} : vector<16x32xf32>, vector<32x64xf32>, vector<16x64xf32> -> vector<16x64xf32>
    %118 = arith.addf %117, %112 : vector<16x64xf32>
    %119 = vector.extract_strided_slice %118 {offsets = [0, 0], sizes = [16, 32], strides = [1, 1]} : vector<16x64xf32> to vector<16x32xf32>
    %120 = arith.negf %119 : vector<16x32xf32>
    %121 = math.exp %120 : vector<16x32xf32>
    %cst_36 = arith.constant 1.000000e+00 : f32
    %122 = vector.broadcast %cst_36 : f32 to vector<16x32xf32>
    %123 = arith.addf %122, %121 : vector<16x32xf32>
    %124 = arith.divf %122, %123 : vector<16x32xf32>
    %125 = vector.extract_strided_slice %118 {offsets = [0, 32], sizes = [16, 32], strides = [1, 1]} : vector<16x64xf32> to vector<16x32xf32>
    %126 = arith.negf %125 : vector<16x32xf32>
    %127 = math.exp %126 : vector<16x32xf32>
    %cst_37 = arith.constant 1.000000e+00 : f32
    %128 = vector.broadcast %cst_37 : f32 to vector<16x32xf32>
    %129 = arith.addf %128, %127 : vector<16x32xf32>
    %130 = arith.divf %128, %129 : vector<16x32xf32>
    %131 = arith.mulf %124, %108 : vector<16x32xf32>
    %cst_38 = arith.constant dense<0.000000e+00> : vector<16x32xf32>
    %132 = tpu.matmul %131, %2, %cst_38 {dimension_numbers = #tpu.dot_dimension_numbers<[1], [0], [0], [1], [0, 0, 1, 1], [], []>} : vector<16x32xf32>, vector<32x32xf32>, vector<16x32xf32> -> vector<16x32xf32>
    %cst_39 = arith.constant dense<0.000000e+00> : vector<16x32xf32>
    %133 = tpu.matmul %0, %132, %cst_39 {dimension_numbers = #tpu.dot_dimension_numbers<[1], [0], [0], [1], [0, 0, 1, 1], [], []>} : vector<16x16xf32>, vector<16x32xf32>, vector<16x32xf32> -> vector<16x32xf32>
    %134 = arith.addf %133, %115 : vector<16x32xf32>
    %135 = math.tanh %134 : vector<16x32xf32>
    %136 = arith.subf %108, %135 : vector<16x32xf32>
    %137 = arith.mulf %130, %136 : vector<16x32xf32>
    %138 = arith.addf %135, %137 : vector<16x32xf32>
    %139 = vector.extract_strided_slice %17 {offsets = [0, 4], sizes = [16, 1], strides = [1, 1]} : vector<16x8xf32> to vector<16x1xf32>
    %140 = vector.broadcast %139 : vector<16x1xf32> to vector<16x64xf32>
    %141 = arith.mulf %140, %5 : vector<16x64xf32>
    %142 = arith.addf %141, %11 : vector<16x64xf32>
    %143 = vector.broadcast %139 : vector<16x1xf32> to vector<16x32xf32>
    %144 = arith.mulf %143, %8 : vector<16x32xf32>
    %145 = arith.addf %144, %14 : vector<16x32xf32>
    %cst_40 = arith.constant dense<0.000000e+00> : vector<16x32xf32>
    %146 = tpu.matmul %0, %138, %cst_40 {dimension_numbers = #tpu.dot_dimension_numbers<[1], [0], [0], [1], [0, 0, 1, 1], [], []>} : vector<16x16xf32>, vector<16x32xf32>, vector<16x32xf32> -> vector<16x32xf32>
    %cst_41 = arith.constant dense<0.000000e+00> : vector<16x64xf32>
    %147 = tpu.matmul %146, %1, %cst_41 {dimension_numbers = #tpu.dot_dimension_numbers<[1], [0], [0], [1], [0, 0, 1, 1], [], []>} : vector<16x32xf32>, vector<32x64xf32>, vector<16x64xf32> -> vector<16x64xf32>
    %148 = arith.addf %147, %142 : vector<16x64xf32>
    %149 = vector.extract_strided_slice %148 {offsets = [0, 0], sizes = [16, 32], strides = [1, 1]} : vector<16x64xf32> to vector<16x32xf32>
    %150 = arith.negf %149 : vector<16x32xf32>
    %151 = math.exp %150 : vector<16x32xf32>
    %cst_42 = arith.constant 1.000000e+00 : f32
    %152 = vector.broadcast %cst_42 : f32 to vector<16x32xf32>
    %153 = arith.addf %152, %151 : vector<16x32xf32>
    %154 = arith.divf %152, %153 : vector<16x32xf32>
    %155 = vector.extract_strided_slice %148 {offsets = [0, 32], sizes = [16, 32], strides = [1, 1]} : vector<16x64xf32> to vector<16x32xf32>
    %156 = arith.negf %155 : vector<16x32xf32>
    %157 = math.exp %156 : vector<16x32xf32>
    %cst_43 = arith.constant 1.000000e+00 : f32
    %158 = vector.broadcast %cst_43 : f32 to vector<16x32xf32>
    %159 = arith.addf %158, %157 : vector<16x32xf32>
    %160 = arith.divf %158, %159 : vector<16x32xf32>
    %161 = arith.mulf %154, %138 : vector<16x32xf32>
    %cst_44 = arith.constant dense<0.000000e+00> : vector<16x32xf32>
    %162 = tpu.matmul %161, %2, %cst_44 {dimension_numbers = #tpu.dot_dimension_numbers<[1], [0], [0], [1], [0, 0, 1, 1], [], []>} : vector<16x32xf32>, vector<32x32xf32>, vector<16x32xf32> -> vector<16x32xf32>
    %cst_45 = arith.constant dense<0.000000e+00> : vector<16x32xf32>
    %163 = tpu.matmul %0, %162, %cst_45 {dimension_numbers = #tpu.dot_dimension_numbers<[1], [0], [0], [1], [0, 0, 1, 1], [], []>} : vector<16x16xf32>, vector<16x32xf32>, vector<16x32xf32> -> vector<16x32xf32>
    %164 = arith.addf %163, %145 : vector<16x32xf32>
    %165 = math.tanh %164 : vector<16x32xf32>
    %166 = arith.subf %138, %165 : vector<16x32xf32>
    %167 = arith.mulf %160, %166 : vector<16x32xf32>
    %168 = arith.addf %165, %167 : vector<16x32xf32>
    %169 = vector.extract_strided_slice %17 {offsets = [0, 5], sizes = [16, 1], strides = [1, 1]} : vector<16x8xf32> to vector<16x1xf32>
    %170 = vector.broadcast %169 : vector<16x1xf32> to vector<16x64xf32>
    %171 = arith.mulf %170, %5 : vector<16x64xf32>
    %172 = arith.addf %171, %11 : vector<16x64xf32>
    %173 = vector.broadcast %169 : vector<16x1xf32> to vector<16x32xf32>
    %174 = arith.mulf %173, %8 : vector<16x32xf32>
    %175 = arith.addf %174, %14 : vector<16x32xf32>
    %cst_46 = arith.constant dense<0.000000e+00> : vector<16x32xf32>
    %176 = tpu.matmul %0, %168, %cst_46 {dimension_numbers = #tpu.dot_dimension_numbers<[1], [0], [0], [1], [0, 0, 1, 1], [], []>} : vector<16x16xf32>, vector<16x32xf32>, vector<16x32xf32> -> vector<16x32xf32>
    %cst_47 = arith.constant dense<0.000000e+00> : vector<16x64xf32>
    %177 = tpu.matmul %176, %1, %cst_47 {dimension_numbers = #tpu.dot_dimension_numbers<[1], [0], [0], [1], [0, 0, 1, 1], [], []>} : vector<16x32xf32>, vector<32x64xf32>, vector<16x64xf32> -> vector<16x64xf32>
    %178 = arith.addf %177, %172 : vector<16x64xf32>
    %179 = vector.extract_strided_slice %178 {offsets = [0, 0], sizes = [16, 32], strides = [1, 1]} : vector<16x64xf32> to vector<16x32xf32>
    %180 = arith.negf %179 : vector<16x32xf32>
    %181 = math.exp %180 : vector<16x32xf32>
    %cst_48 = arith.constant 1.000000e+00 : f32
    %182 = vector.broadcast %cst_48 : f32 to vector<16x32xf32>
    %183 = arith.addf %182, %181 : vector<16x32xf32>
    %184 = arith.divf %182, %183 : vector<16x32xf32>
    %185 = vector.extract_strided_slice %178 {offsets = [0, 32], sizes = [16, 32], strides = [1, 1]} : vector<16x64xf32> to vector<16x32xf32>
    %186 = arith.negf %185 : vector<16x32xf32>
    %187 = math.exp %186 : vector<16x32xf32>
    %cst_49 = arith.constant 1.000000e+00 : f32
    %188 = vector.broadcast %cst_49 : f32 to vector<16x32xf32>
    %189 = arith.addf %188, %187 : vector<16x32xf32>
    %190 = arith.divf %188, %189 : vector<16x32xf32>
    %191 = arith.mulf %184, %168 : vector<16x32xf32>
    %cst_50 = arith.constant dense<0.000000e+00> : vector<16x32xf32>
    %192 = tpu.matmul %191, %2, %cst_50 {dimension_numbers = #tpu.dot_dimension_numbers<[1], [0], [0], [1], [0, 0, 1, 1], [], []>} : vector<16x32xf32>, vector<32x32xf32>, vector<16x32xf32> -> vector<16x32xf32>
    %cst_51 = arith.constant dense<0.000000e+00> : vector<16x32xf32>
    %193 = tpu.matmul %0, %192, %cst_51 {dimension_numbers = #tpu.dot_dimension_numbers<[1], [0], [0], [1], [0, 0, 1, 1], [], []>} : vector<16x16xf32>, vector<16x32xf32>, vector<16x32xf32> -> vector<16x32xf32>
    %194 = arith.addf %193, %175 : vector<16x32xf32>
    %195 = math.tanh %194 : vector<16x32xf32>
    %196 = arith.subf %168, %195 : vector<16x32xf32>
    %197 = arith.mulf %190, %196 : vector<16x32xf32>
    %198 = arith.addf %195, %197 : vector<16x32xf32>
    %199 = vector.extract_strided_slice %17 {offsets = [0, 6], sizes = [16, 1], strides = [1, 1]} : vector<16x8xf32> to vector<16x1xf32>
    %200 = vector.broadcast %199 : vector<16x1xf32> to vector<16x64xf32>
    %201 = arith.mulf %200, %5 : vector<16x64xf32>
    %202 = arith.addf %201, %11 : vector<16x64xf32>
    %203 = vector.broadcast %199 : vector<16x1xf32> to vector<16x32xf32>
    %204 = arith.mulf %203, %8 : vector<16x32xf32>
    %205 = arith.addf %204, %14 : vector<16x32xf32>
    %cst_52 = arith.constant dense<0.000000e+00> : vector<16x32xf32>
    %206 = tpu.matmul %0, %198, %cst_52 {dimension_numbers = #tpu.dot_dimension_numbers<[1], [0], [0], [1], [0, 0, 1, 1], [], []>} : vector<16x16xf32>, vector<16x32xf32>, vector<16x32xf32> -> vector<16x32xf32>
    %cst_53 = arith.constant dense<0.000000e+00> : vector<16x64xf32>
    %207 = tpu.matmul %206, %1, %cst_53 {dimension_numbers = #tpu.dot_dimension_numbers<[1], [0], [0], [1], [0, 0, 1, 1], [], []>} : vector<16x32xf32>, vector<32x64xf32>, vector<16x64xf32> -> vector<16x64xf32>
    %208 = arith.addf %207, %202 : vector<16x64xf32>
    %209 = vector.extract_strided_slice %208 {offsets = [0, 0], sizes = [16, 32], strides = [1, 1]} : vector<16x64xf32> to vector<16x32xf32>
    %210 = arith.negf %209 : vector<16x32xf32>
    %211 = math.exp %210 : vector<16x32xf32>
    %cst_54 = arith.constant 1.000000e+00 : f32
    %212 = vector.broadcast %cst_54 : f32 to vector<16x32xf32>
    %213 = arith.addf %212, %211 : vector<16x32xf32>
    %214 = arith.divf %212, %213 : vector<16x32xf32>
    %215 = vector.extract_strided_slice %208 {offsets = [0, 32], sizes = [16, 32], strides = [1, 1]} : vector<16x64xf32> to vector<16x32xf32>
    %216 = arith.negf %215 : vector<16x32xf32>
    %217 = math.exp %216 : vector<16x32xf32>
    %cst_55 = arith.constant 1.000000e+00 : f32
    %218 = vector.broadcast %cst_55 : f32 to vector<16x32xf32>
    %219 = arith.addf %218, %217 : vector<16x32xf32>
    %220 = arith.divf %218, %219 : vector<16x32xf32>
    %221 = arith.mulf %214, %198 : vector<16x32xf32>
    %cst_56 = arith.constant dense<0.000000e+00> : vector<16x32xf32>
    %222 = tpu.matmul %221, %2, %cst_56 {dimension_numbers = #tpu.dot_dimension_numbers<[1], [0], [0], [1], [0, 0, 1, 1], [], []>} : vector<16x32xf32>, vector<32x32xf32>, vector<16x32xf32> -> vector<16x32xf32>
    %cst_57 = arith.constant dense<0.000000e+00> : vector<16x32xf32>
    %223 = tpu.matmul %0, %222, %cst_57 {dimension_numbers = #tpu.dot_dimension_numbers<[1], [0], [0], [1], [0, 0, 1, 1], [], []>} : vector<16x16xf32>, vector<16x32xf32>, vector<16x32xf32> -> vector<16x32xf32>
    %224 = arith.addf %223, %205 : vector<16x32xf32>
    %225 = math.tanh %224 : vector<16x32xf32>
    %226 = arith.subf %198, %225 : vector<16x32xf32>
    %227 = arith.mulf %220, %226 : vector<16x32xf32>
    %228 = arith.addf %225, %227 : vector<16x32xf32>
    %229 = vector.extract_strided_slice %17 {offsets = [0, 7], sizes = [16, 1], strides = [1, 1]} : vector<16x8xf32> to vector<16x1xf32>
    %230 = vector.broadcast %229 : vector<16x1xf32> to vector<16x64xf32>
    %231 = arith.mulf %230, %5 : vector<16x64xf32>
    %232 = arith.addf %231, %11 : vector<16x64xf32>
    %233 = vector.broadcast %229 : vector<16x1xf32> to vector<16x32xf32>
    %234 = arith.mulf %233, %8 : vector<16x32xf32>
    %235 = arith.addf %234, %14 : vector<16x32xf32>
    %cst_58 = arith.constant dense<0.000000e+00> : vector<16x32xf32>
    %236 = tpu.matmul %0, %228, %cst_58 {dimension_numbers = #tpu.dot_dimension_numbers<[1], [0], [0], [1], [0, 0, 1, 1], [], []>} : vector<16x16xf32>, vector<16x32xf32>, vector<16x32xf32> -> vector<16x32xf32>
    %cst_59 = arith.constant dense<0.000000e+00> : vector<16x64xf32>
    %237 = tpu.matmul %236, %1, %cst_59 {dimension_numbers = #tpu.dot_dimension_numbers<[1], [0], [0], [1], [0, 0, 1, 1], [], []>} : vector<16x32xf32>, vector<32x64xf32>, vector<16x64xf32> -> vector<16x64xf32>
    %238 = arith.addf %237, %232 : vector<16x64xf32>
    %239 = vector.extract_strided_slice %238 {offsets = [0, 0], sizes = [16, 32], strides = [1, 1]} : vector<16x64xf32> to vector<16x32xf32>
    %240 = arith.negf %239 : vector<16x32xf32>
    %241 = math.exp %240 : vector<16x32xf32>
    %cst_60 = arith.constant 1.000000e+00 : f32
    %242 = vector.broadcast %cst_60 : f32 to vector<16x32xf32>
    %243 = arith.addf %242, %241 : vector<16x32xf32>
    %244 = arith.divf %242, %243 : vector<16x32xf32>
    %245 = vector.extract_strided_slice %238 {offsets = [0, 32], sizes = [16, 32], strides = [1, 1]} : vector<16x64xf32> to vector<16x32xf32>
    %246 = arith.negf %245 : vector<16x32xf32>
    %247 = math.exp %246 : vector<16x32xf32>
    %cst_61 = arith.constant 1.000000e+00 : f32
    %248 = vector.broadcast %cst_61 : f32 to vector<16x32xf32>
    %249 = arith.addf %248, %247 : vector<16x32xf32>
    %250 = arith.divf %248, %249 : vector<16x32xf32>
    %251 = arith.mulf %244, %228 : vector<16x32xf32>
    %cst_62 = arith.constant dense<0.000000e+00> : vector<16x32xf32>
    %252 = tpu.matmul %251, %2, %cst_62 {dimension_numbers = #tpu.dot_dimension_numbers<[1], [0], [0], [1], [0, 0, 1, 1], [], []>} : vector<16x32xf32>, vector<32x32xf32>, vector<16x32xf32> -> vector<16x32xf32>
    %cst_63 = arith.constant dense<0.000000e+00> : vector<16x32xf32>
    %253 = tpu.matmul %0, %252, %cst_63 {dimension_numbers = #tpu.dot_dimension_numbers<[1], [0], [0], [1], [0, 0, 1, 1], [], []>} : vector<16x16xf32>, vector<16x32xf32>, vector<16x32xf32> -> vector<16x32xf32>
    %254 = arith.addf %253, %235 : vector<16x32xf32>
    %255 = math.tanh %254 : vector<16x32xf32>
    %256 = arith.subf %228, %255 : vector<16x32xf32>
    %257 = arith.mulf %250, %256 : vector<16x32xf32>
    %258 = arith.addf %255, %257 : vector<16x32xf32>
    %259 = vector.extract_strided_slice %15 {offsets = [16, 0], sizes = [16, 8], strides = [1, 1]} : vector<32x8xf32> to vector<16x8xf32>
    %cst_64 = arith.constant dense<0.000000e+00> : vector<16x8xf32>
    %260 = tpu.matmul %0, %259, %cst_64 {dimension_numbers = #tpu.dot_dimension_numbers<[1], [0], [0], [1], [0, 0, 1, 1], [], []>} : vector<16x16xf32>, vector<16x8xf32>, vector<16x8xf32> -> vector<16x8xf32>
    %cst_65 = arith.constant 0.000000e+00 : f32
    %261 = vector.broadcast %cst_65 : f32 to vector<16x32xf32>
    %262 = vector.extract_strided_slice %260 {offsets = [0, 0], sizes = [16, 1], strides = [1, 1]} : vector<16x8xf32> to vector<16x1xf32>
    %263 = vector.broadcast %262 : vector<16x1xf32> to vector<16x64xf32>
    %264 = arith.mulf %263, %5 : vector<16x64xf32>
    %265 = arith.addf %264, %11 : vector<16x64xf32>
    %266 = vector.broadcast %262 : vector<16x1xf32> to vector<16x32xf32>
    %267 = arith.mulf %266, %8 : vector<16x32xf32>
    %268 = arith.addf %267, %14 : vector<16x32xf32>
    %cst_66 = arith.constant dense<0.000000e+00> : vector<16x32xf32>
    %269 = tpu.matmul %0, %261, %cst_66 {dimension_numbers = #tpu.dot_dimension_numbers<[1], [0], [0], [1], [0, 0, 1, 1], [], []>} : vector<16x16xf32>, vector<16x32xf32>, vector<16x32xf32> -> vector<16x32xf32>
    %cst_67 = arith.constant dense<0.000000e+00> : vector<16x64xf32>
    %270 = tpu.matmul %269, %1, %cst_67 {dimension_numbers = #tpu.dot_dimension_numbers<[1], [0], [0], [1], [0, 0, 1, 1], [], []>} : vector<16x32xf32>, vector<32x64xf32>, vector<16x64xf32> -> vector<16x64xf32>
    %271 = arith.addf %270, %265 : vector<16x64xf32>
    %272 = vector.extract_strided_slice %271 {offsets = [0, 0], sizes = [16, 32], strides = [1, 1]} : vector<16x64xf32> to vector<16x32xf32>
    %273 = arith.negf %272 : vector<16x32xf32>
    %274 = math.exp %273 : vector<16x32xf32>
    %cst_68 = arith.constant 1.000000e+00 : f32
    %275 = vector.broadcast %cst_68 : f32 to vector<16x32xf32>
    %276 = arith.addf %275, %274 : vector<16x32xf32>
    %277 = arith.divf %275, %276 : vector<16x32xf32>
    %278 = vector.extract_strided_slice %271 {offsets = [0, 32], sizes = [16, 32], strides = [1, 1]} : vector<16x64xf32> to vector<16x32xf32>
    %279 = arith.negf %278 : vector<16x32xf32>
    %280 = math.exp %279 : vector<16x32xf32>
    %cst_69 = arith.constant 1.000000e+00 : f32
    %281 = vector.broadcast %cst_69 : f32 to vector<16x32xf32>
    %282 = arith.addf %281, %280 : vector<16x32xf32>
    %283 = arith.divf %281, %282 : vector<16x32xf32>
    %284 = arith.mulf %277, %261 : vector<16x32xf32>
    %cst_70 = arith.constant dense<0.000000e+00> : vector<16x32xf32>
    %285 = tpu.matmul %284, %2, %cst_70 {dimension_numbers = #tpu.dot_dimension_numbers<[1], [0], [0], [1], [0, 0, 1, 1], [], []>} : vector<16x32xf32>, vector<32x32xf32>, vector<16x32xf32> -> vector<16x32xf32>
    %cst_71 = arith.constant dense<0.000000e+00> : vector<16x32xf32>
    %286 = tpu.matmul %0, %285, %cst_71 {dimension_numbers = #tpu.dot_dimension_numbers<[1], [0], [0], [1], [0, 0, 1, 1], [], []>} : vector<16x16xf32>, vector<16x32xf32>, vector<16x32xf32> -> vector<16x32xf32>
    %287 = arith.addf %286, %268 : vector<16x32xf32>
    %288 = math.tanh %287 : vector<16x32xf32>
    %289 = arith.subf %261, %288 : vector<16x32xf32>
    %290 = arith.mulf %283, %289 : vector<16x32xf32>
    %291 = arith.addf %288, %290 : vector<16x32xf32>
    %292 = vector.extract_strided_slice %260 {offsets = [0, 1], sizes = [16, 1], strides = [1, 1]} : vector<16x8xf32> to vector<16x1xf32>
    %293 = vector.broadcast %292 : vector<16x1xf32> to vector<16x64xf32>
    %294 = arith.mulf %293, %5 : vector<16x64xf32>
    %295 = arith.addf %294, %11 : vector<16x64xf32>
    %296 = vector.broadcast %292 : vector<16x1xf32> to vector<16x32xf32>
    %297 = arith.mulf %296, %8 : vector<16x32xf32>
    %298 = arith.addf %297, %14 : vector<16x32xf32>
    %cst_72 = arith.constant dense<0.000000e+00> : vector<16x32xf32>
    %299 = tpu.matmul %0, %291, %cst_72 {dimension_numbers = #tpu.dot_dimension_numbers<[1], [0], [0], [1], [0, 0, 1, 1], [], []>} : vector<16x16xf32>, vector<16x32xf32>, vector<16x32xf32> -> vector<16x32xf32>
    %cst_73 = arith.constant dense<0.000000e+00> : vector<16x64xf32>
    %300 = tpu.matmul %299, %1, %cst_73 {dimension_numbers = #tpu.dot_dimension_numbers<[1], [0], [0], [1], [0, 0, 1, 1], [], []>} : vector<16x32xf32>, vector<32x64xf32>, vector<16x64xf32> -> vector<16x64xf32>
    %301 = arith.addf %300, %295 : vector<16x64xf32>
    %302 = vector.extract_strided_slice %301 {offsets = [0, 0], sizes = [16, 32], strides = [1, 1]} : vector<16x64xf32> to vector<16x32xf32>
    %303 = arith.negf %302 : vector<16x32xf32>
    %304 = math.exp %303 : vector<16x32xf32>
    %cst_74 = arith.constant 1.000000e+00 : f32
    %305 = vector.broadcast %cst_74 : f32 to vector<16x32xf32>
    %306 = arith.addf %305, %304 : vector<16x32xf32>
    %307 = arith.divf %305, %306 : vector<16x32xf32>
    %308 = vector.extract_strided_slice %301 {offsets = [0, 32], sizes = [16, 32], strides = [1, 1]} : vector<16x64xf32> to vector<16x32xf32>
    %309 = arith.negf %308 : vector<16x32xf32>
    %310 = math.exp %309 : vector<16x32xf32>
    %cst_75 = arith.constant 1.000000e+00 : f32
    %311 = vector.broadcast %cst_75 : f32 to vector<16x32xf32>
    %312 = arith.addf %311, %310 : vector<16x32xf32>
    %313 = arith.divf %311, %312 : vector<16x32xf32>
    %314 = arith.mulf %307, %291 : vector<16x32xf32>
    %cst_76 = arith.constant dense<0.000000e+00> : vector<16x32xf32>
    %315 = tpu.matmul %314, %2, %cst_76 {dimension_numbers = #tpu.dot_dimension_numbers<[1], [0], [0], [1], [0, 0, 1, 1], [], []>} : vector<16x32xf32>, vector<32x32xf32>, vector<16x32xf32> -> vector<16x32xf32>
    %cst_77 = arith.constant dense<0.000000e+00> : vector<16x32xf32>
    %316 = tpu.matmul %0, %315, %cst_77 {dimension_numbers = #tpu.dot_dimension_numbers<[1], [0], [0], [1], [0, 0, 1, 1], [], []>} : vector<16x16xf32>, vector<16x32xf32>, vector<16x32xf32> -> vector<16x32xf32>
    %317 = arith.addf %316, %298 : vector<16x32xf32>
    %318 = math.tanh %317 : vector<16x32xf32>
    %319 = arith.subf %291, %318 : vector<16x32xf32>
    %320 = arith.mulf %313, %319 : vector<16x32xf32>
    %321 = arith.addf %318, %320 : vector<16x32xf32>
    %322 = vector.extract_strided_slice %260 {offsets = [0, 2], sizes = [16, 1], strides = [1, 1]} : vector<16x8xf32> to vector<16x1xf32>
    %323 = vector.broadcast %322 : vector<16x1xf32> to vector<16x64xf32>
    %324 = arith.mulf %323, %5 : vector<16x64xf32>
    %325 = arith.addf %324, %11 : vector<16x64xf32>
    %326 = vector.broadcast %322 : vector<16x1xf32> to vector<16x32xf32>
    %327 = arith.mulf %326, %8 : vector<16x32xf32>
    %328 = arith.addf %327, %14 : vector<16x32xf32>
    %cst_78 = arith.constant dense<0.000000e+00> : vector<16x32xf32>
    %329 = tpu.matmul %0, %321, %cst_78 {dimension_numbers = #tpu.dot_dimension_numbers<[1], [0], [0], [1], [0, 0, 1, 1], [], []>} : vector<16x16xf32>, vector<16x32xf32>, vector<16x32xf32> -> vector<16x32xf32>
    %cst_79 = arith.constant dense<0.000000e+00> : vector<16x64xf32>
    %330 = tpu.matmul %329, %1, %cst_79 {dimension_numbers = #tpu.dot_dimension_numbers<[1], [0], [0], [1], [0, 0, 1, 1], [], []>} : vector<16x32xf32>, vector<32x64xf32>, vector<16x64xf32> -> vector<16x64xf32>
    %331 = arith.addf %330, %325 : vector<16x64xf32>
    %332 = vector.extract_strided_slice %331 {offsets = [0, 0], sizes = [16, 32], strides = [1, 1]} : vector<16x64xf32> to vector<16x32xf32>
    %333 = arith.negf %332 : vector<16x32xf32>
    %334 = math.exp %333 : vector<16x32xf32>
    %cst_80 = arith.constant 1.000000e+00 : f32
    %335 = vector.broadcast %cst_80 : f32 to vector<16x32xf32>
    %336 = arith.addf %335, %334 : vector<16x32xf32>
    %337 = arith.divf %335, %336 : vector<16x32xf32>
    %338 = vector.extract_strided_slice %331 {offsets = [0, 32], sizes = [16, 32], strides = [1, 1]} : vector<16x64xf32> to vector<16x32xf32>
    %339 = arith.negf %338 : vector<16x32xf32>
    %340 = math.exp %339 : vector<16x32xf32>
    %cst_81 = arith.constant 1.000000e+00 : f32
    %341 = vector.broadcast %cst_81 : f32 to vector<16x32xf32>
    %342 = arith.addf %341, %340 : vector<16x32xf32>
    %343 = arith.divf %341, %342 : vector<16x32xf32>
    %344 = arith.mulf %337, %321 : vector<16x32xf32>
    %cst_82 = arith.constant dense<0.000000e+00> : vector<16x32xf32>
    %345 = tpu.matmul %344, %2, %cst_82 {dimension_numbers = #tpu.dot_dimension_numbers<[1], [0], [0], [1], [0, 0, 1, 1], [], []>} : vector<16x32xf32>, vector<32x32xf32>, vector<16x32xf32> -> vector<16x32xf32>
    %cst_83 = arith.constant dense<0.000000e+00> : vector<16x32xf32>
    %346 = tpu.matmul %0, %345, %cst_83 {dimension_numbers = #tpu.dot_dimension_numbers<[1], [0], [0], [1], [0, 0, 1, 1], [], []>} : vector<16x16xf32>, vector<16x32xf32>, vector<16x32xf32> -> vector<16x32xf32>
    %347 = arith.addf %346, %328 : vector<16x32xf32>
    %348 = math.tanh %347 : vector<16x32xf32>
    %349 = arith.subf %321, %348 : vector<16x32xf32>
    %350 = arith.mulf %343, %349 : vector<16x32xf32>
    %351 = arith.addf %348, %350 : vector<16x32xf32>
    %352 = vector.extract_strided_slice %260 {offsets = [0, 3], sizes = [16, 1], strides = [1, 1]} : vector<16x8xf32> to vector<16x1xf32>
    %353 = vector.broadcast %352 : vector<16x1xf32> to vector<16x64xf32>
    %354 = arith.mulf %353, %5 : vector<16x64xf32>
    %355 = arith.addf %354, %11 : vector<16x64xf32>
    %356 = vector.broadcast %352 : vector<16x1xf32> to vector<16x32xf32>
    %357 = arith.mulf %356, %8 : vector<16x32xf32>
    %358 = arith.addf %357, %14 : vector<16x32xf32>
    %cst_84 = arith.constant dense<0.000000e+00> : vector<16x32xf32>
    %359 = tpu.matmul %0, %351, %cst_84 {dimension_numbers = #tpu.dot_dimension_numbers<[1], [0], [0], [1], [0, 0, 1, 1], [], []>} : vector<16x16xf32>, vector<16x32xf32>, vector<16x32xf32> -> vector<16x32xf32>
    %cst_85 = arith.constant dense<0.000000e+00> : vector<16x64xf32>
    %360 = tpu.matmul %359, %1, %cst_85 {dimension_numbers = #tpu.dot_dimension_numbers<[1], [0], [0], [1], [0, 0, 1, 1], [], []>} : vector<16x32xf32>, vector<32x64xf32>, vector<16x64xf32> -> vector<16x64xf32>
    %361 = arith.addf %360, %355 : vector<16x64xf32>
    %362 = vector.extract_strided_slice %361 {offsets = [0, 0], sizes = [16, 32], strides = [1, 1]} : vector<16x64xf32> to vector<16x32xf32>
    %363 = arith.negf %362 : vector<16x32xf32>
    %364 = math.exp %363 : vector<16x32xf32>
    %cst_86 = arith.constant 1.000000e+00 : f32
    %365 = vector.broadcast %cst_86 : f32 to vector<16x32xf32>
    %366 = arith.addf %365, %364 : vector<16x32xf32>
    %367 = arith.divf %365, %366 : vector<16x32xf32>
    %368 = vector.extract_strided_slice %361 {offsets = [0, 32], sizes = [16, 32], strides = [1, 1]} : vector<16x64xf32> to vector<16x32xf32>
    %369 = arith.negf %368 : vector<16x32xf32>
    %370 = math.exp %369 : vector<16x32xf32>
    %cst_87 = arith.constant 1.000000e+00 : f32
    %371 = vector.broadcast %cst_87 : f32 to vector<16x32xf32>
    %372 = arith.addf %371, %370 : vector<16x32xf32>
    %373 = arith.divf %371, %372 : vector<16x32xf32>
    %374 = arith.mulf %367, %351 : vector<16x32xf32>
    %cst_88 = arith.constant dense<0.000000e+00> : vector<16x32xf32>
    %375 = tpu.matmul %374, %2, %cst_88 {dimension_numbers = #tpu.dot_dimension_numbers<[1], [0], [0], [1], [0, 0, 1, 1], [], []>} : vector<16x32xf32>, vector<32x32xf32>, vector<16x32xf32> -> vector<16x32xf32>
    %cst_89 = arith.constant dense<0.000000e+00> : vector<16x32xf32>
    %376 = tpu.matmul %0, %375, %cst_89 {dimension_numbers = #tpu.dot_dimension_numbers<[1], [0], [0], [1], [0, 0, 1, 1], [], []>} : vector<16x16xf32>, vector<16x32xf32>, vector<16x32xf32> -> vector<16x32xf32>
    %377 = arith.addf %376, %358 : vector<16x32xf32>
    %378 = math.tanh %377 : vector<16x32xf32>
    %379 = arith.subf %351, %378 : vector<16x32xf32>
    %380 = arith.mulf %373, %379 : vector<16x32xf32>
    %381 = arith.addf %378, %380 : vector<16x32xf32>
    %382 = vector.extract_strided_slice %260 {offsets = [0, 4], sizes = [16, 1], strides = [1, 1]} : vector<16x8xf32> to vector<16x1xf32>
    %383 = vector.broadcast %382 : vector<16x1xf32> to vector<16x64xf32>
    %384 = arith.mulf %383, %5 : vector<16x64xf32>
    %385 = arith.addf %384, %11 : vector<16x64xf32>
    %386 = vector.broadcast %382 : vector<16x1xf32> to vector<16x32xf32>
    %387 = arith.mulf %386, %8 : vector<16x32xf32>
    %388 = arith.addf %387, %14 : vector<16x32xf32>
    %cst_90 = arith.constant dense<0.000000e+00> : vector<16x32xf32>
    %389 = tpu.matmul %0, %381, %cst_90 {dimension_numbers = #tpu.dot_dimension_numbers<[1], [0], [0], [1], [0, 0, 1, 1], [], []>} : vector<16x16xf32>, vector<16x32xf32>, vector<16x32xf32> -> vector<16x32xf32>
    %cst_91 = arith.constant dense<0.000000e+00> : vector<16x64xf32>
    %390 = tpu.matmul %389, %1, %cst_91 {dimension_numbers = #tpu.dot_dimension_numbers<[1], [0], [0], [1], [0, 0, 1, 1], [], []>} : vector<16x32xf32>, vector<32x64xf32>, vector<16x64xf32> -> vector<16x64xf32>
    %391 = arith.addf %390, %385 : vector<16x64xf32>
    %392 = vector.extract_strided_slice %391 {offsets = [0, 0], sizes = [16, 32], strides = [1, 1]} : vector<16x64xf32> to vector<16x32xf32>
    %393 = arith.negf %392 : vector<16x32xf32>
    %394 = math.exp %393 : vector<16x32xf32>
    %cst_92 = arith.constant 1.000000e+00 : f32
    %395 = vector.broadcast %cst_92 : f32 to vector<16x32xf32>
    %396 = arith.addf %395, %394 : vector<16x32xf32>
    %397 = arith.divf %395, %396 : vector<16x32xf32>
    %398 = vector.extract_strided_slice %391 {offsets = [0, 32], sizes = [16, 32], strides = [1, 1]} : vector<16x64xf32> to vector<16x32xf32>
    %399 = arith.negf %398 : vector<16x32xf32>
    %400 = math.exp %399 : vector<16x32xf32>
    %cst_93 = arith.constant 1.000000e+00 : f32
    %401 = vector.broadcast %cst_93 : f32 to vector<16x32xf32>
    %402 = arith.addf %401, %400 : vector<16x32xf32>
    %403 = arith.divf %401, %402 : vector<16x32xf32>
    %404 = arith.mulf %397, %381 : vector<16x32xf32>
    %cst_94 = arith.constant dense<0.000000e+00> : vector<16x32xf32>
    %405 = tpu.matmul %404, %2, %cst_94 {dimension_numbers = #tpu.dot_dimension_numbers<[1], [0], [0], [1], [0, 0, 1, 1], [], []>} : vector<16x32xf32>, vector<32x32xf32>, vector<16x32xf32> -> vector<16x32xf32>
    %cst_95 = arith.constant dense<0.000000e+00> : vector<16x32xf32>
    %406 = tpu.matmul %0, %405, %cst_95 {dimension_numbers = #tpu.dot_dimension_numbers<[1], [0], [0], [1], [0, 0, 1, 1], [], []>} : vector<16x16xf32>, vector<16x32xf32>, vector<16x32xf32> -> vector<16x32xf32>
    %407 = arith.addf %406, %388 : vector<16x32xf32>
    %408 = math.tanh %407 : vector<16x32xf32>
    %409 = arith.subf %381, %408 : vector<16x32xf32>
    %410 = arith.mulf %403, %409 : vector<16x32xf32>
    %411 = arith.addf %408, %410 : vector<16x32xf32>
    %412 = vector.extract_strided_slice %260 {offsets = [0, 5], sizes = [16, 1], strides = [1, 1]} : vector<16x8xf32> to vector<16x1xf32>
    %413 = vector.broadcast %412 : vector<16x1xf32> to vector<16x64xf32>
    %414 = arith.mulf %413, %5 : vector<16x64xf32>
    %415 = arith.addf %414, %11 : vector<16x64xf32>
    %416 = vector.broadcast %412 : vector<16x1xf32> to vector<16x32xf32>
    %417 = arith.mulf %416, %8 : vector<16x32xf32>
    %418 = arith.addf %417, %14 : vector<16x32xf32>
    %cst_96 = arith.constant dense<0.000000e+00> : vector<16x32xf32>
    %419 = tpu.matmul %0, %411, %cst_96 {dimension_numbers = #tpu.dot_dimension_numbers<[1], [0], [0], [1], [0, 0, 1, 1], [], []>} : vector<16x16xf32>, vector<16x32xf32>, vector<16x32xf32> -> vector<16x32xf32>
    %cst_97 = arith.constant dense<0.000000e+00> : vector<16x64xf32>
    %420 = tpu.matmul %419, %1, %cst_97 {dimension_numbers = #tpu.dot_dimension_numbers<[1], [0], [0], [1], [0, 0, 1, 1], [], []>} : vector<16x32xf32>, vector<32x64xf32>, vector<16x64xf32> -> vector<16x64xf32>
    %421 = arith.addf %420, %415 : vector<16x64xf32>
    %422 = vector.extract_strided_slice %421 {offsets = [0, 0], sizes = [16, 32], strides = [1, 1]} : vector<16x64xf32> to vector<16x32xf32>
    %423 = arith.negf %422 : vector<16x32xf32>
    %424 = math.exp %423 : vector<16x32xf32>
    %cst_98 = arith.constant 1.000000e+00 : f32
    %425 = vector.broadcast %cst_98 : f32 to vector<16x32xf32>
    %426 = arith.addf %425, %424 : vector<16x32xf32>
    %427 = arith.divf %425, %426 : vector<16x32xf32>
    %428 = vector.extract_strided_slice %421 {offsets = [0, 32], sizes = [16, 32], strides = [1, 1]} : vector<16x64xf32> to vector<16x32xf32>
    %429 = arith.negf %428 : vector<16x32xf32>
    %430 = math.exp %429 : vector<16x32xf32>
    %cst_99 = arith.constant 1.000000e+00 : f32
    %431 = vector.broadcast %cst_99 : f32 to vector<16x32xf32>
    %432 = arith.addf %431, %430 : vector<16x32xf32>
    %433 = arith.divf %431, %432 : vector<16x32xf32>
    %434 = arith.mulf %427, %411 : vector<16x32xf32>
    %cst_100 = arith.constant dense<0.000000e+00> : vector<16x32xf32>
    %435 = tpu.matmul %434, %2, %cst_100 {dimension_numbers = #tpu.dot_dimension_numbers<[1], [0], [0], [1], [0, 0, 1, 1], [], []>} : vector<16x32xf32>, vector<32x32xf32>, vector<16x32xf32> -> vector<16x32xf32>
    %cst_101 = arith.constant dense<0.000000e+00> : vector<16x32xf32>
    %436 = tpu.matmul %0, %435, %cst_101 {dimension_numbers = #tpu.dot_dimension_numbers<[1], [0], [0], [1], [0, 0, 1, 1], [], []>} : vector<16x16xf32>, vector<16x32xf32>, vector<16x32xf32> -> vector<16x32xf32>
    %437 = arith.addf %436, %418 : vector<16x32xf32>
    %438 = math.tanh %437 : vector<16x32xf32>
    %439 = arith.subf %411, %438 : vector<16x32xf32>
    %440 = arith.mulf %433, %439 : vector<16x32xf32>
    %441 = arith.addf %438, %440 : vector<16x32xf32>
    %442 = vector.extract_strided_slice %260 {offsets = [0, 6], sizes = [16, 1], strides = [1, 1]} : vector<16x8xf32> to vector<16x1xf32>
    %443 = vector.broadcast %442 : vector<16x1xf32> to vector<16x64xf32>
    %444 = arith.mulf %443, %5 : vector<16x64xf32>
    %445 = arith.addf %444, %11 : vector<16x64xf32>
    %446 = vector.broadcast %442 : vector<16x1xf32> to vector<16x32xf32>
    %447 = arith.mulf %446, %8 : vector<16x32xf32>
    %448 = arith.addf %447, %14 : vector<16x32xf32>
    %cst_102 = arith.constant dense<0.000000e+00> : vector<16x32xf32>
    %449 = tpu.matmul %0, %441, %cst_102 {dimension_numbers = #tpu.dot_dimension_numbers<[1], [0], [0], [1], [0, 0, 1, 1], [], []>} : vector<16x16xf32>, vector<16x32xf32>, vector<16x32xf32> -> vector<16x32xf32>
    %cst_103 = arith.constant dense<0.000000e+00> : vector<16x64xf32>
    %450 = tpu.matmul %449, %1, %cst_103 {dimension_numbers = #tpu.dot_dimension_numbers<[1], [0], [0], [1], [0, 0, 1, 1], [], []>} : vector<16x32xf32>, vector<32x64xf32>, vector<16x64xf32> -> vector<16x64xf32>
    %451 = arith.addf %450, %445 : vector<16x64xf32>
    %452 = vector.extract_strided_slice %451 {offsets = [0, 0], sizes = [16, 32], strides = [1, 1]} : vector<16x64xf32> to vector<16x32xf32>
    %453 = arith.negf %452 : vector<16x32xf32>
    %454 = math.exp %453 : vector<16x32xf32>
    %cst_104 = arith.constant 1.000000e+00 : f32
    %455 = vector.broadcast %cst_104 : f32 to vector<16x32xf32>
    %456 = arith.addf %455, %454 : vector<16x32xf32>
    %457 = arith.divf %455, %456 : vector<16x32xf32>
    %458 = vector.extract_strided_slice %451 {offsets = [0, 32], sizes = [16, 32], strides = [1, 1]} : vector<16x64xf32> to vector<16x32xf32>
    %459 = arith.negf %458 : vector<16x32xf32>
    %460 = math.exp %459 : vector<16x32xf32>
    %cst_105 = arith.constant 1.000000e+00 : f32
    %461 = vector.broadcast %cst_105 : f32 to vector<16x32xf32>
    %462 = arith.addf %461, %460 : vector<16x32xf32>
    %463 = arith.divf %461, %462 : vector<16x32xf32>
    %464 = arith.mulf %457, %441 : vector<16x32xf32>
    %cst_106 = arith.constant dense<0.000000e+00> : vector<16x32xf32>
    %465 = tpu.matmul %464, %2, %cst_106 {dimension_numbers = #tpu.dot_dimension_numbers<[1], [0], [0], [1], [0, 0, 1, 1], [], []>} : vector<16x32xf32>, vector<32x32xf32>, vector<16x32xf32> -> vector<16x32xf32>
    %cst_107 = arith.constant dense<0.000000e+00> : vector<16x32xf32>
    %466 = tpu.matmul %0, %465, %cst_107 {dimension_numbers = #tpu.dot_dimension_numbers<[1], [0], [0], [1], [0, 0, 1, 1], [], []>} : vector<16x16xf32>, vector<16x32xf32>, vector<16x32xf32> -> vector<16x32xf32>
    %467 = arith.addf %466, %448 : vector<16x32xf32>
    %468 = math.tanh %467 : vector<16x32xf32>
    %469 = arith.subf %441, %468 : vector<16x32xf32>
    %470 = arith.mulf %463, %469 : vector<16x32xf32>
    %471 = arith.addf %468, %470 : vector<16x32xf32>
    %472 = vector.extract_strided_slice %260 {offsets = [0, 7], sizes = [16, 1], strides = [1, 1]} : vector<16x8xf32> to vector<16x1xf32>
    %473 = vector.broadcast %472 : vector<16x1xf32> to vector<16x64xf32>
    %474 = arith.mulf %473, %5 : vector<16x64xf32>
    %475 = arith.addf %474, %11 : vector<16x64xf32>
    %476 = vector.broadcast %472 : vector<16x1xf32> to vector<16x32xf32>
    %477 = arith.mulf %476, %8 : vector<16x32xf32>
    %478 = arith.addf %477, %14 : vector<16x32xf32>
    %cst_108 = arith.constant dense<0.000000e+00> : vector<16x32xf32>
    %479 = tpu.matmul %0, %471, %cst_108 {dimension_numbers = #tpu.dot_dimension_numbers<[1], [0], [0], [1], [0, 0, 1, 1], [], []>} : vector<16x16xf32>, vector<16x32xf32>, vector<16x32xf32> -> vector<16x32xf32>
    %cst_109 = arith.constant dense<0.000000e+00> : vector<16x64xf32>
    %480 = tpu.matmul %479, %1, %cst_109 {dimension_numbers = #tpu.dot_dimension_numbers<[1], [0], [0], [1], [0, 0, 1, 1], [], []>} : vector<16x32xf32>, vector<32x64xf32>, vector<16x64xf32> -> vector<16x64xf32>
    %481 = arith.addf %480, %475 : vector<16x64xf32>
    %482 = vector.extract_strided_slice %481 {offsets = [0, 0], sizes = [16, 32], strides = [1, 1]} : vector<16x64xf32> to vector<16x32xf32>
    %483 = arith.negf %482 : vector<16x32xf32>
    %484 = math.exp %483 : vector<16x32xf32>
    %cst_110 = arith.constant 1.000000e+00 : f32
    %485 = vector.broadcast %cst_110 : f32 to vector<16x32xf32>
    %486 = arith.addf %485, %484 : vector<16x32xf32>
    %487 = arith.divf %485, %486 : vector<16x32xf32>
    %488 = vector.extract_strided_slice %481 {offsets = [0, 32], sizes = [16, 32], strides = [1, 1]} : vector<16x64xf32> to vector<16x32xf32>
    %489 = arith.negf %488 : vector<16x32xf32>
    %490 = math.exp %489 : vector<16x32xf32>
    %cst_111 = arith.constant 1.000000e+00 : f32
    %491 = vector.broadcast %cst_111 : f32 to vector<16x32xf32>
    %492 = arith.addf %491, %490 : vector<16x32xf32>
    %493 = arith.divf %491, %492 : vector<16x32xf32>
    %494 = arith.mulf %487, %471 : vector<16x32xf32>
    %cst_112 = arith.constant dense<0.000000e+00> : vector<16x32xf32>
    %495 = tpu.matmul %494, %2, %cst_112 {dimension_numbers = #tpu.dot_dimension_numbers<[1], [0], [0], [1], [0, 0, 1, 1], [], []>} : vector<16x32xf32>, vector<32x32xf32>, vector<16x32xf32> -> vector<16x32xf32>
    %cst_113 = arith.constant dense<0.000000e+00> : vector<16x32xf32>
    %496 = tpu.matmul %0, %495, %cst_113 {dimension_numbers = #tpu.dot_dimension_numbers<[1], [0], [0], [1], [0, 0, 1, 1], [], []>} : vector<16x16xf32>, vector<16x32xf32>, vector<16x32xf32> -> vector<16x32xf32>
    %497 = arith.addf %496, %478 : vector<16x32xf32>
    %498 = math.tanh %497 : vector<16x32xf32>
    %499 = arith.subf %471, %498 : vector<16x32xf32>
    %500 = arith.mulf %493, %499 : vector<16x32xf32>
    %501 = arith.addf %498, %500 : vector<16x32xf32>
    %502 = tpu.concatenate %258, %501 in 0 : vector<16x32xf32>, vector<16x32xf32> -> vector<32x32xf32>
    %c0_114 = arith.constant 0 : index
    %c0_115 = arith.constant 0 : index
    %503 = vector.load %arg9[%c0_114, %c0_115] : memref<32x128xf32, #tpu.memory_space<vmem>>, vector<32x128xf32>
    %cst_116 = arith.constant dense<0.000000e+00> : vector<32x128xf32>
    %504 = tpu.matmul %502, %503, %cst_116 {dimension_numbers = #tpu.dot_dimension_numbers<[1], [0], [0], [1], [0, 0, 1, 1], [], []>} : vector<32x32xf32>, vector<32x128xf32>, vector<32x128xf32> -> vector<32x128xf32>
    %c0_117 = arith.constant 0 : index
    %c0_118 = arith.constant 0 : index
    %505 = vector.load %arg10[%c0_117, %c0_118] : memref<1x128xf32, #tpu.memory_space<vmem>>, vector<1x128xf32>
    %506 = vector.broadcast %505 : vector<1x128xf32> to vector<32x128xf32>
    %507 = arith.addf %504, %506 : vector<32x128xf32>
    %c0_119 = arith.constant 0 : index
    %c0_120 = arith.constant 0 : index
    %508 = vector.load %arg11[%c0_119, %c0_120] : memref<32x128xf32, #tpu.memory_space<vmem>>, vector<32x128xf32>
    tpu.vector_store %arg11[%c0_119, %c0_120], %507 {strides = array<i32>} : memref<32x128xf32, #tpu.memory_space<vmem>>, vector<32x128xf32>,
    return
  }
  func.func @transform_0(%arg0: i32) -> (i32, i32) {
    %c0_i32 = arith.constant 0 : i32
    %c0_i32_0 = arith.constant 0 : i32
    return %arg0, %c0_i32 : i32, i32
  }
  func.func @transform_1(%arg0: i32) -> (i32, i32) {
    %c0_i32 = arith.constant 0 : i32
    %c0_i32_0 = arith.constant 0 : i32
    %c0_i32_1 = arith.constant 0 : i32
    return %c0_i32, %c0_i32_0 : i32, i32
  }
  func.func @transform_2(%arg0: i32) -> (i32, i32) {
    %c0_i32 = arith.constant 0 : i32
    %c0_i32_0 = arith.constant 0 : i32
    %c0_i32_1 = arith.constant 0 : i32
    return %c0_i32, %c0_i32_0 : i32, i32
  }
  func.func @transform_3(%arg0: i32) -> (i32, i32) {
    %c0_i32 = arith.constant 0 : i32
    %c0_i32_0 = arith.constant 0 : i32
    %c0_i32_1 = arith.constant 0 : i32
    return %c0_i32, %c0_i32_0 : i32, i32
  }
  func.func @transform_4(%arg0: i32) -> (i32, i32) {
    %c0_i32 = arith.constant 0 : i32
    %c0_i32_0 = arith.constant 0 : i32
    %c0_i32_1 = arith.constant 0 : i32
    return %c0_i32, %c0_i32_0 : i32, i32
  }
  func.func @transform_5(%arg0: i32) -> (i32, i32) {
    %c0_i32 = arith.constant 0 : i32
    %c0_i32_0 = arith.constant 0 : i32
    %c0_i32_1 = arith.constant 0 : i32
    return %c0_i32, %c0_i32_0 : i32, i32
  }
  func.func @transform_6(%arg0: i32) -> (i32, i32) {
    %c0_i32 = arith.constant 0 : i32
    %c0_i32_0 = arith.constant 0 : i32
    %c0_i32_1 = arith.constant 0 : i32
    return %c0_i32, %c0_i32_0 : i32, i32
  }
  func.func @transform_7(%arg0: i32) -> (i32, i32) {
    %c0_i32 = arith.constant 0 : i32
    %c0_i32_0 = arith.constant 0 : i32
    %c0_i32_1 = arith.constant 0 : i32
    return %c0_i32, %c0_i32_0 : i32, i32
  }
  func.func @transform_8(%arg0: i32) -> (i32, i32) {
    %c0_i32 = arith.constant 0 : i32
    %c0_i32_0 = arith.constant 0 : i32
    %c0_i32_1 = arith.constant 0 : i32
    return %c0_i32, %c0_i32_0 : i32, i32
  }
  func.func @transform_9(%arg0: i32) -> (i32, i32) {
    %c0_i32 = arith.constant 0 : i32
    %c0_i32_0 = arith.constant 0 : i32
    %c0_i32_1 = arith.constant 0 : i32
    return %c0_i32, %c0_i32_0 : i32, i32
  }
  func.func @transform_10(%arg0: i32) -> (i32, i32) {
    %c0_i32 = arith.constant 0 : i32
    %c0_i32_0 = arith.constant 0 : i32
    return %arg0, %c0_i32 : i32, i32
  }
}

</mosaic_0001>

<bundles_post_ra>
// kernel: tpu_custom_call.1
= control target key start
LH: loop header
LB: loop body
LE: loop exit
PB: predicated region body
PF: predicated region fallthrough
CT: control target
= control target key end

     0   :  { %15 = vsyncpa [#allocation3], 0  ;;  %s9068_s0 = inlined_call_operand.vmem [shape: f32[32,8], index: 0, kind: input, shape index: {}]   ;;  %s9069_s1 = inlined_call_operand.hbm [shape: f32[16,16], index: 1, kind: input, shape index: {}]   ;;  %s9070_s2 = inlined_call_operand.vmem [shape: f32[32,64], index: 2, kind: input, shape index: {}]   ;;  %s9071_s3 = inlined_call_operand.hbm [shape: f32[32,32], index: 3, kind: input, shape index: {}]   ;;  %s9072_s4 = inlined_call_operand.vmem [shape: f32[1,64], index: 4, kind: input, shape index: {}]   ;;  %s9073_s5 = inlined_call_operand.vmem [shape: f32[1,32], index: 5, kind: input, shape index: {}]   ;;  %s9074_s6 = inlined_call_operand.hbm [shape: f32[1,64], index: 6, kind: input, shape index: {}]   ;;  %s9075_s7 = inlined_call_operand.hbm [shape: f32[1,32], index: 7, kind: input, shape index: {}]   ;;  %s9076_s8 = inlined_call_operand.vmem [shape: f32[32,128], index: 8, kind: input, shape index: {}]   ;;  %s9077_s9 = inlined_call_operand.vmem [shape: f32[1,128], index: 9, kind: input, shape index: {}]   ;;  %s9078_s10 = inlined_call_operand.hbm [shape: f32[32,128], index: 10, kind: output, shape index: {}]  }
   0x1   :  { %16 = vsyncpa [#allocation6], 0 }
   0x2   :  { %17 = vsyncpa [#allocation9], 0 }
   0x3   :  { %18 = vsyncpa [#allocation4], 0  ;;  %s8057_s13 = smov [#allocation5]   ;;  %s8058_s15 = smov [#allocation2]  }
   0x4   :  { %s40_s14 = sshll.u32 %s8057_s13, 4  ;;  %s26_s16 = sshll.u32 %s8058_s15, 4  ;;  %s41_s14 = int_to_ptr.vmem [resolvable:$true] %s40_s14  ;;  %s8130_s16 = int_to_ptr.vmem [resolvable:$true] %s26_s16 }
   0x5   :  { %s7939_s19 = scalar_lea.hbm %s9071_s3, 512 }
   0x6   :  { %p7940_p0 = scmp.ne.s32.totalorder %s9071_s3, %s7939_s19  ;;  %p7943_p1 = scmp.lt.u32.totalorder %s7939_s19, %s9071_s3 }
   0x8   :  { %p7945_p2 = pnand %p7943_p1, %p7940_p0 }
   0xa   :  { %7948 = shalt.err (!%p7945_p2)
}
   0xb   :  { %s7949_s24 = scalar_lea.vmem %s41_s14, 512  ;;  %p7954_p4 = scmp.lt.s32.totalorder %s41_s14, %s41_s14 }
   0xc   :  { %p7950_p3 = scmp.ne.s32.totalorder %s41_s14, %s7949_s24  ;;  %p7955_p5 = scmp.lt.s32.totalorder %s7949_s24, %s7949_s24 }
   0xe   :  { %p7956_p6 = por %p7955_p5, %p7954_p4 }
  0x10   :  { %p7957_p7 = pnand %p7956_p6, %p7950_p3 }
  0x12   :  { %7960 = shalt.err (!%p7957_p7)
}
  0x13   :  { %s8059_s25 = smov 128   ;;  %s8060_s26 = smov 8  }
  0x14   :  { %46 = dma.hbm_to_vmem [thread:$0]  %s9071_s3, 512, %s41_s14, [#allocation6], %s8059_s25, %s8059_s25, %s8060_s26  }
  0x15   :  { %s7961_s11 = scalar_lea.hbm %s9069_s1, 256 }
  0x16   :  { %p7962_p8 = scmp.ne.s32.totalorder %s9069_s1, %s7961_s11  ;;  %p7965_p9 = scmp.lt.u32.totalorder %s7961_s11, %s9069_s1 }
  0x18   :  { %p7967_p10 = pnand %p7965_p9, %p7962_p8 }
  0x1a   :  { %7970 = shalt.err (!%p7967_p10)
}
  0x1b   :  { %s7971_s18 = scalar_lea.vmem %s8130_s16, 256  ;;  %p7976_p12 = scmp.lt.s32.totalorder %s8130_s16, %s8130_s16 }
  0x1c   :  { %p7972_p11 = scmp.ne.s32.totalorder %s8130_s16, %s7971_s18  ;;  %p7977_p13 = scmp.lt.s32.totalorder %s7971_s18, %s7971_s18 }
  0x1e   :  { %p7978_p0 = por %p7977_p13, %p7976_p12 }
  0x20   :  { %p7979_p1 = pnand %p7978_p0, %p7972_p11 }
  0x22   :  { %7982 = shalt.err (!%p7979_p1)
}
  0x23   :  { %32 = dma.hbm_to_vmem [thread:$0]  %s9069_s1, 256, %s8130_s16, [#allocation3], %s8059_s25, %s8059_s25, %s8060_s26  }
  0x24   :  { %s8061_s19 = smov [#allocation7]   ;;  %s8062_s21 = smov [#allocation8]  }
  0x25   :  { %s57_s20 = sshll.u32 %s8061_s19, 4  ;;  %s67_s22 = sshll.u32 %s8062_s21, 4  ;;  %s58_s20 = int_to_ptr.vmem [resolvable:$true] %s57_s20  ;;  %s68_s22 = int_to_ptr.vmem [resolvable:$true] %s67_s22 }
  0x26   :  { %s7983_s27 = scalar_lea.hbm %s9074_s6, 16 }
  0x27   :  { %p7984_p2 = scmp.ne.s32.totalorder %s9074_s6, %s7983_s27  ;;  %p7987_p3 = scmp.lt.u32.totalorder %s7983_s27, %s9074_s6 }
  0x29   :  { %p7989_p4 = pnand %p7987_p3, %p7984_p2 }
  0x2b   :  { %7992 = shalt.err (!%p7989_p4)
}
  0x2c   :  { %s7993_s1 = scalar_lea.vmem %s58_s20, 16  ;;  %s7997_s16 = scalar_lea.vmem %s58_s20, 32 }
  0x2d   :  { %p7994_p5 = scmp.ne.s32.totalorder %s58_s20, %s7993_s1  ;;  %p7998_p6 = scmp.lt.s32.totalorder %s58_s20, %s58_s20 }
  0x2e   :  { %p7999_p7 = scmp.lt.s32.totalorder %s7997_s16, %s7993_s1 }
  0x30   :  { %p8000_p8 = por %p7999_p7, %p7998_p6 }
  0x32   :  { %p8001_p9 = pnand %p8000_p8, %p7994_p5 }
  0x34   :  { %8004 = shalt.err (!%p8001_p9)
}
  0x35   :  { %60 = dma.hbm_to_vmem [thread:$0]  %s9074_s6, 16, %s58_s20, [#allocation6]  }
  0x36   :  { %s8005_s18 = scalar_lea.hbm %s9075_s7, 16 }
  0x37   :  { %p8006_p10 = scmp.ne.s32.totalorder %s9075_s7, %s8005_s18  ;;  %p8009_p11 = scmp.lt.u32.totalorder %s8005_s18, %s9075_s7 }
  0x39   :  { %p8011_p12 = pnand %p8009_p11, %p8006_p10 }
  0x3b   :  { %8014 = shalt.err (!%p8011_p12)
}
  0x3c   :  { %s8015_s23 = scalar_lea.vmem %s68_s22, 16  ;;  %s8019_s24 = scalar_lea.vmem %s68_s22, 32 }
  0x3d   :  { %p8016_p13 = scmp.ne.s32.totalorder %s68_s22, %s8015_s23  ;;  %p8020_p0 = scmp.lt.s32.totalorder %s68_s22, %s68_s22 }
  0x3e   :  { %p8021_p1 = scmp.lt.s32.totalorder %s8019_s24, %s8015_s23 }
  0x40   :  { %p8022_p2 = por %p8021_p1, %p8020_p0 }
  0x42   :  { %p8023_p3 = pnand %p8022_p2, %p8016_p13 }
  0x44   :  { %8026 = shalt.err (!%p8023_p3)
}
  0x45   :  { %70 = dma.hbm_to_vmem [thread:$0]  %s9075_s7, 16, %s68_s22, [#allocation9]  }
  0x46   :  { %8049 = dma.done.wait [#allocation3], 256  }
  0x47   :  { %8050 = vsyncadd [#allocation3], 4294967040 }
  0x48   :  { %8051 = dma.done.wait [#allocation6], 528  }
  0x49   :  { %8052 = vsyncadd [#allocation6], 4294966768 }
  0x4a   :  { %8053 = dma.done.wait [#allocation9], 16  }
  0x4b   :  { %8054 = vsyncadd [#allocation9], 4294967280  ;;  %vm129_vm0 = vcmask 130048   ;;  %v125_v0 = vld [vmem:[%s9068_s0] sm:$0xff]  ;;  %v126_v1 = vld [vmem:[%s9068_s0 + $0x8] sm:$0xff]  ;;  %v8063_v7 = vmov 0.0  }
  0x4c   :  { %v8197_v2 = vld [vmem:[#allocation2] sm:$0xff]  ;;  %v7294_v3 = vpack.c.bf16 %v126_v1, %v125_v0  ;;  %v90_v5 = vld [vmem:[%s9070_s2 + $0x8] sm:$0xff]  ;;  %v91_v9 = vld [vmem:[%s9070_s2 + $0x10] sm:$0xff]  ;;  %v8064_v11 = vmov 0   ;;  %vm304_vm1 = vcmask 261120   ;;  %v8065_v58 = vmov 1  }
  0x4d   :  { %6703 = vmatprep.mubr.msk.f32.mxu1 %vm129_vm0, %v8197_v2  ;;  %v89_v4 = vld [vmem:[%s9070_s2] sm:$0xff]  ;;  %v8207_v6 = vld [vmem:[#allocation2 + $0x8] sm:$0xff]  ;;  %v92_v10 = vld [vmem:[%s9070_s2 + $0x18] sm:$0xff]  ;;  %7704 = vset.pattern.permute.xlu0 %v8064_v11  ;;  %s8066_s14 = smov 32   ;;  %s8067_s19 = smov 96  }
  0x4e   :  { %7295 = vmatprep.subr.bf16.mxu1 %v7294_v3  ;;  %v8209_v8 = vpack.c.bf16 %v90_v5, %v89_v4  ;;  %v8226_v12 = vpack.c.bf16 %v92_v10, %v91_v9  ;;  %v93_v17 = vld [vmem:[#allocation5] sm:$0xff]  ;;  %v94_v18 = vld [vmem:[#allocation5 + $0x8] sm:$0xff]  ;;  %v95_v19 = vld [vmem:[#allocation5 + $0x10] sm:$0xff]  ;;  %7706 = vset.pattern.permute.xlu1 %v8065_v58  ;;  %s8074_s17 = smov [#allocation10]  }
  0x4f   :  { %7297 = vmatpush3.bf16.msra.mxu1 %v7294_v3  ;;  %v8246_v20 = vpack.c.bf16 %v94_v18, %v93_v17  ;;  %v96_v21 = vld [vmem:[#allocation5 + $0x18] sm:$0xff]  ;;  %v8257_v25 = vld [vmem:[%s9072_s4] ss:$0 sm:$0xff]  ;;  %v8261_v28 = vld [vmem:[#allocation7] ss:$0 sm:$0xff]  ;;  %s6183_s18 = sshll.u32 %s8074_s17, 4  ;;  %s6184_s18 = int_to_ptr.vmem [resolvable:$true] %s6183_s18 }
  0x50   :  { %6706 = vmatprep.subr.mxu1 %v8063_v7  ;;  %v8248_v22 = vpack.c.bf16 %v96_v21, %v95_v19  ;;  %v8278_v48 = vld [vmem:[%s9073_s5] ss:$0 sm:$0xff]  ;;  %v8282_v51 = vld [vmem:[#allocation8] ss:$0 sm:$0xff]  ;;  %s8027_s3 = scalar_lea.vmem %s6184_s18, 512  ;;  %p8032_p5 = scmp.lt.s32.totalorder %s6184_s18, %s6184_s18 }
  0x51   :  { %7307 = vmatprep.subr.bf16.mxu0 %v8246_v20  ;;  %p8028_p4 = scmp.ne.s32.totalorder %s6184_s18, %s8027_s3  ;;  %p8033_p6 = scmp.lt.s32.totalorder %s8027_s3, %s8027_s3 }
  0x52   :  { %6704 = vmatmul.mubr.msk.f32.vlgmr.msra.gmra.mrb[0].mxu1 %vm129_vm0, %v8207_v6  ;;  %7309 = vmatpush3.bf16.msra.mxu0 %v8246_v20 }
  0x53   :  { %6707 = vmatpush3.msra.mxu1 %v8063_v7  ;;  %6708 = vmatprep.mubr.msk.f32.mxu1 %vm129_vm0, %v8197_v2  ;;  %p8034_p7 = por %p8033_p6, %p8032_p5 }
  0x54   :  { %7299 = vmatprep.subr.bf16.mxu1 %v8209_v8  ;;  %7311 = vmatprep.subr.bf16.mxu0 %v8248_v22 }
  0x55   :  { %p8035_p8 = pnand %p8034_p7, %p8028_p4 }
  0x56   :  { %6709 = vmatmul.mubr.msk.f32.vlgmr.msra.gmra.mrb[2].mxu1 %vm129_vm0, %v8207_v6  ;;  %7313 = vmatpush3.bf16.msra.mxu0 %v8248_v22 }
  0x57   :  { %7301 = vmatpush3.bf16.msra.mxu1 %v8209_v8 }
  0x58   :  { %7303 = vmatprep.subr.bf16.mxu1 %v8226_v12 }
  0x5b   :  { %7305 = vmatpush3.bf16.msra.mxu1 %v8226_v12 }
 0x125   :  { %v8230_v13 = vpop.f32.mrb[0].mxu1 }
 0x126   :  { %v8232_v14 = vpop.f32.mrb[1].mxu1 }
 0x127   :  { %213 = vperm.xlu0 %7704, %v8232_v14  }
 0x129   :  { %v8235_v15 = vpop.f32.mrb[2].mxu1 }
 0x12a   :  { %v8237_v16 = vpop.f32.mrb[3].mxu1 }
 0x12b   :  { %218 = vperm.xlu0 %7704, %v8230_v13   ;;  %6719 = vmatprep.mubr.msk.f32.mxu1 %vm304_vm1, %v8237_v16 }
 0x12c   :  { %6720 = vmatmul.mubr.msk.f32.vlgmr.msra.gmra.mrb[4].mxu1 %vm304_vm1, %v8235_v15 }
 0x12d   :  { %6737 = vmatprep.mubr.msk.f32.mxu1 %vm129_vm0, %v8197_v2 }
 0x12f   :  { %7705 = vset.pattern.permute.xlu0 %v8065_v58 }
 0x1a6   :  { %v214_v23 = vpop.permute.xlu0 %213 }
 0x1a7   :  { %v221_v27 = vmul.f32 %v8257_v25, %v214_v23  ;;  %v225_v49 = vmul.f32 %v8278_v48, %v214_v23 }
 0x1a9   :  { %v223_v31 = vadd.f32 %v8261_v28, %v221_v27  ;;  %v227_v54 = vadd.f32 %v8282_v51, %v225_v49 }
 0x1aa   :  { %v219_v24 = vpop.permute.xlu0 %218 }
 0x1ab   :  { %v222_v26 = vmul.f32 %v8257_v25, %v219_v24  ;;  %v226_v50 = vmul.f32 %v8278_v48, %v219_v24 }
 0x1ad   :  { %v224_v29 = vadd.f32 %v8261_v28, %v222_v26  ;;  %v228_v52 = vadd.f32 %v8282_v51, %v226_v50 }
 0x1ff   :  { %v6721_v30 = vpop.f32.mrb[4].mxu1 }
 0x200   :  { %v383_v32 = vadd.f32 %v6721_v30, %v224_v29  ;;  %v377_v33 = vpop.f32.mrb[5].mxu1 }
 0x201   :  { %v378_v34 = vadd.f32 %v377_v33, %v223_v31 }
 0x202   :  { %v6208_v35 = vmul.f32 -1.442695, %v383_v32 }
 0x203   :  { %v6207_v36 = vmul.f32 -1.442695, %v378_v34 }
 0x204   :  { %7735 = vpow2.f32 %v6208_v35 }
 0x205   :  { %7737 = vpow2.f32 %v6207_v36 }
 0x20e   :  { %v7736_v37 = vpop.eup %7735 }
 0x20f   :  { %v7738_v38 = vpop.eup %7737  ;;  %v393_v39 = vadd.f32 1.0, %v7736_v37 }
 0x210   :  { %v392_v40 = vadd.f32 1.0, %v7738_v38 }
 0x211   :  { %7739 = vrcp.f32 %v393_v39 }
 0x212   :  { %7741 = vrcp.f32 %v392_v40 }
 0x21b   :  { %v7740_v41 = vpop.eup %7739 }
 0x21c   :  { %v7742_v42 = vpop.eup %7741  ;;  %v399_v44 = vmul.f32 0.0, %v7740_v41 }
 0x21d   :  { %v398_v43 = vmul.f32 0.0, %v7742_v42 }
 0x21f   :  { %6730 = vmatprep.mubr.msk.f32.mxu0 %vm304_vm1, %v398_v43 }
 0x220   :  { %6731 = vmatmul.mubr.msk.f32.vlgmr.msra.gmra.mrb[0].mxu0 %vm304_vm1, %v399_v44 }
 0x221   :  { %6744 = vmatprep.mubr.msk.f32.mxu0 %vm129_vm0, %v8197_v2 }
 0x2f3   :  { %v6732_v45 = vpop.f32.mrb[0].mxu0 }
 0x2f4   :  { %v472_v46 = vpop.f32.mrb[1].mxu0 }
 0x2f5   :  { %v7314_v47 = vpack.c.bf16 %v6732_v45, %v472_v46 }
 0x2f7   :  { %7315 = vmatprep.subr.bf16.mxu1 %v7314_v47 }
 0x2f8   :  { %7317 = vmatpush3.bf16.msra.mxu1 %v7314_v47 }
 0x2f9   :  { %7323 = vmatprep.subr.bf16.mxu1 %v8209_v8 }
 0x2fb   :  { %6738 = vmatmul.mubr.msk.f32.vlgmr.msra.gmra.mrb[6].mxu1 %vm129_vm0, %v8207_v6 }
 0x2fc   :  { %7325 = vmatpush3.bf16.msra.mxu1 %v8209_v8 }
 0x2fd   :  { %7327 = vmatprep.subr.bf16.mxu1 %v8226_v12 }
 0x300   :  { %7329 = vmatpush3.bf16.msra.mxu1 %v8226_v12 }
 0x3ce   :  { %v6739_v53 = vpop.f32.mrb[6].mxu1 }
 0x3cf   :  { %v547_v55 = vpop.f32.mrb[7].mxu1  ;;  %v553_v56 = vadd.f32 %v6739_v53, %v228_v52 }
 0x3d0   :  { %v548_v57 = vadd.f32 %v547_v55, %v227_v54 }
 0x3d2   :  { %7743 = vtanh.f32 %v548_v57 }
 0x3d3   :  { %7745 = vtanh.f32 %v553_v56  ;;  %v8068_v56 = vmov 2  }
 0x3dc   :  { %v7744_v59 = vpop.eup %7743 }
 0x3dd   :  { %v558_v60 = vsub.f32 0.0, %v7744_v59  ;;  %v7746_v61 = vpop.eup %7745 }
 0x3de   :  { %v559_v62 = vsub.f32 0.0, %v7746_v61 }
 0x3df   :  { %562 = vrot.lane.b32.xlu1 %v558_v60, %s8066_s14 }
 0x3e3   :  { %564 = vrot.lane.b32.xlu1 %v559_v62, %s8066_s14 }
 0x451   :  { %v563_v63 = vpop.permute.xlu1 %562 }
 0x452   :  { %v568_v0 = vmul.f32 %v7742_v42, %v563_v63 }
 0x454   :  { %572 = vrot.lane.b32.xlu0 %v568_v0, %s8067_s19 }
 0x455   :  { %v565_v1 = vpop.permute.xlu1 %564 }
 0x456   :  { %v569_v3 = vmul.f32 %v7740_v41, %v565_v1 }
 0x458   :  { %581 = vperm.xlu0 %7705, %v8232_v14   ;;  %574 = vrot.lane.b32.xlu1 %v569_v3, %s8067_s19 }
 0x45c   :  { %585 = vperm.xlu1 %7706, %v8230_v13   ;;  %7708 = vset.pattern.permute.xlu0 %v8068_v56 }
 0x460   :  { %7707 = vset.pattern.permute.xlu1 %v8068_v56 }
 0x4c6   :  { %v573_v4 = vpop.permute.xlu0 %572 }
 0x4c7   :  { %v8294_v7 = vadd.f32 %v7744_v59, %v573_v4 }
 0x4ca   :  { %v575_v5 = vpop.permute.xlu1 %574 }
 0x4cb   :  { %v8296_v9 = vadd.f32 %v7746_v61, %v575_v5 }
 0x4cd   :  { %v7318_v10 = vpack.c.bf16 %v8296_v9, %v8294_v7 }
 0x4cf   :  { %7319 = vmatprep.subr.bf16.mxu0 %v7318_v10 }
 0x4d0   :  { %7321 = vmatpush3.bf16.msra.mxu0 %v7318_v10 }
 0x4d1   :  { %7331 = vmatprep.subr.bf16.mxu0 %v8246_v20 }
 0x4d3   :  { %6745 = vmatmul.mubr.msk.f32.vlgmr.msra.gmra.mrb[2].mxu0 %vm129_vm0, %v8207_v6 }
 0x4d4   :  { %7333 = vmatpush3.bf16.msra.mxu0 %v8246_v20 }
 0x4d5   :  { %7335 = vmatprep.subr.bf16.mxu0 %v8248_v22 }
 0x4d7   :  { %v582_v21 = vpop.permute.xlu0 %581 }
 0x4d8   :  { %7337 = vmatpush3.bf16.msra.mxu0 %v8248_v22  ;;  %v588_v24 = vmul.f32 %v8257_v25, %v582_v21  ;;  %v592_v47 = vmul.f32 %v8278_v48, %v582_v21 }
 0x4da   :  { %v590_v29 = vadd.f32 %v8261_v28, %v588_v24  ;;  %v594_v52 = vadd.f32 %v8282_v51, %v592_v47 }
 0x4db   :  { %v586_v19 = vpop.permute.xlu1 %585 }
 0x4dc   :  { %v589_v23 = vmul.f32 %v8257_v25, %v586_v19  ;;  %v593_v46 = vmul.f32 %v8278_v48, %v586_v19 }
 0x4de   :  { %v591_v26 = vadd.f32 %v8261_v28, %v589_v23  ;;  %v595_v49 = vadd.f32 %v8282_v51, %v593_v46 }
 0x5a6   :  { %v6746_v17 = vpop.f32.mrb[2].mxu0 }
 0x5a7   :  { %v662_v18 = vpop.f32.mrb[3].mxu0 }
 0x5a8   :  { %6755 = vmatprep.mubr.msk.f32.mxu1 %vm304_vm1, %v662_v18 }
 0x5a9   :  { %6756 = vmatmul.mubr.msk.f32.vlgmr.msra.gmra.mrb[8].mxu1 %vm304_vm1, %v6746_v17 }
 0x5aa   :  { %6773 = vmatprep.mubr.msk.f32.mxu1 %vm129_vm0, %v8197_v2 }
 0x67c   :  { %v6757_v27 = vpop.f32.mrb[8].mxu1 }
 0x67d   :  { %v749_v30 = vadd.f32 %v6757_v27, %v591_v26  ;;  %v743_v31 = vpop.f32.mrb[9].mxu1 }
 0x67e   :  { %v744_v32 = vadd.f32 %v743_v31, %v590_v29 }
 0x67f   :  { %v6218_v33 = vmul.f32 -1.442695, %v749_v30 }
 0x680   :  { %v6217_v34 = vmul.f32 -1.442695, %v744_v32 }
 0x681   :  { %7747 = vpow2.f32 %v6218_v33 }
 0x682   :  { %7749 = vpow2.f32 %v6217_v34 }
 0x68b   :  { %v7748_v35 = vpop.eup %7747 }
 0x68c   :  { %v7750_v36 = vpop.eup %7749  ;;  %v759_v37 = vadd.f32 1.0, %v7748_v35 }
 0x68d   :  { %v758_v38 = vadd.f32 1.0, %v7750_v36 }
 0x68e   :  { %7751 = vrcp.f32 %v759_v37 }
 0x68f   :  { %7753 = vrcp.f32 %v758_v38 }
 0x698   :  { %v7752_v39 = vpop.eup %7751 }
 0x699   :  { %v7754_v40 = vpop.eup %7753  ;;  %v765_v42 = vmul.f32 %v7752_v39, %v8296_v9 }
 0x69a   :  { %v764_v41 = vmul.f32 %v7754_v40, %v8294_v7 }
 0x69c   :  { %6766 = vmatprep.mubr.msk.f32.mxu0 %vm304_vm1, %v764_v41 }
 0x69d   :  { %6767 = vmatmul.mubr.msk.f32.vlgmr.msra.gmra.mrb[4].mxu0 %vm304_vm1, %v765_v42 }
 0x69e   :  { %6780 = vmatprep.mubr.msk.f32.mxu0 %vm129_vm0, %v8197_v2 }
 0x770   :  { %v6768_v43 = vpop.f32.mrb[4].mxu0 }
 0x771   :  { %v838_v44 = vpop.f32.mrb[5].mxu0 }
 0x772   :  { %v7338_v45 = vpack.c.bf16 %v6768_v43, %v838_v44 }
 0x774   :  { %7339 = vmatprep.subr.bf16.mxu1 %v7338_v45 }
 0x775   :  { %7341 = vmatpush3.bf16.msra.mxu1 %v7338_v45 }
 0x776   :  { %7347 = vmatprep.subr.bf16.mxu1 %v8209_v8 }
 0x778   :  { %6774 = vmatmul.mubr.msk.f32.vlgmr.msra.gmra.mrb[10].mxu1 %vm129_vm0, %v8207_v6 }
 0x779   :  { %7349 = vmatpush3.bf16.msra.mxu1 %v8209_v8 }
 0x77a   :  { %7351 = vmatprep.subr.bf16.mxu1 %v8226_v12 }
 0x77d   :  { %7353 = vmatpush3.bf16.msra.mxu1 %v8226_v12 }
 0x84b   :  { %v6775_v50 = vpop.f32.mrb[10].mxu1 }
 0x84c   :  { %v919_v53 = vadd.f32 %v6775_v50, %v595_v49  ;;  %v913_v54 = vpop.f32.mrb[11].mxu1 }
 0x84d   :  { %v914_v55 = vadd.f32 %v913_v54, %v594_v52 }
 0x84e   :  { %7755 = vtanh.f32 %v919_v53 }
 0x84f   :  { %7757 = vtanh.f32 %v914_v55  ;;  %v8069_v55 = vmov 3  }
 0x858   :  { %v7756_v57 = vpop.eup %7755 }
 0x859   :  { %v7758_v59 = vpop.eup %7757  ;;  %v925_v60 = vsub.f32 %v8296_v9, %v7756_v57 }
 0x85a   :  { %v924_v61 = vsub.f32 %v8294_v7, %v7758_v59 }
 0x85b   :  { %930 = vrot.lane.b32.xlu0 %v925_v60, %s8066_s14 }
 0x85c   :  { %928 = vrot.lane.b32.xlu1 %v924_v61, %s8066_s14 }
 0x8cd   :  { %v931_v62 = vpop.permute.xlu0 %930 }
 0x8ce   :  { %v935_v63 = vmul.f32 %v7752_v39, %v931_v62  ;;  %v929_v0 = vpop.permute.xlu1 %928 }
 0x8cf   :  { %v934_v1 = vmul.f32 %v7754_v40, %v929_v0 }
 0x8d0   :  { %940 = vrot.lane.b32.xlu0 %v935_v63, %s8067_s19 }
 0x8d1   :  { %938 = vrot.lane.b32.xlu1 %v934_v1, %s8067_s19 }
 0x8d4   :  { %951 = vperm.xlu0 %7708, %v8230_v13  }
 0x8d5   :  { %947 = vperm.xlu1 %7707, %v8232_v14  }
 0x8d8   :  { %7709 = vset.pattern.permute.xlu0 %v8069_v55 }
 0x8d9   :  { %7710 = vset.pattern.permute.xlu1 %v8069_v55 }
 0x942   :  { %v941_v3 = vpop.permute.xlu0 %940 }
 0x943   :  { %v8340_v4 = vadd.f32 %v7756_v57, %v941_v3  ;;  %v939_v5 = vpop.permute.xlu1 %938 }
 0x944   :  { %v8342_v7 = vadd.f32 %v7758_v59, %v939_v5 }
 0x946   :  { %v7342_v9 = vpack.c.bf16 %v8340_v4, %v8342_v7 }
 0x948   :  { %7343 = vmatprep.subr.bf16.mxu0 %v7342_v9 }
 0x949   :  { %7345 = vmatpush3.bf16.msra.mxu0 %v7342_v9 }
 0x94a   :  { %7355 = vmatprep.subr.bf16.mxu0 %v8246_v20 }
 0x94c   :  { %6781 = vmatmul.mubr.msk.f32.vlgmr.msra.gmra.mrb[6].mxu0 %vm129_vm0, %v8207_v6 }
 0x94d   :  { %7357 = vmatpush3.bf16.msra.mxu0 %v8246_v20 }
 0x94e   :  { %7359 = vmatprep.subr.bf16.mxu0 %v8248_v22 }
 0x951   :  { %7361 = vmatpush3.bf16.msra.mxu0 %v8248_v22 }
 0x953   :  { %v952_v18 = vpop.permute.xlu0 %951 }
 0x954   :  { %v948_v19 = vpop.permute.xlu1 %947  ;;  %v955_v21 = vmul.f32 %v8257_v25, %v952_v18  ;;  %v959_v45 = vmul.f32 %v8278_v48, %v952_v18 }
 0x955   :  { %v954_v23 = vmul.f32 %v8257_v25, %v948_v19  ;;  %v958_v46 = vmul.f32 %v8278_v48, %v948_v19 }
 0x956   :  { %v957_v24 = vadd.f32 %v8261_v28, %v955_v21  ;;  %v961_v47 = vadd.f32 %v8282_v51, %v959_v45 }
 0x957   :  { %v956_v27 = vadd.f32 %v8261_v28, %v954_v23  ;;  %v960_v50 = vadd.f32 %v8282_v51, %v958_v46 }
 0xa1f   :  { %v6782_v10 = vpop.f32.mrb[6].mxu0 }
 0xa20   :  { %v1028_v17 = vpop.f32.mrb[7].mxu0 }
 0xa21   :  { %6791 = vmatprep.mubr.msk.f32.mxu1 %vm304_vm1, %v1028_v17 }
 0xa22   :  { %6792 = vmatmul.mubr.msk.f32.vlgmr.msra.gmra.mrb[12].mxu1 %vm304_vm1, %v6782_v10 }
 0xa23   :  { %6809 = vmatprep.mubr.msk.f32.mxu1 %vm129_vm0, %v8197_v2 }
 0xaf5   :  { %v6793_v26 = vpop.f32.mrb[12].mxu1 }
 0xaf6   :  { %v1115_v29 = vadd.f32 %v6793_v26, %v957_v24  ;;  %v1109_v30 = vpop.f32.mrb[13].mxu1 }
 0xaf7   :  { %v1110_v31 = vadd.f32 %v1109_v30, %v956_v27 }
 0xaf8   :  { %v6228_v32 = vmul.f32 -1.442695, %v1115_v29 }
 0xaf9   :  { %v6227_v33 = vmul.f32 -1.442695, %v1110_v31 }
 0xafa   :  { %7759 = vpow2.f32 %v6228_v32 }
 0xafb   :  { %7761 = vpow2.f32 %v6227_v33 }
 0xb04   :  { %v7760_v34 = vpop.eup %7759 }
 0xb05   :  { %v7762_v35 = vpop.eup %7761  ;;  %v1125_v36 = vadd.f32 1.0, %v7760_v34 }
 0xb06   :  { %v1124_v37 = vadd.f32 1.0, %v7762_v35 }
 0xb07   :  { %7763 = vrcp.f32 %v1125_v36 }
 0xb08   :  { %7765 = vrcp.f32 %v1124_v37 }
 0xb11   :  { %v7764_v38 = vpop.eup %7763 }
 0xb12   :  { %v7766_v39 = vpop.eup %7765  ;;  %v1131_v41 = vmul.f32 %v7764_v38, %v8340_v4 }
 0xb13   :  { %v1130_v40 = vmul.f32 %v7766_v39, %v8342_v7 }
 0xb15   :  { %6802 = vmatprep.mubr.msk.f32.mxu0 %vm304_vm1, %v1130_v40 }
 0xb16   :  { %6803 = vmatmul.mubr.msk.f32.vlgmr.msra.gmra.mrb[8].mxu0 %vm304_vm1, %v1131_v41 }
 0xb17   :  { %6816 = vmatprep.mubr.msk.f32.mxu0 %vm129_vm0, %v8197_v2 }
 0xbe9   :  { %v6804_v42 = vpop.f32.mrb[8].mxu0 }
 0xbea   :  { %v1204_v43 = vpop.f32.mrb[9].mxu0 }
 0xbeb   :  { %v7362_v44 = vpack.c.bf16 %v6804_v42, %v1204_v43 }
 0xbed   :  { %7363 = vmatprep.subr.bf16.mxu1 %v7362_v44 }
 0xbee   :  { %7365 = vmatpush3.bf16.msra.mxu1 %v7362_v44 }
 0xbef   :  { %7371 = vmatprep.subr.bf16.mxu1 %v8209_v8 }
 0xbf1   :  { %6810 = vmatmul.mubr.msk.f32.vlgmr.msra.gmra.mrb[14].mxu1 %vm129_vm0, %v8207_v6 }
 0xbf2   :  { %7373 = vmatpush3.bf16.msra.mxu1 %v8209_v8 }
 0xbf3   :  { %7375 = vmatprep.subr.bf16.mxu1 %v8226_v12 }
 0xbf6   :  { %7377 = vmatpush3.bf16.msra.mxu1 %v8226_v12 }
 0xcc4   :  { %v6811_v49 = vpop.f32.mrb[14].mxu1 }
 0xcc5   :  { %v1279_v52 = vpop.f32.mrb[15].mxu1  ;;  %v1285_v53 = vadd.f32 %v6811_v49, %v961_v47 }
 0xcc6   :  { %v1280_v54 = vadd.f32 %v1279_v52, %v960_v50 }
 0xcc8   :  { %7767 = vtanh.f32 %v1280_v54 }
 0xcc9   :  { %7769 = vtanh.f32 %v1285_v53 }
 0xcd2   :  { %v7768_v57 = vpop.eup %7767 }
 0xcd3   :  { %v1290_v59 = vsub.f32 %v8342_v7, %v7768_v57  ;;  %v7770_v60 = vpop.eup %7769 }
 0xcd4   :  { %v1291_v61 = vsub.f32 %v8340_v4, %v7770_v60 }
 0xcd5   :  { %1294 = vrot.lane.b32.xlu1 %v1290_v59, %s8066_s14 }
 0xcd9   :  { %1296 = vrot.lane.b32.xlu1 %v1291_v61, %s8066_s14 }
 0xd47   :  { %v1295_v62 = vpop.permute.xlu1 %1294 }
 0xd48   :  { %v1300_v63 = vmul.f32 %v7766_v39, %v1295_v62 }
 0xd4a   :  { %1304 = vrot.lane.b32.xlu0 %v1300_v63, %s8067_s19 }
 0xd4b   :  { %v1297_v0 = vpop.permute.xlu1 %1296 }
 0xd4c   :  { %v1301_v1 = vmul.f32 %v7764_v38, %v1297_v0 }
 0xd4e   :  { %1313 = vperm.xlu0 %7709, %v8232_v14   ;;  %1306 = vrot.lane.b32.xlu1 %v1301_v1, %s8067_s19 }
 0xd52   :  { %1317 = vperm.xlu1 %7710, %v8230_v13  }
 0xdbc   :  { %v1305_v3 = vpop.permute.xlu0 %1304 }
 0xdbd   :  { %v8386_v7 = vadd.f32 %v7768_v57, %v1305_v3  ;;  %v8070_v57 = vmov 4  }
 0xdbe   :  { %7712 = vset.pattern.permute.xlu0 %v8070_v57  ;;  %7711 = vset.pattern.permute.xlu1 %v8070_v57 }
 0xdc0   :  { %v1307_v5 = vpop.permute.xlu1 %1306 }
 0xdc1   :  { %v8388_v9 = vadd.f32 %v7770_v60, %v1307_v5 }
 0xdc3   :  { %v7366_v4 = vpack.c.bf16 %v8388_v9, %v8386_v7 }
 0xdc5   :  { %7367 = vmatprep.subr.bf16.mxu0 %v7366_v4 }
 0xdc6   :  { %7369 = vmatpush3.bf16.msra.mxu0 %v7366_v4 }
 0xdc7   :  { %7379 = vmatprep.subr.bf16.mxu0 %v8246_v20 }
 0xdc9   :  { %6817 = vmatmul.mubr.msk.f32.vlgmr.msra.gmra.mrb[10].mxu0 %vm129_vm0, %v8207_v6 }
 0xdca   :  { %7381 = vmatpush3.bf16.msra.mxu0 %v8246_v20 }
 0xdcb   :  { %7383 = vmatprep.subr.bf16.mxu0 %v8248_v22 }
 0xdcd   :  { %v1314_v19 = vpop.permute.xlu0 %1313 }
 0xdce   :  { %7385 = vmatpush3.bf16.msra.mxu0 %v8248_v22  ;;  %v1320_v23 = vmul.f32 %v8257_v25, %v1314_v19  ;;  %v1324_v46 = vmul.f32 %v8278_v48, %v1314_v19 }
 0xdd0   :  { %v1322_v27 = vadd.f32 %v8261_v28, %v1320_v23  ;;  %v1326_v50 = vadd.f32 %v8282_v51, %v1324_v46 }
 0xdd1   :  { %v1318_v18 = vpop.permute.xlu1 %1317 }
 0xdd2   :  { %v1321_v21 = vmul.f32 %v8257_v25, %v1318_v18  ;;  %v1325_v45 = vmul.f32 %v8278_v48, %v1318_v18 }
 0xdd4   :  { %v1323_v24 = vadd.f32 %v8261_v28, %v1321_v21  ;;  %v1327_v47 = vadd.f32 %v8282_v51, %v1325_v45 }
 0xe9c   :  { %v6818_v10 = vpop.f32.mrb[10].mxu0 }
 0xe9d   :  { %v1394_v17 = vpop.f32.mrb[11].mxu0 }
 0xe9e   :  { %6827 = vmatprep.mubr.msk.f32.mxu1 %vm304_vm1, %v1394_v17 }
 0xe9f   :  { %6828 = vmatmul.mubr.msk.f32.vlgmr.msra.gmra.mrb[16].mxu1 %vm304_vm1, %v6818_v10 }
 0xea0   :  { %6845 = vmatprep.mubr.msk.f32.mxu1 %vm129_vm0, %v8197_v2 }
 0xf72   :  { %v6829_v26 = vpop.f32.mrb[16].mxu1 }
 0xf73   :  { %v1481_v29 = vadd.f32 %v6829_v26, %v1323_v24  ;;  %v1475_v30 = vpop.f32.mrb[17].mxu1 }
 0xf74   :  { %v1476_v31 = vadd.f32 %v1475_v30, %v1322_v27 }
 0xf75   :  { %v6238_v32 = vmul.f32 -1.442695, %v1481_v29 }
 0xf76   :  { %v6237_v33 = vmul.f32 -1.442695, %v1476_v31 }
 0xf77   :  { %7771 = vpow2.f32 %v6238_v32 }
 0xf78   :  { %7773 = vpow2.f32 %v6237_v33 }
 0xf81   :  { %v7772_v34 = vpop.eup %7771 }
 0xf82   :  { %v7774_v35 = vpop.eup %7773  ;;  %v1491_v36 = vadd.f32 1.0, %v7772_v34 }
 0xf83   :  { %v1490_v37 = vadd.f32 1.0, %v7774_v35 }
 0xf84   :  { %7775 = vrcp.f32 %v1491_v36 }
 0xf85   :  { %7777 = vrcp.f32 %v1490_v37 }
 0xf8e   :  { %v7776_v38 = vpop.eup %7775 }
 0xf8f   :  { %v7778_v39 = vpop.eup %7777  ;;  %v1497_v41 = vmul.f32 %v7776_v38, %v8388_v9 }
 0xf90   :  { %v1496_v40 = vmul.f32 %v7778_v39, %v8386_v7 }
 0xf92   :  { %6838 = vmatprep.mubr.msk.f32.mxu0 %vm304_vm1, %v1496_v40 }
 0xf93   :  { %6839 = vmatmul.mubr.msk.f32.vlgmr.msra.gmra.mrb[12].mxu0 %vm304_vm1, %v1497_v41 }
 0xf94   :  { %6852 = vmatprep.mubr.msk.f32.mxu0 %vm129_vm0, %v8197_v2 }
0x1066   :  { %v6840_v42 = vpop.f32.mrb[12].mxu0 }
0x1067   :  { %v1570_v43 = vpop.f32.mrb[13].mxu0 }
0x1068   :  { %v7386_v44 = vpack.c.bf16 %v6840_v42, %v1570_v43 }
0x106a   :  { %7387 = vmatprep.subr.bf16.mxu1 %v7386_v44 }
0x106b   :  { %7389 = vmatpush3.bf16.msra.mxu1 %v7386_v44 }
0x106c   :  { %7395 = vmatprep.subr.bf16.mxu1 %v8209_v8 }
0x106e   :  { %6846 = vmatmul.mubr.msk.f32.vlgmr.msra.gmra.mrb[18].mxu1 %vm129_vm0, %v8207_v6 }
0x106f   :  { %7397 = vmatpush3.bf16.msra.mxu1 %v8209_v8 }
0x1070   :  { %7399 = vmatprep.subr.bf16.mxu1 %v8226_v12 }
0x1073   :  { %7401 = vmatpush3.bf16.msra.mxu1 %v8226_v12 }
0x1141   :  { %v6847_v49 = vpop.f32.mrb[18].mxu1 }
0x1142   :  { %v1651_v52 = vadd.f32 %v6847_v49, %v1327_v47  ;;  %v1645_v53 = vpop.f32.mrb[19].mxu1 }
0x1143   :  { %v1646_v54 = vadd.f32 %v1645_v53, %v1326_v50 }
0x1144   :  { %7779 = vtanh.f32 %v1651_v52 }
0x1145   :  { %7781 = vtanh.f32 %v1646_v54 }
0x114e   :  { %v7780_v59 = vpop.eup %7779 }
0x114f   :  { %v7782_v60 = vpop.eup %7781  ;;  %v1657_v61 = vsub.f32 %v8388_v9, %v7780_v59 }
0x1150   :  { %v1656_v62 = vsub.f32 %v8386_v7, %v7782_v60 }
0x1151   :  { %1662 = vrot.lane.b32.xlu0 %v1657_v61, %s8066_s14 }
0x1152   :  { %1660 = vrot.lane.b32.xlu1 %v1656_v62, %s8066_s14 }
0x11c3   :  { %v1663_v63 = vpop.permute.xlu0 %1662 }
0x11c4   :  { %v1667_v0 = vmul.f32 %v7776_v38, %v1663_v63  ;;  %v1661_v1 = vpop.permute.xlu1 %1660 }
0x11c5   :  { %v1666_v3 = vmul.f32 %v7778_v39, %v1661_v1 }
0x11c6   :  { %1672 = vrot.lane.b32.xlu0 %v1667_v0, %s8067_s19 }
0x11c7   :  { %1670 = vrot.lane.b32.xlu1 %v1666_v3, %s8067_s19 }
0x11ca   :  { %1683 = vperm.xlu0 %7712, %v8230_v13  }
0x11cb   :  { %1679 = vperm.xlu1 %7711, %v8232_v14  }
0x1238   :  { %v1673_v5 = vpop.permute.xlu0 %1672 }
0x1239   :  { %v8432_v9 = vadd.f32 %v7780_v59, %v1673_v5  ;;  %v1671_v7 = vpop.permute.xlu1 %1670 }
0x123a   :  { %v8434_v4 = vadd.f32 %v7782_v60, %v1671_v7  ;;  %v8071_v60 = vmov 5  }
0x123b   :  { %7713 = vset.pattern.permute.xlu0 %v8071_v60  ;;  %7714 = vset.pattern.permute.xlu1 %v8071_v60 }
0x123c   :  { %v7390_v10 = vpack.c.bf16 %v8432_v9, %v8434_v4 }
0x123e   :  { %7391 = vmatprep.subr.bf16.mxu0 %v7390_v10 }
0x123f   :  { %7393 = vmatpush3.bf16.msra.mxu0 %v7390_v10 }
0x1240   :  { %7403 = vmatprep.subr.bf16.mxu0 %v8246_v20 }
0x1242   :  { %6853 = vmatmul.mubr.msk.f32.vlgmr.msra.gmra.mrb[14].mxu0 %vm129_vm0, %v8207_v6 }
0x1243   :  { %7405 = vmatpush3.bf16.msra.mxu0 %v8246_v20 }
0x1244   :  { %7407 = vmatprep.subr.bf16.mxu0 %v8248_v22 }
0x1247   :  { %7409 = vmatpush3.bf16.msra.mxu0 %v8248_v22 }
0x1249   :  { %v1684_v19 = vpop.permute.xlu0 %1683 }
0x124a   :  { %v1680_v21 = vpop.permute.xlu1 %1679  ;;  %v1687_v23 = vmul.f32 %v8257_v25, %v1684_v19  ;;  %v1691_v46 = vmul.f32 %v8278_v48, %v1684_v19 }
0x124b   :  { %v1686_v24 = vmul.f32 %v8257_v25, %v1680_v21  ;;  %v1690_v47 = vmul.f32 %v8278_v48, %v1680_v21 }
0x124c   :  { %v1689_v26 = vadd.f32 %v8261_v28, %v1687_v23  ;;  %v1693_v49 = vadd.f32 %v8282_v51, %v1691_v46 }
0x124d   :  { %v1688_v29 = vadd.f32 %v8261_v28, %v1686_v24  ;;  %v1692_v52 = vadd.f32 %v8282_v51, %v1690_v47 }
0x1315   :  { %v6854_v17 = vpop.f32.mrb[14].mxu0 }
0x1316   :  { %v1760_v18 = vpop.f32.mrb[15].mxu0 }
0x1317   :  { %6863 = vmatprep.mubr.msk.f32.mxu1 %vm304_vm1, %v1760_v18 }
0x1318   :  { %6864 = vmatmul.mubr.msk.f32.vlgmr.msra.gmra.mrb[20].mxu1 %vm304_vm1, %v6854_v17 }
0x1319   :  { %6881 = vmatprep.mubr.msk.f32.mxu1 %vm129_vm0, %v8197_v2 }
0x13eb   :  { %v6865_v27 = vpop.f32.mrb[20].mxu1 }
0x13ec   :  { %v1847_v30 = vadd.f32 %v6865_v27, %v1689_v26  ;;  %v1841_v31 = vpop.f32.mrb[21].mxu1 }
0x13ed   :  { %v1842_v32 = vadd.f32 %v1841_v31, %v1688_v29 }
0x13ee   :  { %v6248_v33 = vmul.f32 -1.442695, %v1847_v30 }
0x13ef   :  { %v6247_v34 = vmul.f32 -1.442695, %v1842_v32 }
0x13f0   :  { %7783 = vpow2.f32 %v6248_v33 }
0x13f1   :  { %7785 = vpow2.f32 %v6247_v34 }
0x13fa   :  { %v7784_v35 = vpop.eup %7783 }
0x13fb   :  { %v7786_v36 = vpop.eup %7785  ;;  %v1857_v37 = vadd.f32 1.0, %v7784_v35 }
0x13fc   :  { %v1856_v38 = vadd.f32 1.0, %v7786_v36 }
0x13fd   :  { %7787 = vrcp.f32 %v1857_v37 }
0x13fe   :  { %7789 = vrcp.f32 %v1856_v38 }
0x1407   :  { %v7788_v39 = vpop.eup %7787 }
0x1408   :  { %v7790_v40 = vpop.eup %7789  ;;  %v1863_v42 = vmul.f32 %v7788_v39, %v8432_v9 }
0x1409   :  { %v1862_v41 = vmul.f32 %v7790_v40, %v8434_v4 }
0x140b   :  { %6874 = vmatprep.mubr.msk.f32.mxu0 %vm304_vm1, %v1862_v41 }
0x140c   :  { %6875 = vmatmul.mubr.msk.f32.vlgmr.msra.gmra.mrb[16].mxu0 %vm304_vm1, %v1863_v42 }
0x140d   :  { %6888 = vmatprep.mubr.msk.f32.mxu0 %vm129_vm0, %v8197_v2 }
0x14df   :  { %v6876_v43 = vpop.f32.mrb[16].mxu0 }
0x14e0   :  { %v1936_v44 = vpop.f32.mrb[17].mxu0 }
0x14e1   :  { %v7410_v45 = vpack.c.bf16 %v6876_v43, %v1936_v44 }
0x14e3   :  { %7411 = vmatprep.subr.bf16.mxu1 %v7410_v45 }
0x14e4   :  { %7413 = vmatpush3.bf16.msra.mxu1 %v7410_v45 }
0x14e5   :  { %7419 = vmatprep.subr.bf16.mxu1 %v8209_v8 }
0x14e7   :  { %6882 = vmatmul.mubr.msk.f32.vlgmr.msra.gmra.mrb[22].mxu1 %vm129_vm0, %v8207_v6 }
0x14e8   :  { %7421 = vmatpush3.bf16.msra.mxu1 %v8209_v8 }
0x14e9   :  { %7423 = vmatprep.subr.bf16.mxu1 %v8226_v12 }
0x14ec   :  { %7425 = vmatpush3.bf16.msra.mxu1 %v8226_v12 }
0x15ba   :  { %v6883_v50 = vpop.f32.mrb[22].mxu1 }
0x15bb   :  { %v2011_v53 = vpop.f32.mrb[23].mxu1  ;;  %v2017_v54 = vadd.f32 %v6883_v50, %v1693_v49 }
0x15bc   :  { %v2012_v59 = vadd.f32 %v2011_v53, %v1692_v52 }
0x15be   :  { %7791 = vtanh.f32 %v2012_v59 }
0x15bf   :  { %7793 = vtanh.f32 %v2017_v54 }
0x15c8   :  { %v7792_v61 = vpop.eup %7791 }
0x15c9   :  { %v2022_v62 = vsub.f32 %v8434_v4, %v7792_v61  ;;  %v7794_v63 = vpop.eup %7793 }
0x15ca   :  { %v2023_v0 = vsub.f32 %v8432_v9, %v7794_v63 }
0x15cb   :  { %2026 = vrot.lane.b32.xlu1 %v2022_v62, %s8066_s14 }
0x15cf   :  { %2028 = vrot.lane.b32.xlu1 %v2023_v0, %s8066_s14 }
0x163d   :  { %v2027_v1 = vpop.permute.xlu1 %2026 }
0x163e   :  { %v2032_v3 = vmul.f32 %v7790_v40, %v2027_v1 }
0x1640   :  { %2036 = vrot.lane.b32.xlu0 %v2032_v3, %s8067_s19 }
0x1641   :  { %v2029_v5 = vpop.permute.xlu1 %2028 }
0x1642   :  { %v2033_v7 = vmul.f32 %v7788_v39, %v2029_v5 }
0x1644   :  { %2045 = vperm.xlu0 %7713, %v8232_v14   ;;  %2038 = vrot.lane.b32.xlu1 %v2033_v7, %s8067_s19 }
0x1648   :  { %2049 = vperm.xlu1 %7714, %v8230_v13  }
0x16b2   :  { %v2037_v4 = vpop.permute.xlu0 %2036 }
0x16b3   :  { %v8478_v17 = vadd.f32 %v7792_v61, %v2037_v4 }
0x16b6   :  { %v2039_v10 = vpop.permute.xlu1 %2038 }
0x16b7   :  { %v8480_v18 = vadd.f32 %v7794_v63, %v2039_v10 }
0x16b9   :  { %v7414_v9 = vpack.c.bf16 %v8480_v18, %v8478_v17 }
0x16bb   :  { %7415 = vmatprep.subr.bf16.mxu0 %v7414_v9 }
0x16bc   :  { %7417 = vmatpush3.bf16.msra.mxu0 %v7414_v9 }
0x16bd   :  { %7427 = vmatprep.subr.bf16.mxu0 %v8246_v20 }
0x16bf   :  { %6889 = vmatmul.mubr.msk.f32.vlgmr.msra.gmra.mrb[18].mxu0 %vm129_vm0, %v8207_v6 }
0x16c0   :  { %7429 = vmatpush3.bf16.msra.mxu0 %v8246_v20 }
0x16c1   :  { %7431 = vmatprep.subr.bf16.mxu0 %v8248_v22 }
0x16c3   :  { %v2046_v24 = vpop.permute.xlu0 %2045 }
0x16c4   :  { %7433 = vmatpush3.bf16.msra.mxu0 %v8248_v22  ;;  %v2052_v27 = vmul.f32 %v8257_v25, %v2046_v24 }
0x16c6   :  { %v2054_v31 = vadd.f32 %v8261_v28, %v2052_v27 }
0x16c7   :  { %v2050_v23 = vpop.permute.xlu1 %2049 }
0x16c8   :  { %v2053_v26 = vmul.f32 %v8257_v25, %v2050_v23  ;;  %v2057_v49 = vmul.f32 %v8278_v48, %v2050_v23 }
0x16ca   :  { %v2055_v29 = vadd.f32 %v8261_v28, %v2053_v26  ;;  %v2059_v50 = vadd.f32 %v8282_v51, %v2057_v49  ;;  %v8540_v26 = vld [vmem:[#allocation2] sm:$0xff] }
0x1792   :  { %v6890_v19 = vpop.f32.mrb[18].mxu0 }
0x1793   :  { %v2126_v21 = vpop.f32.mrb[19].mxu0 }
0x1794   :  { %6899 = vmatprep.mubr.msk.f32.mxu1 %vm304_vm1, %v2126_v21  ;;  %v8531_v21 = vld [vmem:[#allocation2 + $0x8] sm:$0xff] }
0x1795   :  { %6900 = vmatmul.mubr.msk.f32.vlgmr.msra.gmra.mrb[24].mxu1 %vm304_vm1, %v6890_v19 }
0x1796   :  { %6917 = vmatprep.mubr.msk.f32.mxu1 %vm129_vm0, %v8197_v2 }
0x1868   :  { %v6901_v30 = vpop.f32.mrb[24].mxu1 }
0x1869   :  { %v2213_v32 = vadd.f32 %v6901_v30, %v2055_v29  ;;  %v2207_v33 = vpop.f32.mrb[25].mxu1 }
0x186a   :  { %v2208_v34 = vadd.f32 %v2207_v33, %v2054_v31 }
0x186b   :  { %v6258_v35 = vmul.f32 -1.442695, %v2213_v32 }
0x186c   :  { %v6257_v36 = vmul.f32 -1.442695, %v2208_v34 }
0x186d   :  { %7795 = vpow2.f32 %v6258_v35 }
0x186e   :  { %7797 = vpow2.f32 %v6257_v36 }
0x1877   :  { %v7796_v37 = vpop.eup %7795 }
0x1878   :  { %v7798_v38 = vpop.eup %7797  ;;  %v2223_v39 = vadd.f32 1.0, %v7796_v37 }
0x1879   :  { %v2222_v40 = vadd.f32 1.0, %v7798_v38 }
0x187a   :  { %7799 = vrcp.f32 %v2223_v39 }
0x187b   :  { %7801 = vrcp.f32 %v2222_v40 }
0x1884   :  { %v7800_v41 = vpop.eup %7799 }
0x1885   :  { %v7802_v42 = vpop.eup %7801  ;;  %v2229_v44 = vmul.f32 %v7800_v41, %v8480_v18 }
0x1886   :  { %v2228_v43 = vmul.f32 %v7802_v42, %v8478_v17 }
0x1888   :  { %6910 = vmatprep.mubr.msk.f32.mxu0 %vm304_vm1, %v2228_v43 }
0x1889   :  { %6911 = vmatmul.mubr.msk.f32.vlgmr.msra.gmra.mrb[20].mxu0 %vm304_vm1, %v2229_v44 }
0x188a   :  { %6924 = vmatprep.mubr.msk.f32.mxu0 %vm129_vm0, %v8197_v2  ;;  %v2056_v2 = vmul.f32 %v8278_v48, %v2046_v24 }
0x188c   :  { %v2058_v53 = vadd.f32 %v8282_v51, %v2056_v2 }
0x195c   :  { %v6912_v45 = vpop.f32.mrb[20].mxu0 }
0x195d   :  { %v2302_v46 = vpop.f32.mrb[21].mxu0 }
0x195e   :  { %v7434_v47 = vpack.c.bf16 %v6912_v45, %v2302_v46 }
0x1960   :  { %7435 = vmatprep.subr.bf16.mxu1 %v7434_v47 }
0x1961   :  { %7437 = vmatpush3.bf16.msra.mxu1 %v7434_v47 }
0x1962   :  { %7443 = vmatprep.subr.bf16.mxu1 %v8209_v8 }
0x1964   :  { %6918 = vmatmul.mubr.msk.f32.vlgmr.msra.gmra.mrb[26].mxu1 %vm129_vm0, %v8207_v6  ;;  %v8072_v6 = vmov 6  }
0x1965   :  { %7445 = vmatpush3.bf16.msra.mxu1 %v8209_v8  ;;  %7716 = vset.pattern.permute.xlu0 %v8072_v6 }
0x1966   :  { %7447 = vmatprep.subr.bf16.mxu1 %v8226_v12  ;;  %7715 = vset.pattern.permute.xlu1 %v8072_v6 }
0x1969   :  { %7449 = vmatpush3.bf16.msra.mxu1 %v8226_v12 }
0x1a37   :  { %v6919_v52 = vpop.f32.mrb[26].mxu1 }
0x1a38   :  { %v2383_v54 = vadd.f32 %v6919_v52, %v2059_v50  ;;  %v2377_v59 = vpop.f32.mrb[27].mxu1 }
0x1a39   :  { %v2378_v61 = vadd.f32 %v2377_v59, %v2058_v53 }
0x1a3a   :  { %7803 = vtanh.f32 %v2383_v54 }
0x1a3b   :  { %7805 = vtanh.f32 %v2378_v61 }
0x1a44   :  { %v7804_v62 = vpop.eup %7803 }
0x1a45   :  { %v7806_v63 = vpop.eup %7805  ;;  %v2389_v0 = vsub.f32 %v8480_v18, %v7804_v62 }
0x1a46   :  { %v2388_v1 = vsub.f32 %v8478_v17, %v7806_v63 }
0x1a47   :  { %2394 = vrot.lane.b32.xlu0 %v2389_v0, %s8066_s14 }
0x1a48   :  { %2392 = vrot.lane.b32.xlu1 %v2388_v1, %s8066_s14 }
0x1ab9   :  { %v2395_v3 = vpop.permute.xlu0 %2394 }
0x1aba   :  { %v2399_v5 = vmul.f32 %v7800_v41, %v2395_v3  ;;  %v2393_v7 = vpop.permute.xlu1 %2392 }
0x1abb   :  { %v2398_v4 = vmul.f32 %v7802_v42, %v2393_v7 }
0x1abc   :  { %2404 = vrot.lane.b32.xlu0 %v2399_v5, %s8067_s19 }
0x1abd   :  { %2402 = vrot.lane.b32.xlu1 %v2398_v4, %s8067_s19 }
0x1ac0   :  { %2415 = vperm.xlu0 %7716, %v8230_v13  }
0x1ac1   :  { %2411 = vperm.xlu1 %7715, %v8232_v14  }
0x1b2e   :  { %v2405_v10 = vpop.permute.xlu0 %2404 }
0x1b2f   :  { %v8524_v18 = vadd.f32 %v7804_v62, %v2405_v10  ;;  %v2403_v17 = vpop.permute.xlu1 %2402 }
0x1b30   :  { %v8526_v9 = vadd.f32 %v7806_v63, %v2403_v17  ;;  %v8073_v63 = vmov 7  }
0x1b31   :  { %7717 = vset.pattern.permute.xlu0 %v8073_v63  ;;  %7718 = vset.pattern.permute.xlu1 %v8073_v63 }
0x1b32   :  { %v7438_v19 = vpack.c.bf16 %v8524_v18, %v8526_v9 }
0x1b34   :  { %7439 = vmatprep.subr.bf16.mxu0 %v7438_v19 }
0x1b35   :  { %7441 = vmatpush3.bf16.msra.mxu0 %v7438_v19 }
0x1b36   :  { %7451 = vmatprep.subr.bf16.mxu0 %v8246_v20 }
0x1b38   :  { %6925 = vmatmul.mubr.msk.f32.vlgmr.msra.gmra.mrb[22].mxu0 %vm129_vm0, %v8531_v21 }
0x1b39   :  { %7453 = vmatpush3.bf16.msra.mxu0 %v8246_v20 }
0x1b3a   :  { %7455 = vmatprep.subr.bf16.mxu0 %v8248_v22 }
0x1b3d   :  { %7457 = vmatpush3.bf16.msra.mxu0 %v8248_v22 }
0x1b3f   :  { %v2416_v27 = vpop.permute.xlu0 %2415 }
0x1b40   :  { %v2412_v29 = vpop.permute.xlu1 %2411  ;;  %v2419_v30 = vmul.f32 %v8257_v25, %v2416_v27  ;;  %v2423_v2 = vmul.f32 %v8278_v48, %v2416_v27 }
0x1b41   :  { %v2418_v31 = vmul.f32 %v8257_v25, %v2412_v29  ;;  %v2422_v50 = vmul.f32 %v8278_v48, %v2412_v29 }
0x1b42   :  { %v2421_v32 = vadd.f32 %v8261_v28, %v2419_v30  ;;  %v2425_v52 = vadd.f32 %v8282_v51, %v2423_v2  ;;  %v8605_v30 = vld [vmem:[%s9072_s4] ss:$0 sm:$0xff] }
0x1b43   :  { %v2420_v34 = vadd.f32 %v8261_v28, %v2418_v31  ;;  %v2424_v54 = vadd.f32 %v8282_v51, %v2422_v50 }
0x1c0b   :  { %v6926_v23 = vpop.f32.mrb[22].mxu0 }
0x1c0c   :  { %v2492_v24 = vpop.f32.mrb[23].mxu0 }
0x1c0d   :  { %6935 = vmatprep.mubr.msk.f32.mxu1 %vm304_vm1, %v2492_v24 }
0x1c0e   :  { %6936 = vmatmul.mubr.msk.f32.vlgmr.msra.gmra.mrb[28].mxu1 %vm304_vm1, %v6926_v23  ;;  %v128_v23 = vld [vmem:[%s9068_s0 + $0x18] sm:$0xff] }
0x1c0f   :  { %6953 = vmatprep.mubr.msk.f32.mxu1 %vm129_vm0, %v8540_v26 }
0x1ce1   :  { %v6937_v33 = vpop.f32.mrb[28].mxu1 }
0x1ce2   :  { %v2579_v35 = vadd.f32 %v6937_v33, %v2421_v32  ;;  %v2573_v36 = vpop.f32.mrb[29].mxu1  ;;  %v8611_v33 = vld [vmem:[#allocation7] ss:$0 sm:$0xff] }
0x1ce3   :  { %v2574_v37 = vadd.f32 %v2573_v36, %v2420_v34 }
0x1ce4   :  { %v6268_v38 = vmul.f32 -1.442695, %v2579_v35 }
0x1ce5   :  { %v6267_v39 = vmul.f32 -1.442695, %v2574_v37 }
0x1ce6   :  { %7807 = vpow2.f32 %v6268_v38 }
0x1ce7   :  { %7809 = vpow2.f32 %v6267_v39 }
0x1cf0   :  { %v7808_v40 = vpop.eup %7807 }
0x1cf1   :  { %v7810_v41 = vpop.eup %7809  ;;  %v2589_v42 = vadd.f32 1.0, %v7808_v40 }
0x1cf2   :  { %v2588_v43 = vadd.f32 1.0, %v7810_v41 }
0x1cf3   :  { %7811 = vrcp.f32 %v2589_v42 }
0x1cf4   :  { %7813 = vrcp.f32 %v2588_v43 }
0x1cfd   :  { %v7812_v44 = vpop.eup %7811 }
0x1cfe   :  { %v7814_v25 = vpop.eup %7813  ;;  %v2595_v46 = vmul.f32 %v7812_v44, %v8524_v18 }
0x1cff   :  { %v2594_v45 = vmul.f32 %v7814_v25, %v8526_v9 }
0x1d01   :  { %6946 = vmatprep.mubr.msk.f32.mxu0 %vm304_vm1, %v2594_v45 }
0x1d02   :  { %6947 = vmatmul.mubr.msk.f32.vlgmr.msra.gmra.mrb[24].mxu0 %vm304_vm1, %v2595_v46 }
0x1d03   :  { %6960 = vmatprep.mubr.msk.f32.mxu0 %vm129_vm0, %v8540_v26 }
0x1dd5   :  { %v6948_v28 = vpop.f32.mrb[24].mxu0 }
0x1dd6   :  { %v2668_v47 = vpop.f32.mrb[25].mxu0 }
0x1dd7   :  { %v7458_v49 = vpack.c.bf16 %v6948_v28, %v2668_v47 }
0x1dd9   :  { %7459 = vmatprep.subr.bf16.mxu1 %v7458_v49 }
0x1dda   :  { %7461 = vmatpush3.bf16.msra.mxu1 %v7458_v49 }
0x1ddb   :  { %7467 = vmatprep.subr.bf16.mxu1 %v8209_v8 }
0x1ddd   :  { %6954 = vmatmul.mubr.msk.f32.vlgmr.msra.gmra.mrb[30].mxu1 %vm129_vm0, %v8531_v21 }
0x1dde   :  { %7469 = vmatpush3.bf16.msra.mxu1 %v8209_v8 }
0x1ddf   :  { %7471 = vmatprep.subr.bf16.mxu1 %v8226_v12 }
0x1de2   :  { %7473 = vmatpush3.bf16.msra.mxu1 %v8226_v12 }
0x1eb0   :  { %v6955_v53 = vpop.f32.mrb[30].mxu1 }
0x1eb1   :  { %v2743_v59 = vpop.f32.mrb[31].mxu1  ;;  %v2749_v61 = vadd.f32 %v6955_v53, %v2425_v52 }
0x1eb2   :  { %v2744_v62 = vadd.f32 %v2743_v59, %v2424_v54 }
0x1eb4   :  { %7815 = vtanh.f32 %v2744_v62 }
0x1eb5   :  { %7817 = vtanh.f32 %v2749_v61 }
0x1ebe   :  { %v7816_v0 = vpop.eup %7815 }
0x1ebf   :  { %v2754_v1 = vsub.f32 %v8526_v9, %v7816_v0  ;;  %v7818_v3 = vpop.eup %7817 }
0x1ec0   :  { %v2755_v48 = vsub.f32 %v8524_v18, %v7818_v3 }
0x1ec1   :  { %2758 = vrot.lane.b32.xlu1 %v2754_v1, %s8066_s14 }
0x1ec5   :  { %2760 = vrot.lane.b32.xlu1 %v2755_v48, %s8066_s14 }
0x1f33   :  { %v2759_v51 = vpop.permute.xlu1 %2758 }
0x1f34   :  { %v2764_v5 = vmul.f32 %v7814_v25, %v2759_v51 }
0x1f36   :  { %2768 = vrot.lane.b32.xlu0 %v2764_v5, %s8067_s19 }
0x1f37   :  { %v2761_v7 = vpop.permute.xlu1 %2760 }
0x1f38   :  { %v2765_v4 = vmul.f32 %v7812_v44, %v2761_v7 }
0x1f3a   :  { %2777 = vperm.xlu0 %7717, %v8232_v14   ;;  %2770 = vrot.lane.b32.xlu1 %v2765_v4, %s8067_s19  ;;  %v127_v14 = vld [vmem:[%s9068_s0 + $0x10] sm:$0xff] }
0x1f3b   :  { %v7486_v24 = vpack.c.bf16 %v128_v23, %v127_v14 }
0x1f3e   :  { %2781 = vperm.xlu1 %7718, %v8230_v13   ;;  %7720 = vset.pattern.permute.xlu0 %v8064_v11 }
0x1f42   :  { %7719 = vset.pattern.permute.xlu1 %v8064_v11 }
0x1fa8   :  { %v2769_v10 = vpop.permute.xlu0 %2768 }
0x1fa9   :  { %v8576_v17 = vadd.f32 %v7816_v0, %v2769_v10 }
0x1fac   :  { %v2771_v18 = vpop.permute.xlu1 %2770 }
0x1fad   :  { %v8578_v9 = vadd.f32 %v7818_v3, %v2771_v18 }
0x1faf   :  { %v7462_v19 = vpack.c.bf16 %v8578_v9, %v8576_v17 }
0x1fb1   :  { %7463 = vmatprep.subr.bf16.mxu0 %v7462_v19 }
0x1fb2   :  { %7465 = vmatpush3.bf16.msra.mxu0 %v7462_v19 }
0x1fb3   :  { %7475 = vmatprep.subr.bf16.mxu0 %v8246_v20 }
0x1fb5   :  { %6961 = vmatmul.mubr.msk.f32.vlgmr.msra.gmra.mrb[26].mxu0 %vm129_vm0, %v8531_v21 }
0x1fb6   :  { %7477 = vmatpush3.bf16.msra.mxu0 %v8246_v20 }
0x1fb7   :  { %7479 = vmatprep.subr.bf16.mxu0 %v8248_v22 }
0x1fb9   :  { %v8600_v29 = vpop.permute.xlu0 %2777 }
0x1fba   :  { %7481 = vmatpush3.bf16.msra.mxu0 %v8248_v22  ;;  %v2784_v32 = vmul.f32 %v8605_v30, %v8600_v29 }
0x1fbb   :  { %7487 = vmatprep.subr.bf16.mxu0 %v7486_v24 }
0x1fbc   :  { %v2786_v36 = vadd.f32 %v8611_v33, %v2784_v32 }
0x1fbd   :  { %v8598_v27 = vpop.permute.xlu1 %2781 }
0x1fbe   :  { %v2785_v31 = vmul.f32 %v8605_v30, %v8598_v27 }
0x1fc0   :  { %v2787_v34 = vadd.f32 %v8611_v33, %v2785_v31 }
0x2088   :  { %v6962_v11 = vpop.f32.mrb[26].mxu0 }
0x2089   :  { %v2858_v13 = vpop.f32.mrb[27].mxu0 }
0x208a   :  { %6971 = vmatprep.mubr.msk.f32.mxu1 %vm304_vm1, %v2858_v13 }
0x208b   :  { %6972 = vmatmul.mubr.msk.f32.vlgmr.msra.gmra.mrb[32].mxu1 %vm304_vm1, %v6962_v11 }
0x208c   :  { %6989 = vmatprep.mubr.msk.f32.mxu1 %vm129_vm0, %v8540_v26 }
0x215e   :  { %v6973_v35 = vpop.f32.mrb[32].mxu1 }
0x215f   :  { %v2945_v37 = vadd.f32 %v6973_v35, %v2787_v34  ;;  %v2939_v38 = vpop.f32.mrb[33].mxu1  ;;  %v8674_v34 = vld [vmem:[%s9073_s5] ss:$0 sm:$0xff] }
0x2160   :  { %v2940_v39 = vadd.f32 %v2939_v38, %v2786_v36 }
0x2161   :  { %v6278_v40 = vmul.f32 -1.442695, %v2945_v37  ;;  %v8678_v37 = vld [vmem:[#allocation8] ss:$0 sm:$0xff] }
0x2162   :  { %v6277_v41 = vmul.f32 -1.442695, %v2940_v39 }
0x2163   :  { %7819 = vpow2.f32 %v6278_v40 }
0x2164   :  { %7821 = vpow2.f32 %v6277_v41 }
0x216d   :  { %v7820_v42 = vpop.eup %7819 }
0x216e   :  { %v7822_v43 = vpop.eup %7821  ;;  %v2955_v44 = vadd.f32 1.0, %v7820_v42 }
0x216f   :  { %v2954_v25 = vadd.f32 1.0, %v7822_v43 }
0x2170   :  { %7823 = vrcp.f32 %v2955_v44 }
0x2171   :  { %7825 = vrcp.f32 %v2954_v25 }
0x217a   :  { %v8615_v45 = vpop.eup %7823 }
0x217b   :  { %v8617_v46 = vpop.eup %7825  ;;  %v2961_v47 = vmul.f32 %v8615_v45, %v8578_v9 }
0x217c   :  { %v2960_v28 = vmul.f32 %v8617_v46, %v8576_v17 }
0x217e   :  { %6982 = vmatprep.mubr.msk.f32.mxu0 %vm304_vm1, %v2960_v28 }
0x217f   :  { %6983 = vmatmul.mubr.msk.f32.vlgmr.msra.gmra.mrb[28].mxu0 %vm304_vm1, %v2961_v47 }
0x2180   :  { %7489 = vmatpush3.bf16.msra.mxu0 %v7486_v24  ;;  %6996 = vmatprep.mubr.msk.f32.mxu0 %vm129_vm0, %v8540_v26 }
0x2181   :  { %7499 = vmatprep.subr.bf16.mxu0 %v8246_v20 }
0x2183   :  { %6997 = vmatmul.mubr.msk.f32.vlgmr.msra.gmra.mrb[30].mxu0 %vm129_vm0, %v8531_v21 }
0x2184   :  { %7501 = vmatpush3.bf16.msra.mxu0 %v8246_v20 }
0x2185   :  { %7503 = vmatprep.subr.bf16.mxu0 %v8248_v22 }
0x2188   :  { %7505 = vmatpush3.bf16.msra.mxu0 %v8248_v22 }
0x2252   :  { %v6984_v49 = vpop.f32.mrb[28].mxu0 }
0x2253   :  { %v3034_v2 = vpop.f32.mrb[29].mxu0 }
0x2254   :  { %v7482_v50 = vpack.c.bf16 %v6984_v49, %v3034_v2 }
0x2256   :  { %7483 = vmatprep.subr.bf16.mxu1 %v7482_v50  ;;  %v8633_v52 = vpop.f32.mrb[30].mxu0 }
0x2257   :  { %7485 = vmatpush3.bf16.msra.mxu1 %v7482_v50  ;;  %v8635_v53 = vpop.f32.mrb[31].mxu0  ;;  %3224 = vperm.xlu0 %7720, %v8633_v52  }
0x2258   :  { %7491 = vmatprep.subr.bf16.mxu1 %v8209_v8  ;;  %3219 = vperm.xlu1 %7719, %v8635_v53  }
0x225a   :  { %6990 = vmatmul.mubr.msk.f32.vlgmr.msra.gmra.mrb[34].mxu1 %vm129_vm0, %v8531_v21 }
0x225b   :  { %7493 = vmatpush3.bf16.msra.mxu1 %v8209_v8  ;;  %7007 = vmatprep.mubr.msk.f32.mxu1 %vm304_vm1, %v8237_v16 }
0x225c   :  { %7495 = vmatprep.subr.bf16.mxu1 %v8226_v12  ;;  %7721 = vset.pattern.permute.xlu0 %v8065_v58 }
0x225d   :  { %7722 = vset.pattern.permute.xlu1 %v8065_v58 }
0x225f   :  { %7497 = vmatpush3.bf16.msra.mxu1 %v8226_v12 }
0x2262   :  { %7008 = vmatmul.mubr.msk.f32.vlgmr.msra.gmra.mrb[36].mxu1 %vm304_vm1, %v8235_v15 }
0x2263   :  { %7025 = vmatprep.mubr.msk.f32.mxu1 %vm129_vm0, %v8540_v26 }
0x22d6   :  { %v3225_v54 = vpop.permute.xlu0 %3224 }
0x22d7   :  { %v3220_v59 = vpop.permute.xlu1 %3219  ;;  %v3228_v16 = vmul.f32 %v8605_v30, %v3225_v54  ;;  %v3232_v35 = vmul.f32 %v8674_v34, %v3225_v54 }
0x22d8   :  { %v3227_v0 = vmul.f32 %v8605_v30, %v3220_v59  ;;  %v3231_v36 = vmul.f32 %v8674_v34, %v3220_v59 }
0x22d9   :  { %v3230_v58 = vadd.f32 %v8611_v33, %v3228_v16  ;;  %v3234_v38 = vadd.f32 %v8678_v37, %v3232_v35 }
0x22da   :  { %v3229_v1 = vadd.f32 %v8611_v33, %v3227_v0  ;;  %v3233_v40 = vadd.f32 %v8678_v37, %v3231_v36 }
0x232d   :  { %v8653_v61 = vpop.f32.mrb[34].mxu1 }
0x232e   :  { %v8655_v62 = vpop.f32.mrb[35].mxu1 }
0x2335   :  { %v7009_v3 = vpop.f32.mrb[36].mxu1 }
0x2336   :  { %v3307_v48 = vadd.f32 %v7009_v3, %v3230_v58  ;;  %v3301_v15 = vpop.f32.mrb[37].mxu1 }
0x2337   :  { %v3302_v51 = vadd.f32 %v3301_v15, %v3229_v1 }
0x2338   :  { %v6288_v5 = vmul.f32 -1.442695, %v3307_v48 }
0x2339   :  { %v6287_v7 = vmul.f32 -1.442695, %v3302_v51 }
0x233a   :  { %7827 = vpow2.f32 %v6288_v5 }
0x233b   :  { %7829 = vpow2.f32 %v6287_v7 }
0x2344   :  { %v7828_v4 = vpop.eup %7827 }
0x2345   :  { %v7830_v10 = vpop.eup %7829  ;;  %v3317_v18 = vadd.f32 1.0, %v7828_v4 }
0x2346   :  { %v3316_v19 = vadd.f32 1.0, %v7830_v10 }
0x2347   :  { %7831 = vrcp.f32 %v3317_v18 }
0x2348   :  { %7833 = vrcp.f32 %v3316_v19 }
0x2351   :  { %v7832_v11 = vpop.eup %7831 }
0x2352   :  { %v7834_v13 = vpop.eup %7833  ;;  %v3323_v23 = vmul.f32 0.0, %v7832_v11 }
0x2353   :  { %v3322_v14 = vmul.f32 0.0, %v7834_v13 }
0x2355   :  { %7018 = vmatprep.mubr.msk.f32.mxu0 %vm304_vm1, %v3322_v14 }
0x2356   :  { %7019 = vmatmul.mubr.msk.f32.vlgmr.msra.gmra.mrb[32].mxu0 %vm304_vm1, %v3323_v23 }
0x2357   :  { %7032 = vmatprep.mubr.msk.f32.mxu0 %vm129_vm0, %v8540_v26 }
0x2429   :  { %v7020_v24 = vpop.f32.mrb[32].mxu0 }
0x242a   :  { %v3396_v31 = vpop.f32.mrb[33].mxu0 }
0x242b   :  { %v7506_v32 = vpack.c.bf16 %v7020_v24, %v3396_v31 }
0x242d   :  { %7507 = vmatprep.subr.bf16.mxu1 %v7506_v32 }
0x242e   :  { %7509 = vmatpush3.bf16.msra.mxu1 %v7506_v32 }
0x242f   :  { %7515 = vmatprep.subr.bf16.mxu1 %v8209_v8 }
0x2431   :  { %7026 = vmatmul.mubr.msk.f32.vlgmr.msra.gmra.mrb[38].mxu1 %vm129_vm0, %v8531_v21 }
0x2432   :  { %7517 = vmatpush3.bf16.msra.mxu1 %v8209_v8 }
0x2433   :  { %7519 = vmatprep.subr.bf16.mxu1 %v8226_v12 }
0x2436   :  { %7521 = vmatpush3.bf16.msra.mxu1 %v8226_v12 }
0x2504   :  { %v7027_v39 = vpop.f32.mrb[38].mxu1 }
0x2505   :  { %v3471_v41 = vpop.f32.mrb[39].mxu1  ;;  %v3477_v42 = vadd.f32 %v7027_v39, %v3234_v38 }
0x2506   :  { %v3472_v43 = vadd.f32 %v3471_v41, %v3233_v40 }
0x2508   :  { %7835 = vtanh.f32 %v3472_v43 }
0x2509   :  { %7837 = vtanh.f32 %v3477_v42 }
0x2512   :  { %v7836_v44 = vpop.eup %7835 }
0x2513   :  { %v3482_v25 = vsub.f32 0.0, %v7836_v44  ;;  %v7838_v28 = vpop.eup %7837 }
0x2514   :  { %v3483_v47 = vsub.f32 0.0, %v7838_v28 }
0x2515   :  { %3486 = vrot.lane.b32.xlu1 %v3482_v25, %s8066_s14 }
0x2519   :  { %3488 = vrot.lane.b32.xlu1 %v3483_v47, %s8066_s14 }
0x2587   :  { %v3487_v49 = vpop.permute.xlu1 %3486 }
0x2588   :  { %v3492_v2 = vmul.f32 %v7834_v13, %v3487_v49 }
0x258a   :  { %3496 = vrot.lane.b32.xlu0 %v3492_v2, %s8067_s19 }
0x258b   :  { %v3489_v50 = vpop.permute.xlu1 %3488 }
0x258c   :  { %v3493_v54 = vmul.f32 %v7832_v11, %v3489_v50 }
0x258e   :  { %3505 = vperm.xlu0 %7721, %v8635_v53   ;;  %3498 = vrot.lane.b32.xlu1 %v3493_v54, %s8067_s19 }
0x2592   :  { %3509 = vperm.xlu1 %7722, %v8633_v52   ;;  %7724 = vset.pattern.permute.xlu0 %v8068_v56 }
0x2596   :  { %7723 = vset.pattern.permute.xlu1 %v8068_v56 }
0x25fc   :  { %v3497_v59 = vpop.permute.xlu0 %3496 }
0x25fd   :  { %v8690_v0 = vadd.f32 %v7836_v44, %v3497_v59 }
0x2600   :  { %v3499_v16 = vpop.permute.xlu1 %3498 }
0x2601   :  { %v8692_v58 = vadd.f32 %v7838_v28, %v3499_v16 }
0x2603   :  { %v7510_v1 = vpack.c.bf16 %v8692_v58, %v8690_v0 }
0x2605   :  { %7511 = vmatprep.subr.bf16.mxu0 %v7510_v1 }
0x2606   :  { %7513 = vmatpush3.bf16.msra.mxu0 %v7510_v1 }
0x2607   :  { %7523 = vmatprep.subr.bf16.mxu0 %v8246_v20 }
0x2609   :  { %7033 = vmatmul.mubr.msk.f32.vlgmr.msra.gmra.mrb[34].mxu0 %vm129_vm0, %v8531_v21 }
0x260a   :  { %7525 = vmatpush3.bf16.msra.mxu0 %v8246_v20 }
0x260b   :  { %7527 = vmatprep.subr.bf16.mxu0 %v8248_v22 }
0x260d   :  { %v3506_v15 = vpop.permute.xlu0 %3505 }
0x260e   :  { %7529 = vmatpush3.bf16.msra.mxu0 %v8248_v22  ;;  %v3512_v5 = vmul.f32 %v8605_v30, %v3506_v15  ;;  %v3516_v44 = vmul.f32 %v8674_v34, %v3506_v15 }
0x2610   :  { %v3514_v10 = vadd.f32 %v8611_v33, %v3512_v5  ;;  %v3518_v47 = vadd.f32 %v8678_v37, %v3516_v44 }
0x2611   :  { %v3510_v48 = vpop.permute.xlu1 %3509 }
0x2612   :  { %v3513_v51 = vmul.f32 %v8605_v30, %v3510_v48  ;;  %v3517_v43 = vmul.f32 %v8674_v34, %v3510_v48 }
0x2614   :  { %v3515_v7 = vadd.f32 %v8611_v33, %v3513_v51  ;;  %v3519_v25 = vadd.f32 %v8678_v37, %v3517_v43 }
0x26dc   :  { %v7034_v56 = vpop.f32.mrb[34].mxu0 }
0x26dd   :  { %v3586_v3 = vpop.f32.mrb[35].mxu0 }
0x26de   :  { %7043 = vmatprep.mubr.msk.f32.mxu1 %vm304_vm1, %v3586_v3 }
0x26df   :  { %7044 = vmatmul.mubr.msk.f32.vlgmr.msra.gmra.mrb[40].mxu1 %vm304_vm1, %v7034_v56 }
0x26e0   :  { %7061 = vmatprep.mubr.msk.f32.mxu1 %vm129_vm0, %v8540_v26 }
0x27b2   :  { %v7045_v4 = vpop.f32.mrb[40].mxu1 }
0x27b3   :  { %v3673_v18 = vadd.f32 %v7045_v4, %v3515_v7  ;;  %v3667_v19 = vpop.f32.mrb[41].mxu1 }
0x27b4   :  { %v3668_v11 = vadd.f32 %v3667_v19, %v3514_v10 }
0x27b5   :  { %v6298_v13 = vmul.f32 -1.442695, %v3673_v18 }
0x27b6   :  { %v6297_v14 = vmul.f32 -1.442695, %v3668_v11 }
0x27b7   :  { %7839 = vpow2.f32 %v6298_v13 }
0x27b8   :  { %7841 = vpow2.f32 %v6297_v14 }
0x27c1   :  { %v7840_v23 = vpop.eup %7839 }
0x27c2   :  { %v7842_v24 = vpop.eup %7841  ;;  %v3683_v31 = vadd.f32 1.0, %v7840_v23 }
0x27c3   :  { %v3682_v32 = vadd.f32 1.0, %v7842_v24 }
0x27c4   :  { %7843 = vrcp.f32 %v3683_v31 }
0x27c5   :  { %7845 = vrcp.f32 %v3682_v32 }
0x27ce   :  { %v7844_v35 = vpop.eup %7843 }
0x27cf   :  { %v7846_v36 = vpop.eup %7845  ;;  %v3689_v39 = vmul.f32 %v7844_v35, %v8692_v58 }
0x27d0   :  { %v3688_v38 = vmul.f32 %v7846_v36, %v8690_v0 }
0x27d2   :  { %7054 = vmatprep.mubr.msk.f32.mxu0 %vm304_vm1, %v3688_v38 }
0x27d3   :  { %7055 = vmatmul.mubr.msk.f32.vlgmr.msra.gmra.mrb[36].mxu0 %vm304_vm1, %v3689_v39 }
0x27d4   :  { %7068 = vmatprep.mubr.msk.f32.mxu0 %vm129_vm0, %v8540_v26 }
0x28a6   :  { %v7056_v40 = vpop.f32.mrb[36].mxu0 }
0x28a7   :  { %v3762_v41 = vpop.f32.mrb[37].mxu0 }
0x28a8   :  { %v7530_v42 = vpack.c.bf16 %v7056_v40, %v3762_v41 }
0x28aa   :  { %7531 = vmatprep.subr.bf16.mxu1 %v7530_v42 }
0x28ab   :  { %7533 = vmatpush3.bf16.msra.mxu1 %v7530_v42 }
0x28ac   :  { %7539 = vmatprep.subr.bf16.mxu1 %v8209_v8 }
0x28ae   :  { %7062 = vmatmul.mubr.msk.f32.vlgmr.msra.gmra.mrb[42].mxu1 %vm129_vm0, %v8531_v21 }
0x28af   :  { %7541 = vmatpush3.bf16.msra.mxu1 %v8209_v8 }
0x28b0   :  { %7543 = vmatprep.subr.bf16.mxu1 %v8226_v12 }
0x28b3   :  { %7545 = vmatpush3.bf16.msra.mxu1 %v8226_v12 }
0x2981   :  { %v7063_v28 = vpop.f32.mrb[42].mxu1 }
0x2982   :  { %v3843_v49 = vadd.f32 %v7063_v28, %v3519_v25  ;;  %v3837_v2 = vpop.f32.mrb[43].mxu1 }
0x2983   :  { %v3838_v50 = vadd.f32 %v3837_v2, %v3518_v47 }
0x2984   :  { %7847 = vtanh.f32 %v3843_v49 }
0x2985   :  { %7849 = vtanh.f32 %v3838_v50 }
0x298e   :  { %v7848_v54 = vpop.eup %7847 }
0x298f   :  { %v7850_v59 = vpop.eup %7849  ;;  %v3849_v16 = vsub.f32 %v8692_v58, %v7848_v54 }
0x2990   :  { %v3848_v1 = vsub.f32 %v8690_v0, %v7850_v59 }
0x2991   :  { %3854 = vrot.lane.b32.xlu0 %v3849_v16, %s8066_s14 }
0x2992   :  { %3852 = vrot.lane.b32.xlu1 %v3848_v1, %s8066_s14 }
0x2a03   :  { %v3855_v56 = vpop.permute.xlu0 %3854 }
0x2a04   :  { %v3859_v3 = vmul.f32 %v7844_v35, %v3855_v56  ;;  %v3853_v48 = vpop.permute.xlu1 %3852 }
0x2a05   :  { %v3858_v15 = vmul.f32 %v7846_v36, %v3853_v48 }
0x2a06   :  { %3864 = vrot.lane.b32.xlu0 %v3859_v3, %s8067_s19 }
0x2a07   :  { %3862 = vrot.lane.b32.xlu1 %v3858_v15, %s8067_s19 }
0x2a0a   :  { %3875 = vperm.xlu0 %7724, %v8633_v52  }
0x2a0b   :  { %3871 = vperm.xlu1 %7723, %v8635_v53  }
0x2a0e   :  { %7725 = vset.pattern.permute.xlu0 %v8069_v55 }
0x2a0f   :  { %7726 = vset.pattern.permute.xlu1 %v8069_v55 }
0x2a78   :  { %v3865_v0 = vpop.permute.xlu0 %3864 }
0x2a79   :  { %v8736_v58 = vadd.f32 %v7848_v54, %v3865_v0  ;;  %v3863_v51 = vpop.permute.xlu1 %3862 }
0x2a7a   :  { %v8738_v5 = vadd.f32 %v7850_v59, %v3863_v51 }
0x2a7c   :  { %v7534_v7 = vpack.c.bf16 %v8736_v58, %v8738_v5 }
0x2a7e   :  { %7535 = vmatprep.subr.bf16.mxu0 %v7534_v7 }
0x2a7f   :  { %7537 = vmatpush3.bf16.msra.mxu0 %v7534_v7 }
0x2a80   :  { %7547 = vmatprep.subr.bf16.mxu0 %v8246_v20 }
0x2a82   :  { %7069 = vmatmul.mubr.msk.f32.vlgmr.msra.gmra.mrb[38].mxu0 %vm129_vm0, %v8531_v21 }
0x2a83   :  { %7549 = vmatpush3.bf16.msra.mxu0 %v8246_v20 }
0x2a84   :  { %7551 = vmatprep.subr.bf16.mxu0 %v8248_v22 }
0x2a87   :  { %7553 = vmatpush3.bf16.msra.mxu0 %v8248_v22 }
0x2a89   :  { %v3876_v10 = vpop.permute.xlu0 %3875 }
0x2a8a   :  { %v3872_v18 = vpop.permute.xlu1 %3871  ;;  %v3879_v19 = vmul.f32 %v8605_v30, %v3876_v10  ;;  %v3883_v2 = vmul.f32 %v8674_v34, %v3876_v10 }
0x2a8b   :  { %v3878_v11 = vmul.f32 %v8605_v30, %v3872_v18  ;;  %v3882_v50 = vmul.f32 %v8674_v34, %v3872_v18 }
0x2a8c   :  { %v3881_v13 = vadd.f32 %v8611_v33, %v3879_v19  ;;  %v3885_v54 = vadd.f32 %v8678_v37, %v3883_v2 }
0x2a8d   :  { %v3880_v23 = vadd.f32 %v8611_v33, %v3878_v11  ;;  %v3884_v16 = vadd.f32 %v8678_v37, %v3882_v50 }
0x2b55   :  { %v7070_v55 = vpop.f32.mrb[38].mxu0 }
0x2b56   :  { %v3952_v4 = vpop.f32.mrb[39].mxu0 }
0x2b57   :  { %7079 = vmatprep.mubr.msk.f32.mxu1 %vm304_vm1, %v3952_v4 }
0x2b58   :  { %7080 = vmatmul.mubr.msk.f32.vlgmr.msra.gmra.mrb[44].mxu1 %vm304_vm1, %v7070_v55 }
0x2b59   :  { %7097 = vmatprep.mubr.msk.f32.mxu1 %vm129_vm0, %v8540_v26 }
0x2c2b   :  { %v7081_v14 = vpop.f32.mrb[44].mxu1 }
0x2c2c   :  { %v4039_v24 = vadd.f32 %v7081_v14, %v3881_v13  ;;  %v4033_v31 = vpop.f32.mrb[45].mxu1 }
0x2c2d   :  { %v4034_v32 = vadd.f32 %v4033_v31, %v3880_v23 }
0x2c2e   :  { %v6308_v35 = vmul.f32 -1.442695, %v4039_v24 }
0x2c2f   :  { %v6307_v36 = vmul.f32 -1.442695, %v4034_v32 }
0x2c30   :  { %7851 = vpow2.f32 %v6308_v35 }
0x2c31   :  { %7853 = vpow2.f32 %v6307_v36 }
0x2c3a   :  { %v7852_v38 = vpop.eup %7851 }
0x2c3b   :  { %v7854_v39 = vpop.eup %7853  ;;  %v4049_v40 = vadd.f32 1.0, %v7852_v38 }
0x2c3c   :  { %v4048_v41 = vadd.f32 1.0, %v7854_v39 }
0x2c3d   :  { %7855 = vrcp.f32 %v4049_v40 }
0x2c3e   :  { %7857 = vrcp.f32 %v4048_v41 }
0x2c47   :  { %v7856_v42 = vpop.eup %7855 }
0x2c48   :  { %v7858_v43 = vpop.eup %7857  ;;  %v4055_v25 = vmul.f32 %v7856_v42, %v8736_v58 }
0x2c49   :  { %v4054_v44 = vmul.f32 %v7858_v43, %v8738_v5 }
0x2c4b   :  { %7090 = vmatprep.mubr.msk.f32.mxu0 %vm304_vm1, %v4054_v44 }
0x2c4c   :  { %7091 = vmatmul.mubr.msk.f32.vlgmr.msra.gmra.mrb[40].mxu0 %vm304_vm1, %v4055_v25 }
0x2c4d   :  { %7104 = vmatprep.mubr.msk.f32.mxu0 %vm129_vm0, %v8540_v26 }
0x2d1f   :  { %v7092_v28 = vpop.f32.mrb[40].mxu0 }
0x2d20   :  { %v4128_v47 = vpop.f32.mrb[41].mxu0 }
0x2d21   :  { %v7554_v49 = vpack.c.bf16 %v7092_v28, %v4128_v47 }
0x2d23   :  { %7555 = vmatprep.subr.bf16.mxu1 %v7554_v49 }
0x2d24   :  { %7557 = vmatpush3.bf16.msra.mxu1 %v7554_v49 }
0x2d25   :  { %7563 = vmatprep.subr.bf16.mxu1 %v8209_v8 }
0x2d27   :  { %7098 = vmatmul.mubr.msk.f32.vlgmr.msra.gmra.mrb[46].mxu1 %vm129_vm0, %v8531_v21 }
0x2d28   :  { %7565 = vmatpush3.bf16.msra.mxu1 %v8209_v8 }
0x2d29   :  { %7567 = vmatprep.subr.bf16.mxu1 %v8226_v12 }
0x2d2c   :  { %7569 = vmatpush3.bf16.msra.mxu1 %v8226_v12 }
0x2dfa   :  { %v7099_v59 = vpop.f32.mrb[46].mxu1 }
0x2dfb   :  { %v4203_v1 = vpop.f32.mrb[47].mxu1  ;;  %v4209_v56 = vadd.f32 %v7099_v59, %v3885_v54 }
0x2dfc   :  { %v4204_v3 = vadd.f32 %v4203_v1, %v3884_v16 }
0x2dfe   :  { %7859 = vtanh.f32 %v4204_v3 }
0x2dff   :  { %7861 = vtanh.f32 %v4209_v56 }
0x2e08   :  { %v7860_v48 = vpop.eup %7859 }
0x2e09   :  { %v4214_v15 = vsub.f32 %v8738_v5, %v7860_v48  ;;  %v7862_v0 = vpop.eup %7861 }
0x2e0a   :  { %v4215_v51 = vsub.f32 %v8736_v58, %v7862_v0 }
0x2e0b   :  { %4218 = vrot.lane.b32.xlu1 %v4214_v15, %s8066_s14 }
0x2e0f   :  { %4220 = vrot.lane.b32.xlu1 %v4215_v51, %s8066_s14 }
0x2e7d   :  { %v4219_v7 = vpop.permute.xlu1 %4218 }
0x2e7e   :  { %v4224_v55 = vmul.f32 %v7858_v43, %v4219_v7 }
0x2e80   :  { %4228 = vrot.lane.b32.xlu0 %v4224_v55, %s8067_s19 }
0x2e81   :  { %v4221_v4 = vpop.permute.xlu1 %4220 }
0x2e82   :  { %v4225_v10 = vmul.f32 %v7856_v42, %v4221_v4 }
0x2e84   :  { %4237 = vperm.xlu0 %7725, %v8635_v53   ;;  %4230 = vrot.lane.b32.xlu1 %v4225_v10, %s8067_s19 }
0x2e88   :  { %4241 = vperm.xlu1 %7726, %v8633_v52   ;;  %7728 = vset.pattern.permute.xlu0 %v8070_v57 }
0x2e8c   :  { %7727 = vset.pattern.permute.xlu1 %v8070_v57 }
0x2ef2   :  { %v4229_v5 = vpop.permute.xlu0 %4228 }
0x2ef3   :  { %v8782_v18 = vadd.f32 %v7860_v48, %v4229_v5 }
0x2ef6   :  { %v4231_v58 = vpop.permute.xlu1 %4230 }
0x2ef7   :  { %v8784_v19 = vadd.f32 %v7862_v0, %v4231_v58 }
0x2ef9   :  { %v7558_v11 = vpack.c.bf16 %v8784_v19, %v8782_v18 }
0x2efb   :  { %7559 = vmatprep.subr.bf16.mxu0 %v7558_v11 }
0x2efc   :  { %7561 = vmatpush3.bf16.msra.mxu0 %v7558_v11 }
0x2efd   :  { %7571 = vmatprep.subr.bf16.mxu0 %v8246_v20 }
0x2eff   :  { %7105 = vmatmul.mubr.msk.f32.vlgmr.msra.gmra.mrb[42].mxu0 %vm129_vm0, %v8531_v21 }
0x2f00   :  { %7573 = vmatpush3.bf16.msra.mxu0 %v8246_v20 }
0x2f01   :  { %7575 = vmatprep.subr.bf16.mxu0 %v8248_v22 }
0x2f03   :  { %v4238_v23 = vpop.permute.xlu0 %4237 }
0x2f04   :  { %7577 = vmatpush3.bf16.msra.mxu0 %v8248_v22  ;;  %v4244_v31 = vmul.f32 %v8605_v30, %v4238_v23  ;;  %v4248_v56 = vmul.f32 %v8674_v34, %v4238_v23 }
0x2f06   :  { %v4246_v36 = vadd.f32 %v8611_v33, %v4244_v31  ;;  %v4250_v15 = vadd.f32 %v8678_v37, %v4248_v56 }
0x2f07   :  { %v4242_v14 = vpop.permute.xlu1 %4241 }
0x2f08   :  { %v4245_v24 = vmul.f32 %v8605_v30, %v4242_v14  ;;  %v4249_v1 = vmul.f32 %v8674_v34, %v4242_v14 }
0x2f0a   :  { %v4247_v32 = vadd.f32 %v8611_v33, %v4245_v24  ;;  %v4251_v3 = vadd.f32 %v8678_v37, %v4249_v1 }
0x2fd2   :  { %v7106_v57 = vpop.f32.mrb[42].mxu0 }
0x2fd3   :  { %v4318_v13 = vpop.f32.mrb[43].mxu0 }
0x2fd4   :  { %7115 = vmatprep.mubr.msk.f32.mxu1 %vm304_vm1, %v4318_v13 }
0x2fd5   :  { %7116 = vmatmul.mubr.msk.f32.vlgmr.msra.gmra.mrb[48].mxu1 %vm304_vm1, %v7106_v57 }
0x2fd6   :  { %7133 = vmatprep.mubr.msk.f32.mxu1 %vm129_vm0, %v8540_v26 }
0x30a8   :  { %v7117_v35 = vpop.f32.mrb[48].mxu1 }
0x30a9   :  { %v4405_v38 = vadd.f32 %v7117_v35, %v4247_v32  ;;  %v4399_v39 = vpop.f32.mrb[49].mxu1 }
0x30aa   :  { %v4400_v40 = vadd.f32 %v4399_v39, %v4246_v36 }
0x30ab   :  { %v6318_v41 = vmul.f32 -1.442695, %v4405_v38 }
0x30ac   :  { %v6317_v42 = vmul.f32 -1.442695, %v4400_v40 }
0x30ad   :  { %7863 = vpow2.f32 %v6318_v41 }
0x30ae   :  { %7865 = vpow2.f32 %v6317_v42 }
0x30b7   :  { %v7864_v43 = vpop.eup %7863 }
0x30b8   :  { %v7866_v44 = vpop.eup %7865  ;;  %v4415_v25 = vadd.f32 1.0, %v7864_v43 }
0x30b9   :  { %v4414_v28 = vadd.f32 1.0, %v7866_v44 }
0x30ba   :  { %7867 = vrcp.f32 %v4415_v25 }
0x30bb   :  { %7869 = vrcp.f32 %v4414_v28 }
0x30c4   :  { %v7868_v47 = vpop.eup %7867 }
0x30c5   :  { %v7870_v49 = vpop.eup %7869  ;;  %v4421_v50 = vmul.f32 %v7868_v47, %v8784_v19 }
0x30c6   :  { %v4420_v2 = vmul.f32 %v7870_v49, %v8782_v18 }
0x30c8   :  { %7126 = vmatprep.mubr.msk.f32.mxu0 %vm304_vm1, %v4420_v2 }
0x30c9   :  { %7127 = vmatmul.mubr.msk.f32.vlgmr.msra.gmra.mrb[44].mxu0 %vm304_vm1, %v4421_v50 }
0x30ca   :  { %7140 = vmatprep.mubr.msk.f32.mxu0 %vm129_vm0, %v8540_v26 }
0x319c   :  { %v7128_v54 = vpop.f32.mrb[44].mxu0 }
0x319d   :  { %v4494_v59 = vpop.f32.mrb[45].mxu0 }
0x319e   :  { %v7578_v16 = vpack.c.bf16 %v7128_v54, %v4494_v59 }
0x31a0   :  { %7579 = vmatprep.subr.bf16.mxu1 %v7578_v16 }
0x31a1   :  { %7581 = vmatpush3.bf16.msra.mxu1 %v7578_v16 }
0x31a2   :  { %7587 = vmatprep.subr.bf16.mxu1 %v8209_v8 }
0x31a4   :  { %7134 = vmatmul.mubr.msk.f32.vlgmr.msra.gmra.mrb[50].mxu1 %vm129_vm0, %v8531_v21 }
0x31a5   :  { %7589 = vmatpush3.bf16.msra.mxu1 %v8209_v8 }
0x31a6   :  { %7591 = vmatprep.subr.bf16.mxu1 %v8226_v12 }
0x31a9   :  { %7593 = vmatpush3.bf16.msra.mxu1 %v8226_v12 }
0x3277   :  { %v7135_v48 = vpop.f32.mrb[50].mxu1 }
0x3278   :  { %v4575_v0 = vadd.f32 %v7135_v48, %v4251_v3  ;;  %v4569_v51 = vpop.f32.mrb[51].mxu1 }
0x3279   :  { %v4570_v7 = vadd.f32 %v4569_v51, %v4250_v15 }
0x327a   :  { %7871 = vtanh.f32 %v4575_v0 }
0x327b   :  { %7873 = vtanh.f32 %v4570_v7 }
0x3284   :  { %v7872_v55 = vpop.eup %7871 }
0x3285   :  { %v7874_v4 = vpop.eup %7873  ;;  %v4581_v10 = vsub.f32 %v8784_v19, %v7872_v55 }
0x3286   :  { %v4580_v5 = vsub.f32 %v8782_v18, %v7874_v4 }
0x3287   :  { %4586 = vrot.lane.b32.xlu0 %v4581_v10, %s8066_s14 }
0x3288   :  { %4584 = vrot.lane.b32.xlu1 %v4580_v5, %s8066_s14 }
0x32f9   :  { %v4587_v58 = vpop.permute.xlu0 %4586 }
0x32fa   :  { %v4591_v11 = vmul.f32 %v7868_v47, %v4587_v58  ;;  %v4585_v57 = vpop.permute.xlu1 %4584 }
0x32fb   :  { %v4590_v13 = vmul.f32 %v7870_v49, %v4585_v57 }
0x32fc   :  { %4596 = vrot.lane.b32.xlu0 %v4591_v11, %s8067_s19 }
0x32fd   :  { %4594 = vrot.lane.b32.xlu1 %v4590_v13, %s8067_s19 }
0x3300   :  { %4607 = vperm.xlu0 %7728, %v8633_v52  }
0x3301   :  { %4603 = vperm.xlu1 %7727, %v8635_v53  }
0x3304   :  { %7729 = vset.pattern.permute.xlu0 %v8071_v60 }
0x3305   :  { %7730 = vset.pattern.permute.xlu1 %v8071_v60 }
0x336e   :  { %v4597_v18 = vpop.permute.xlu0 %4596 }
0x336f   :  { %v8828_v19 = vadd.f32 %v7872_v55, %v4597_v18  ;;  %v4595_v14 = vpop.permute.xlu1 %4594 }
0x3370   :  { %v8830_v23 = vadd.f32 %v7874_v4, %v4595_v14 }
0x3372   :  { %v7582_v24 = vpack.c.bf16 %v8828_v19, %v8830_v23 }
0x3374   :  { %7583 = vmatprep.subr.bf16.mxu0 %v7582_v24 }
0x3375   :  { %7585 = vmatpush3.bf16.msra.mxu0 %v7582_v24 }
0x3376   :  { %7595 = vmatprep.subr.bf16.mxu0 %v8246_v20 }
0x3378   :  { %7141 = vmatmul.mubr.msk.f32.vlgmr.msra.gmra.mrb[46].mxu0 %vm129_vm0, %v8531_v21 }
0x3379   :  { %7597 = vmatpush3.bf16.msra.mxu0 %v8246_v20 }
0x337a   :  { %7599 = vmatprep.subr.bf16.mxu0 %v8248_v22 }
0x337d   :  { %7601 = vmatpush3.bf16.msra.mxu0 %v8248_v22 }
0x337f   :  { %v4608_v32 = vpop.permute.xlu0 %4607 }
0x3380   :  { %v4604_v35 = vpop.permute.xlu1 %4603  ;;  %v4611_v36 = vmul.f32 %v8605_v30, %v4608_v32  ;;  %v4615_v15 = vmul.f32 %v8674_v34, %v4608_v32  ;;  %v8881_v32 = vld [vmem:[#allocation2 + $0x8] sm:$0xff] }
0x3381   :  { %v4610_v38 = vmul.f32 %v8605_v30, %v4604_v35 }
0x3382   :  { %v4613_v39 = vadd.f32 %v8611_v33, %v4611_v36  ;;  %v4617_v0 = vadd.f32 %v8678_v37, %v4615_v15  ;;  %v8890_v36 = vld [vmem:[#allocation2] sm:$0xff] }
0x3383   :  { %v4612_v41 = vadd.f32 %v8611_v33, %v4610_v38 }
0x344b   :  { %v7142_v60 = vpop.f32.mrb[46].mxu0 }
0x344c   :  { %v4684_v31 = vpop.f32.mrb[47].mxu0 }
0x344d   :  { %7151 = vmatprep.mubr.msk.f32.mxu1 %vm304_vm1, %v4684_v31 }
0x344e   :  { %7152 = vmatmul.mubr.msk.f32.vlgmr.msra.gmra.mrb[52].mxu1 %vm304_vm1, %v7142_v60 }
0x344f   :  { %7169 = vmatprep.mubr.msk.f32.mxu1 %vm129_vm0, %v8540_v26 }
0x3521   :  { %v7153_v40 = vpop.f32.mrb[52].mxu1 }
0x3522   :  { %v4771_v42 = vadd.f32 %v7153_v40, %v4613_v39  ;;  %v4765_v43 = vpop.f32.mrb[53].mxu1 }
0x3523   :  { %v4766_v44 = vadd.f32 %v4765_v43, %v4612_v41 }
0x3524   :  { %v6328_v25 = vmul.f32 -1.442695, %v4771_v42 }
0x3525   :  { %v6327_v28 = vmul.f32 -1.442695, %v4766_v44 }
0x3526   :  { %7875 = vpow2.f32 %v6328_v25 }
0x3527   :  { %7877 = vpow2.f32 %v6327_v28 }
0x3530   :  { %v7876_v47 = vpop.eup %7875 }
0x3531   :  { %v7878_v49 = vpop.eup %7877  ;;  %v4781_v2 = vadd.f32 1.0, %v7876_v47 }
0x3532   :  { %v4780_v50 = vadd.f32 1.0, %v7878_v49 }
0x3533   :  { %7879 = vrcp.f32 %v4781_v2 }
0x3534   :  { %7881 = vrcp.f32 %v4780_v50 }
0x353d   :  { %v7880_v54 = vpop.eup %7879 }
0x353e   :  { %v7882_v59 = vpop.eup %7881  ;;  %v4787_v1 = vmul.f32 %v7880_v54, %v8828_v19 }
0x353f   :  { %v4786_v16 = vmul.f32 %v7882_v59, %v8830_v23 }
0x3541   :  { %7162 = vmatprep.mubr.msk.f32.mxu0 %vm304_vm1, %v4786_v16 }
0x3542   :  { %7163 = vmatmul.mubr.msk.f32.vlgmr.msra.gmra.mrb[48].mxu0 %vm304_vm1, %v4787_v1 }
0x3543   :  { %7176 = vmatprep.mubr.msk.f32.mxu0 %vm129_vm0, %v8540_v26  ;;  %v4614_v26 = vmul.f32 %v8674_v34, %v4604_v35 }
0x3545   :  { %v4616_v7 = vadd.f32 %v8678_v37, %v4614_v26 }
0x3615   :  { %v7164_v56 = vpop.f32.mrb[48].mxu0 }
0x3616   :  { %v4860_v3 = vpop.f32.mrb[49].mxu0 }
0x3617   :  { %v7602_v48 = vpack.c.bf16 %v7164_v56, %v4860_v3 }
0x3619   :  { %7603 = vmatprep.subr.bf16.mxu1 %v7602_v48 }
0x361a   :  { %7605 = vmatpush3.bf16.msra.mxu1 %v7602_v48 }
0x361b   :  { %7611 = vmatprep.subr.bf16.mxu1 %v8209_v8 }
0x361d   :  { %7170 = vmatmul.mubr.msk.f32.vlgmr.msra.gmra.mrb[54].mxu1 %vm129_vm0, %v8531_v21 }
0x361e   :  { %7613 = vmatpush3.bf16.msra.mxu1 %v8209_v8 }
0x361f   :  { %7615 = vmatprep.subr.bf16.mxu1 %v8226_v12 }
0x3622   :  { %7617 = vmatpush3.bf16.msra.mxu1 %v8226_v12 }
0x36f0   :  { %v7171_v51 = vpop.f32.mrb[54].mxu1 }
0x36f1   :  { %v4935_v55 = vpop.f32.mrb[55].mxu1  ;;  %v4941_v4 = vadd.f32 %v7171_v51, %v4617_v0 }
0x36f2   :  { %v4936_v10 = vadd.f32 %v4935_v55, %v4616_v7 }
0x36f4   :  { %7883 = vtanh.f32 %v4936_v10 }
0x36f5   :  { %7885 = vtanh.f32 %v4941_v4 }
0x36fe   :  { %v7884_v21 = vpop.eup %7883 }
0x36ff   :  { %v4946_v5 = vsub.f32 %v8830_v23, %v7884_v21  ;;  %v7886_v58 = vpop.eup %7885 }
0x3700   :  { %v4947_v11 = vsub.f32 %v8828_v19, %v7886_v58 }
0x3701   :  { %4950 = vrot.lane.b32.xlu1 %v4946_v5, %s8066_s14 }
0x3705   :  { %4952 = vrot.lane.b32.xlu1 %v4947_v11, %s8066_s14 }
0x3773   :  { %v4951_v57 = vpop.permute.xlu1 %4950 }
0x3774   :  { %v4956_v13 = vmul.f32 %v7882_v59, %v4951_v57 }
0x3776   :  { %4960 = vrot.lane.b32.xlu0 %v4956_v13, %s8067_s19 }
0x3777   :  { %v4953_v18 = vpop.permute.xlu1 %4952 }
0x3778   :  { %v4957_v14 = vmul.f32 %v7880_v54, %v4953_v18 }
0x377a   :  { %4969 = vperm.xlu0 %7729, %v8635_v53   ;;  %4962 = vrot.lane.b32.xlu1 %v4957_v14, %s8067_s19 }
0x377e   :  { %4973 = vperm.xlu1 %7730, %v8633_v52   ;;  %7732 = vset.pattern.permute.xlu0 %v8072_v6 }
0x3782   :  { %7731 = vset.pattern.permute.xlu1 %v8072_v6 }
0x37e8   :  { %v4961_v23 = vpop.permute.xlu0 %4960 }
0x37e9   :  { %v8874_v24 = vadd.f32 %v7884_v21, %v4961_v23 }
0x37ec   :  { %v4963_v19 = vpop.permute.xlu1 %4962 }
0x37ed   :  { %v8876_v60 = vadd.f32 %v7886_v58, %v4963_v19 }
0x37ef   :  { %v7606_v31 = vpack.c.bf16 %v8876_v60, %v8874_v24 }
0x37f1   :  { %7607 = vmatprep.subr.bf16.mxu0 %v7606_v31 }
0x37f2   :  { %7609 = vmatpush3.bf16.msra.mxu0 %v7606_v31 }
0x37f3   :  { %7619 = vmatprep.subr.bf16.mxu0 %v8246_v20 }
0x37f5   :  { %7177 = vmatmul.mubr.msk.f32.vlgmr.msra.gmra.mrb[50].mxu0 %vm129_vm0, %v8881_v32 }
0x37f6   :  { %7621 = vmatpush3.bf16.msra.mxu0 %v8246_v20 }
0x37f7   :  { %7623 = vmatprep.subr.bf16.mxu0 %v8248_v22 }
0x37f9   :  { %v4970_v39 = vpop.permute.xlu0 %4969 }
0x37fa   :  { %7625 = vmatpush3.bf16.msra.mxu0 %v8248_v22  ;;  %v4976_v41 = vmul.f32 %v8605_v30, %v4970_v39  ;;  %v4980_v0 = vmul.f32 %v8674_v34, %v4970_v39 }
0x37fc   :  { %v4978_v44 = vadd.f32 %v8611_v33, %v4976_v41  ;;  %v4982_v55 = vadd.f32 %v8678_v37, %v4980_v0 }
0x37fd   :  { %v4974_v38 = vpop.permute.xlu1 %4973 }
0x37fe   :  { %v4977_v40 = vmul.f32 %v8605_v30, %v4974_v38  ;;  %v4981_v26 = vmul.f32 %v8674_v34, %v4974_v38 }
0x3800   :  { %v4979_v42 = vadd.f32 %v8611_v33, %v4977_v40  ;;  %v4983_v51 = vadd.f32 %v8678_v37, %v4981_v26  ;;  %v8943_v40 = vld [vmem:[%s9072_s4] ss:$0 sm:$0xff] }
0x38c8   :  { %v7178_v6 = vpop.f32.mrb[50].mxu0 }
0x38c9   :  { %v5050_v35 = vpop.f32.mrb[51].mxu0 }
0x38ca   :  { %7187 = vmatprep.mubr.msk.f32.mxu1 %vm304_vm1, %v5050_v35 }
0x38cb   :  { %7188 = vmatmul.mubr.msk.f32.vlgmr.msra.gmra.mrb[56].mxu1 %vm304_vm1, %v7178_v6 }
0x38cc   :  { %7205 = vmatprep.mubr.msk.f32.mxu1 %vm129_vm0, %v8890_v36 }
0x399e   :  { %v7189_v43 = vpop.f32.mrb[56].mxu1 }
0x399f   :  { %v5137_v25 = vadd.f32 %v7189_v43, %v4979_v42  ;;  %v5131_v28 = vpop.f32.mrb[57].mxu1  ;;  %v8947_v43 = vld [vmem:[#allocation7] ss:$0 sm:$0xff] }
0x39a0   :  { %v5132_v47 = vadd.f32 %v5131_v28, %v4978_v44 }
0x39a1   :  { %v6338_v49 = vmul.f32 -1.442695, %v5137_v25 }
0x39a2   :  { %v6337_v2 = vmul.f32 -1.442695, %v5132_v47 }
0x39a3   :  { %7887 = vpow2.f32 %v6338_v49 }
0x39a4   :  { %7889 = vpow2.f32 %v6337_v2 }
0x39ad   :  { %v7888_v50 = vpop.eup %7887 }
0x39ae   :  { %v7890_v54 = vpop.eup %7889  ;;  %v5147_v59 = vadd.f32 1.0, %v7888_v50 }
0x39af   :  { %v5146_v16 = vadd.f32 1.0, %v7890_v54 }
0x39b0   :  { %7891 = vrcp.f32 %v5147_v59 }
0x39b1   :  { %7893 = vrcp.f32 %v5146_v16 }
0x39ba   :  { %v7892_v1 = vpop.eup %7891 }
0x39bb   :  { %v7894_v30 = vpop.eup %7893  ;;  %v5153_v3 = vmul.f32 %v7892_v1, %v8876_v60 }
0x39bc   :  { %v5152_v56 = vmul.f32 %v7894_v30, %v8874_v24 }
0x39be   :  { %7198 = vmatprep.mubr.msk.f32.mxu0 %vm304_vm1, %v5152_v56 }
0x39bf   :  { %7199 = vmatmul.mubr.msk.f32.vlgmr.msra.gmra.mrb[52].mxu0 %vm304_vm1, %v5153_v3 }
0x39c0   :  { %7212 = vmatprep.mubr.msk.f32.mxu0 %vm129_vm0, %v8890_v36 }
0x3a92   :  { %v7200_v33 = vpop.f32.mrb[52].mxu0 }
0x3a93   :  { %v5226_v48 = vpop.f32.mrb[53].mxu0 }
0x3a94   :  { %v7626_v15 = vpack.c.bf16 %v7200_v33, %v5226_v48 }
0x3a96   :  { %7627 = vmatprep.subr.bf16.mxu1 %v7626_v15 }
0x3a97   :  { %7629 = vmatpush3.bf16.msra.mxu1 %v7626_v15 }
0x3a98   :  { %7635 = vmatprep.subr.bf16.mxu1 %v8209_v8 }
0x3a9a   :  { %7206 = vmatmul.mubr.msk.f32.vlgmr.msra.gmra.mrb[58].mxu1 %vm129_vm0, %v8881_v32 }
0x3a9b   :  { %7637 = vmatpush3.bf16.msra.mxu1 %v8209_v8 }
0x3a9c   :  { %7639 = vmatprep.subr.bf16.mxu1 %v8226_v12 }
0x3a9f   :  { %7641 = vmatpush3.bf16.msra.mxu1 %v8226_v12 }
0x3b6d   :  { %v7207_v7 = vpop.f32.mrb[58].mxu1 }
0x3b6e   :  { %v5307_v4 = vadd.f32 %v7207_v7, %v4983_v51  ;;  %v5301_v10 = vpop.f32.mrb[59].mxu1 }
0x3b6f   :  { %v5302_v21 = vadd.f32 %v5301_v10, %v4982_v55 }
0x3b70   :  { %7895 = vtanh.f32 %v5307_v4 }
0x3b71   :  { %7897 = vtanh.f32 %v5302_v21 }
0x3b7a   :  { %v7896_v5 = vpop.eup %7895 }
0x3b7b   :  { %v7898_v58 = vpop.eup %7897  ;;  %v5313_v11 = vsub.f32 %v8876_v60, %v7896_v5 }
0x3b7c   :  { %v5312_v57 = vsub.f32 %v8874_v24, %v7898_v58 }
0x3b7d   :  { %5318 = vrot.lane.b32.xlu0 %v5313_v11, %s8066_s14 }
0x3b7e   :  { %5316 = vrot.lane.b32.xlu1 %v5312_v57, %s8066_s14 }
0x3bef   :  { %v5319_v13 = vpop.permute.xlu0 %5318 }
0x3bf0   :  { %v5323_v18 = vmul.f32 %v7892_v1, %v5319_v13  ;;  %v5317_v14 = vpop.permute.xlu1 %5316  ;;  %v2789_v13 = vmul.f32 %v8674_v34, %v8598_v27 }
0x3bf1   :  { %v5322_v23 = vmul.f32 %v7894_v30, %v5317_v14 }
0x3bf2   :  { %5328 = vrot.lane.b32.xlu0 %v5323_v18, %s8067_s19  ;;  %v2788_v18 = vmul.f32 %v8674_v34, %v8600_v29  ;;  %v2791_v14 = vadd.f32 %v8678_v37, %v2789_v13 }
0x3bf3   :  { %5326 = vrot.lane.b32.xlu1 %v5322_v23, %s8067_s19 }
0x3bf4   :  { %v3115_v23 = vadd.f32 %v8653_v61, %v2791_v14 }
0x3bf6   :  { %5339 = vperm.xlu0 %7732, %v8633_v52  }
0x3bf7   :  { %5335 = vperm.xlu1 %7731, %v8635_v53  }
0x3bfa   :  { %7733 = vset.pattern.permute.xlu0 %v8073_v63 }
0x3bfb   :  { %7734 = vset.pattern.permute.xlu1 %v8073_v63 }
0x3c64   :  { %v5329_v19 = vpop.permute.xlu0 %5328 }
0x3c65   :  { %v8924_v24 = vadd.f32 %v7896_v5, %v5329_v19  ;;  %v5327_v60 = vpop.permute.xlu1 %5326  ;;  %v2790_v19 = vadd.f32 %v8678_v37, %v2788_v18 }
0x3c66   :  { %v8926_v31 = vadd.f32 %v7898_v58, %v5327_v60 }
0x3c67   :  { %v3110_v60 = vadd.f32 %v8655_v62, %v2790_v19 }
0x3c68   :  { %v7630_v6 = vpack.c.bf16 %v8924_v24, %v8926_v31 }
0x3c6a   :  { %7631 = vmatprep.subr.bf16.mxu0 %v7630_v6 }
0x3c6b   :  { %7633 = vmatpush3.bf16.msra.mxu0 %v7630_v6 }
0x3c6c   :  { %7643 = vmatprep.subr.bf16.mxu0 %v8246_v20 }
0x3c6e   :  { %7213 = vmatmul.mubr.msk.f32.vlgmr.msra.gmra.mrb[54].mxu0 %vm129_vm0, %v8881_v32 }
0x3c6f   :  { %7645 = vmatpush3.bf16.msra.mxu0 %v8246_v20 }
0x3c70   :  { %7647 = vmatprep.subr.bf16.mxu0 %v8248_v22 }
0x3c73   :  { %7649 = vmatpush3.bf16.msra.mxu0 %v8248_v22 }
0x3c75   :  { %v5340_v38 = vpop.permute.xlu0 %5339 }
0x3c76   :  { %v5336_v39 = vpop.permute.xlu1 %5335  ;;  %v5343_v41 = vmul.f32 %v8943_v40, %v5340_v38  ;;  %v5347_v51 = vmul.f32 %v8674_v34, %v5340_v38 }
0x3c77   :  { %v5342_v42 = vmul.f32 %v8943_v40, %v5336_v39  ;;  %v5346_v7 = vmul.f32 %v8674_v34, %v5336_v39 }
0x3c78   :  { %v5345_v44 = vadd.f32 %v8947_v43, %v5343_v41  ;;  %v5349_v55 = vadd.f32 %v8678_v37, %v5347_v51 }
0x3c79   :  { %v5344_v28 = vadd.f32 %v8947_v43, %v5342_v42  ;;  %v5348_v10 = vadd.f32 %v8678_v37, %v5346_v7 }
0x3d41   :  { %v7214_v63 = vpop.f32.mrb[54].mxu0 }
0x3d42   :  { %v5416_v35 = vpop.f32.mrb[55].mxu0 }
0x3d43   :  { %7223 = vmatprep.mubr.msk.f32.mxu1 %vm304_vm1, %v5416_v35 }
0x3d44   :  { %7224 = vmatmul.mubr.msk.f32.vlgmr.msra.gmra.mrb[60].mxu1 %vm304_vm1, %v7214_v63 }
0x3d45   :  { %7241 = vmatprep.mubr.msk.f32.mxu1 %vm129_vm0, %v8890_v36 }
0x3e17   :  { %v7225_v25 = vpop.f32.mrb[60].mxu1 }
0x3e18   :  { %v5503_v47 = vadd.f32 %v7225_v25, %v5345_v44  ;;  %v5497_v49 = vpop.f32.mrb[61].mxu1 }
0x3e19   :  { %v5498_v2 = vadd.f32 %v5497_v49, %v5344_v28 }
0x3e1a   :  { %v6348_v50 = vmul.f32 -1.442695, %v5503_v47 }
0x3e1b   :  { %v6347_v54 = vmul.f32 -1.442695, %v5498_v2 }
0x3e1c   :  { %7899 = vpow2.f32 %v6348_v50 }
0x3e1d   :  { %7901 = vpow2.f32 %v6347_v54 }
0x3e26   :  { %v7900_v59 = vpop.eup %7899 }
0x3e27   :  { %v7902_v16 = vpop.eup %7901  ;;  %v5513_v1 = vadd.f32 1.0, %v7900_v59 }
0x3e28   :  { %v5512_v30 = vadd.f32 1.0, %v7902_v16 }
0x3e29   :  { %7903 = vrcp.f32 %v5513_v1 }
0x3e2a   :  { %7905 = vrcp.f32 %v5512_v30 }
0x3e33   :  { %v7904_v56 = vpop.eup %7903 }
0x3e34   :  { %v7906_v3 = vpop.eup %7905  ;;  %v5519_v48 = vmul.f32 %v7904_v56, %v8924_v24 }
0x3e35   :  { %v5518_v33 = vmul.f32 %v7906_v3, %v8926_v31 }
0x3e37   :  { %7234 = vmatprep.mubr.msk.f32.mxu0 %vm304_vm1, %v5518_v33  ;;  %v7937_v33 = vld [vmem:[%s9073_s5] ss:$0 sm:$0xff] }
0x3e38   :  { %7235 = vmatmul.mubr.msk.f32.vlgmr.msra.gmra.mrb[56].mxu0 %vm304_vm1, %v5519_v48 }
0x3e39   :  { %7248 = vmatprep.mubr.msk.f32.mxu0 %vm129_vm0, %v8890_v36 }
0x3f0b   :  { %v7236_v15 = vpop.f32.mrb[56].mxu0 }
0x3f0c   :  { %v5592_v26 = vpop.f32.mrb[57].mxu0 }
0x3f0d   :  { %v7650_v0 = vpack.c.bf16 %v7236_v15, %v5592_v26  ;;  %v7938_v26 = vld [vmem:[#allocation8] ss:$0 sm:$0xff] }
0x3f0f   :  { %7651 = vmatprep.subr.bf16.mxu1 %v7650_v0 }
0x3f10   :  { %7653 = vmatpush3.bf16.msra.mxu1 %v7650_v0 }
0x3f11   :  { %7659 = vmatprep.subr.bf16.mxu1 %v8209_v8 }
0x3f13   :  { %7242 = vmatmul.mubr.msk.f32.vlgmr.msra.gmra.mrb[62].mxu1 %vm129_vm0, %v8881_v32 }
0x3f14   :  { %7661 = vmatpush3.bf16.msra.mxu1 %v8209_v8 }
0x3f15   :  { %7663 = vmatprep.subr.bf16.mxu1 %v8226_v12 }
0x3f18   :  { %7665 = vmatpush3.bf16.msra.mxu1 %v8226_v12 }
0x3fe6   :  { %v7243_v4 = vpop.f32.mrb[62].mxu1 }
0x3fe7   :  { %v5667_v21 = vpop.f32.mrb[63].mxu1  ;;  %v5673_v5 = vadd.f32 %v7243_v4, %v5349_v55  ;;  %v6066_v55 = vld [vmem:[%s9076_s8] sm:$0xff]  ;;  %v6067_v4 = vld [vmem:[%s9076_s8 + $0x8] sm:$0xff] }
0x3fe8   :  { %v5668_v58 = vadd.f32 %v5667_v21, %v5348_v10  ;;  %v7678_v21 = vpack.c.bf16 %v6067_v4, %v6066_v55 }
0x3fea   :  { %7907 = vtanh.f32 %v5668_v58  ;;  %v6068_v58 = vld [vmem:[%s9076_s8 + $0x10] sm:$0xff] }
0x3feb   :  { %7909 = vtanh.f32 %v5673_v5 }
0x3fec   :  { %7911 = vtanh.f32 %v3115_v23 }
0x3fed   :  { %7913 = vtanh.f32 %v3110_v60 }
0x3ff4   :  { %v7908_v11 = vpop.eup %7907 }
0x3ff5   :  { %v5678_v8 = vsub.f32 %v8926_v31, %v7908_v11  ;;  %v7910_v57 = vpop.eup %7909 }
0x3ff6   :  { %v5679_v12 = vsub.f32 %v8924_v24, %v7910_v57  ;;  %v8980_v27 = vpop.eup %7911 }
0x3ff7   :  { %5682 = vrot.lane.b32.xlu1 %v5678_v8, %s8066_s14  ;;  %v3121_v29 = vsub.f32 %v8578_v9, %v8980_v27  ;;  %v8986_v61 = vpop.eup %7913 }
0x3ff8   :  { %v3120_v62 = vsub.f32 %v8576_v17, %v8986_v61 }
0x3ffb   :  { %5684 = vrot.lane.b32.xlu1 %v5679_v12, %s8066_s14 }
0x4069   :  { %v5683_v31 = vpop.permute.xlu1 %5682 }
0x406a   :  { %v5688_v24 = vmul.f32 %v7906_v3, %v5683_v31 }
0x406c   :  { %5692 = vrot.lane.b32.xlu0 %v5688_v24, %s8067_s19 }
0x406d   :  { %v5685_v6 = vpop.permute.xlu1 %5684 }
0x406e   :  { %v5689_v63 = vmul.f32 %v7904_v56, %v5685_v6 }
0x4070   :  { %5701 = vperm.xlu0 %7733, %v8635_v53   ;;  %5694 = vrot.lane.b32.xlu1 %v5689_v63, %s8067_s19 }
0x4074   :  { %3126 = vrot.lane.b32.xlu0 %v3121_v29, %s8066_s14  ;;  %5705 = vperm.xlu1 %7734, %v8633_v52  }
0x4078   :  { %3124 = vrot.lane.b32.xlu1 %v3120_v62, %s8066_s14 }
0x40de   :  { %v5693_v34 = vpop.permute.xlu0 %5692 }
0x40df   :  { %v8993_v35 = vadd.f32 %v7908_v11, %v5693_v34  ;;  %v6069_v11 = vld [vmem:[%s9076_s8 + $0x18] sm:$0xff] }
0x40e0   :  { %v7682_v8 = vpack.c.bf16 %v6069_v11, %v6068_v58 }
0x40e2   :  { %v5695_v37 = vpop.permute.xlu1 %5694 }
0x40e3   :  { %v8995_v53 = vadd.f32 %v7910_v57, %v5695_v37 }
0x40e5   :  { %v7654_v9 = vpack.c.bf16 %v8995_v53, %v8993_v35 }
0x40e7   :  { %7655 = vmatprep.subr.bf16.mxu0 %v7654_v9 }
0x40e8   :  { %7657 = vmatpush3.bf16.msra.mxu0 %v7654_v9  ;;  %v6363_v9 = vld [vmem:[%s9077_s9] ss:$0 sm:$0xff] }
0x40e9   :  { %7667 = vmatprep.subr.bf16.mxu0 %v8246_v20 }
0x40eb   :  { %7249 = vmatmul.mubr.msk.f32.vlgmr.msra.gmra.mrb[58].mxu0 %vm129_vm0, %v8881_v32 }
0x40ec   :  { %7669 = vmatpush3.bf16.msra.mxu0 %v8246_v20 }
0x40ed   :  { %7671 = vmatprep.subr.bf16.mxu0 %v8248_v22 }
0x40ef   :  { %v5702_v39 = vpop.permute.xlu0 %5701 }
0x40f0   :  { %7673 = vmatpush3.bf16.msra.mxu0 %v8248_v22  ;;  %v5708_v42 = vmul.f32 %v8943_v40, %v5702_v39  ;;  %v5712_v15 = vmul.f32 %v7937_v33, %v5702_v39 }
0x40f1   :  { %7679 = vmatprep.subr.bf16.mxu0 %v7678_v21 }
0x40f2   :  { %v5710_v22 = vadd.f32 %v8947_v43, %v5708_v42  ;;  %v5714_v7 = vadd.f32 %v7938_v26, %v5712_v15 }
0x40f3   :  { %v5706_v38 = vpop.permute.xlu1 %5705  ;;  %v3127_v18 = vpop.permute.xlu0 %3126 }
0x40f4   :  { %v5709_v41 = vmul.f32 %v8943_v40, %v5706_v38  ;;  %v5713_v48 = vmul.f32 %v7937_v33, %v5706_v38  ;;  %v3131_v19 = vmul.f32 %v8615_v45, %v3127_v18 }
0x40f6   :  { %v5711_v20 = vadd.f32 %v8947_v43, %v5709_v41  ;;  %v5715_v0 = vadd.f32 %v7938_v26, %v5713_v48 }
0x40f7   :  { %v3125_v23 = vpop.permute.xlu1 %3124 }
0x40f8   :  { %v3130_v60 = vmul.f32 %v8617_v46, %v3125_v23 }
0x41be   :  { %v7250_v17 = vpop.f32.mrb[58].mxu0 }
0x41bf   :  { %v5782_v52 = vpop.f32.mrb[59].mxu0 }
0x41c0   :  { %7259 = vmatprep.mubr.msk.f32.mxu1 %vm304_vm1, %v5782_v52 }
0x41c1   :  { %7260 = vmatmul.mubr.msk.f32.vlgmr.msra.gmra.mrb[64].mxu1 %vm304_vm1, %v7250_v17 }
0x41c2   :  { %7277 = vmatprep.mubr.msk.f32.mxu1 %vm129_vm0, %v8890_v36 }
0x4294   :  { %v7261_v44 = vpop.f32.mrb[64].mxu1 }
0x4295   :  { %v5869_v25 = vadd.f32 %v7261_v44, %v5711_v20  ;;  %v5863_v28 = vpop.f32.mrb[65].mxu1 }
0x4296   :  { %v5864_v47 = vadd.f32 %v5863_v28, %v5710_v22 }
0x4297   :  { %v6358_v49 = vmul.f32 -1.442695, %v5869_v25 }
0x4298   :  { %v6357_v2 = vmul.f32 -1.442695, %v5864_v47 }
0x4299   :  { %7915 = vpow2.f32 %v6358_v49 }
0x429a   :  { %7917 = vpow2.f32 %v6357_v2 }
0x42a3   :  { %v7916_v50 = vpop.eup %7915 }
0x42a4   :  { %v7918_v36 = vpop.eup %7917  ;;  %v5879_v54 = vadd.f32 1.0, %v7916_v50 }
0x42a5   :  { %v5878_v59 = vadd.f32 1.0, %v7918_v36 }
0x42a6   :  { %7919 = vrcp.f32 %v5879_v54 }
0x42a7   :  { %7921 = vrcp.f32 %v5878_v59 }
0x42b0   :  { %v7920_v16 = vpop.eup %7919 }
0x42b1   :  { %v7922_v40 = vpop.eup %7921  ;;  %v5885_v30 = vmul.f32 %v7920_v16, %v8995_v53 }
0x42b2   :  { %v5884_v1 = vmul.f32 %v7922_v40, %v8993_v35 }
0x42b4   :  { %7270 = vmatprep.mubr.msk.f32.mxu0 %vm304_vm1, %v5884_v1 }
0x42b5   :  { %7271 = vmatmul.mubr.msk.f32.vlgmr.msra.gmra.mrb[60].mxu0 %vm304_vm1, %v5885_v30 }
0x42b6   :  { %7681 = vmatpush3.bf16.msra.mxu0 %v7678_v21 }
0x42b7   :  { %7683 = vmatprep.subr.bf16.mxu0 %v7682_v8 }
0x42ba   :  { %7685 = vmatpush3.bf16.msra.mxu0 %v7682_v8 }
0x4388   :  { %v7272_v43 = vpop.f32.mrb[60].mxu0 }
0x4389   :  { %v5958_v56 = vpop.f32.mrb[61].mxu0 }
0x438a   :  { %v7674_v3 = vpack.c.bf16 %v7272_v43, %v5958_v56 }
0x438c   :  { %7675 = vmatprep.subr.bf16.mxu1 %v7674_v3 }
0x438d   :  { %7677 = vmatpush3.bf16.msra.mxu1 %v7674_v3 }
0x4390   :  { %7278 = vmatmul.mubr.msk.f32.vlgmr.msra.gmra.mrb[66].mxu1 %vm129_vm0, %v8881_v32 }
0x4463   :  { %v7279_v51 = vpop.f32.mrb[66].mxu1 }
0x4464   :  { %v6039_v10 = vadd.f32 %v7279_v51, %v5715_v0  ;;  %v6033_v32 = vpop.f32.mrb[67].mxu1 }
0x4465   :  { %v6034_v5 = vadd.f32 %v6033_v32, %v5714_v7 }
0x4466   :  { %7923 = vtanh.f32 %v6039_v10 }
0x4467   :  { %7925 = vtanh.f32 %v6034_v5 }
0x4470   :  { %v7924_v57 = vpop.eup %7923 }
0x4471   :  { %v7926_v12 = vpop.eup %7925  ;;  %v6045_v13 = vsub.f32 %v8995_v53, %v7924_v57 }
0x4472   :  { %v6044_v14 = vsub.f32 %v8993_v35, %v7926_v12 }
0x4473   :  { %6050 = vrot.lane.b32.xlu0 %v6045_v13, %s8066_s14 }
0x4474   :  { %6048 = vrot.lane.b32.xlu1 %v6044_v14, %s8066_s14 }
0x4477   :  { %3136 = vrot.lane.b32.xlu0 %v3131_v19, %s8067_s19 }
0x4478   :  { %3134 = vrot.lane.b32.xlu1 %v3130_v60, %s8067_s19 }
0x44e5   :  { %v6051_v31 = vpop.permute.xlu0 %6050 }
0x44e6   :  { %v6055_v24 = vmul.f32 %v7920_v16, %v6051_v31  ;;  %v6049_v6 = vpop.permute.xlu1 %6048 }
0x44e7   :  { %v6054_v63 = vmul.f32 %v7922_v40, %v6049_v6 }
0x44e8   :  { %6060 = vrot.lane.b32.xlu0 %v6055_v24, %s8067_s19 }
0x44e9   :  { %v3137_v29 = vpop.permute.xlu0 %3136  ;;  %6058 = vrot.lane.b32.xlu1 %v6054_v63, %s8067_s19 }
0x44ea   :  { %v3135_v62 = vpop.permute.xlu1 %3134  ;;  %v3141_v45 = vadd.f32 %v8980_v27, %v3137_v29 }
0x44eb   :  { %v3140_v34 = vadd.f32 %v8986_v61, %v3135_v62 }
0x44ed   :  { %7288 = vmatprep.mubr.msk.f32.mxu0 %vm304_vm1, %v3140_v34 }
0x44ee   :  { %7289 = vmatmul.mubr.msk.f32.vlgmr.msra.gmra.mrb[62].mxu0 %vm304_vm1, %v3141_v45 }
0x455a   :  { %v6061_v46 = vpop.permute.xlu0 %6060 }
0x455b   :  { %v6059_v37 = vpop.permute.xlu1 %6058  ;;  %v6065_v53 = vadd.f32 %v7924_v57, %v6061_v46 }
0x455c   :  { %v6064_v35 = vadd.f32 %v7926_v12, %v6059_v37 }
0x455e   :  { %7291 = vmatprep.mubr.msk.f32.mxu0 %vm304_vm1, %v6064_v35 }
0x455f   :  { %7292 = vmatmul.mubr.msk.f32.gmra.mrb[64].mxu0 %vm304_vm1, %v6065_v53 }
0x45c1   :  { %v7290_v17 = vpop.f32.mrb[62].mxu0 }
0x45c2   :  { %v6161_v61 = vadd.f32 %v7290_v17, %v6363_v9  ;;  %v6155_v52 = vpop.f32.mrb[63].mxu0 }
0x45c3   :  { %v6156_v27 = vadd.f32 %v6363_v9, %v6155_v52 }
0x45c4   :  { %6175 = vst [vmem:[#allocation10 + $0x8] sm:$0xff] %v6161_v61 }
0x45c5   :  { %6174 = vst [vmem:[#allocation10] sm:$0xff] %v6156_v27 }
0x4632   :  { %v7293_v38 = vpop.f32.mrb[64].mxu0 }
0x4633   :  { %v6171_v39 = vadd.f32 %v7293_v38, %v6363_v9  ;;  %v6165_v41 = vpop.f32.mrb[65].mxu0 }
0x4634   :  { %v6166_v42 = vadd.f32 %v6363_v9, %v6165_v41 }
0x4635   :  { %6177 = vst [vmem:[#allocation10 + $0x18] sm:$0xff] %v6171_v39 }
0x4636   :  { %6176 = vst [vmem:[#allocation10 + $0x10] sm:$0xff] %v6166_v42 }
0x4637   :  { %8038 = shalt.err (!%p8035_p8)
}
0x4638   :  { %s8039_s19 = scalar_lea.hbm %s9078_s10, 512 }
0x4639   :  { %p8040_p9 = scmp.ne.s32.totalorder %s9078_s10, %s8039_s19  ;;  %p8043_p10 = scmp.lt.u32.totalorder %s8039_s19, %s9078_s10 }
0x463b   :  { %p8045_p11 = pnand %p8043_p10, %p8040_p9 }
0x463d   :  { %8048 = shalt.err (!%p8045_p11)
}
0x463e   :  { %6189 = dma.vmem_to_hbm [thread:$0]  %s6184_s18, 512, %s9078_s10, [#allocation4], %s8059_s25, %s8059_s25, %s8060_s26  }
0x463f   :  { %8055 = dma.done.wait [#allocation4], 512  }
0x4640   :  { %8056 = vsyncadd [#allocation4], 4294966784 }
0x4641   :  { %6193 = vsyncpa [#allocation3], 1 }
0x4642   :  { %6194 = vsyncpa [#allocation6], 1 }
0x4643   :  { %6195 = vsyncpa [#allocation9], 1 }
0x4644   :  { %6196 = vsyncpa [#allocation4], 1 }

</bundles_post_ra>
